<compile_context>
chip_gen: v5e
topology: v5e:2x2
jax: 0.10.0
libtpu: 0.0.40
codegen_flags: <defaults>
</compile_context>

<pallas_src>
import functools

import jax
import jax.numpy as jnp
from jax import lax
from jax.experimental import pallas as pl
from jax.experimental.pallas import tpu as pltpu

# ---------------- model config (mamba-minimal ModelArgs semantics) ----------------
D_MODEL = 32
N_LAYER = 2
VOCAB = 64
D_STATE = 16
EXPAND = 2
D_CONV = 4
D_INNER = EXPAND * D_MODEL
DT_RANK = (D_MODEL + 15) // 16          # dt_rank = 'auto' -> ceil(d_model / 16)
EPS = 1e-5


def _silu(x):
    return x * jax.nn.sigmoid(x)


# ------------------------------- fused Pallas kernel --------------------------------
def _encoder_kernel(B, L,
                    ids_ref, emb_ref, rmsw_ref, winx_ref, winr_ref,
                    convw_ref, convb_ref, wb_ref, wc_ref, wdelta_ref,
                    bdt_ref, alogt_ref, dpar_ref, wout_ref, normf_ref,
                    o_ref,
                    dA_scr, dBu_scr, cm_scr, y_scr):
    """Whole encoder for one (B, L) batch; rows are time-major: row = t*B + b."""
    M = B * L
    Di, N, K, V = D_INNER, D_STATE, D_CONV, VOCAB

    # --- embedding as a one-hot matmul: the gather stays on the MXU, in VMEM ---
    ids = ids_ref[...]                                                    # (M, 1) i32
    onehot = (ids == lax.broadcasted_iota(jnp.int32, (M, V), 1)).astype(jnp.float32)
    x = jnp.dot(onehot, emb_ref[...], preferred_element_type=jnp.float32)  # (M, D)

    # iotas reused by the causal shift matrices of the depthwise conv
    r_io = lax.broadcasted_iota(jnp.int32, (M, M), 0)
    c_io = lax.broadcasted_iota(jnp.int32, (M, M), 1)

    for li in range(N_LAYER):                       # static unroll over layers
        rms_w  = rmsw_ref[li]                       # (1, D)
        w_in_x = winx_ref[li]                       # (D, Di)
        w_in_r = winr_ref[li]                       # (D, Di)
        conv_w = convw_ref[li]                      # (K, Di)
        conv_b = convb_ref[li]                      # (1, Di)
        w_b    = wb_ref[li]                         # (Di, N)
        w_c    = wc_ref[li]                         # (Di, N)
        w_dl   = wdelta_ref[li]                     # (Di, Di)  (= wx_dt @ w_dt)
        b_dt   = bdt_ref[li]                        # (1, Di)
        A_t    = -jnp.exp(alogt_ref[li])            # (N, Di)
        d_par  = dpar_ref[li]                       # (1, Di)
        w_out  = wout_ref[li]                       # (Di, D)

        # --- RMSNorm ---
        ms = jnp.mean(x * x, axis=-1, keepdims=True)
        xn = x * lax.rsqrt(ms + EPS) * rms_w                              # (M, D)

        # --- in_proj, split into two clean matmuls (conv path / gate path) ---
        xc  = jnp.dot(xn, w_in_x, preferred_element_type=jnp.float32)    # (M, Di)
        res = jnp.dot(xn, w_in_r, preferred_element_type=jnp.float32)    # (M, Di)

        # --- depthwise causal conv1d (pad K-1, truncate to L):
        # tap k reads x shifted down by j = K-1-k time steps; the shift + zero fill
        # is a tiny 0/1 (M, M) matrix on the MXU (no concatenate / misaligned slices).
        acc = conv_b + conv_w[K - 1:K, :] * xc                            # j = 0 tap
        for j in range(1, K):
            shift_mat = (c_io == r_io - j * B).astype(jnp.float32)        # (M, M)
            shifted = jnp.dot(shift_mat, xc, preferred_element_type=jnp.float32)
            acc = acc + conv_w[K - 1 - j:K - j, :] * shifted
        u = _silu(acc)                                                    # (M, Di)

        # --- x_proj / dt_proj (dt low-rank already folded into w_dl) ---
        Bm = jnp.dot(u, w_b, preferred_element_type=jnp.float32)          # (M, N)
        Cm = jnp.dot(u, w_c, preferred_element_type=jnp.float32)          # (M, N)
        delta = jax.nn.softplus(
            jnp.dot(u, w_dl, preferred_element_type=jnp.float32) + b_dt)  # (M, Di)

        # --- stage per-timestep scan operands in VMEM scratch (Di on lanes) ---
        dA_scr[...]  = jnp.exp(delta[:, None, :] * A_t[None, :, :])       # (M, N, Di)
        dBu_scr[...] = (delta * u)[:, None, :] * Bm[:, :, None]           # (M, N, Di)
        cm_scr[...]  = Cm[:, :, None]                                     # (M, N, 1)

        # --- selective scan: sequential over time, state (B, N, Di) ---
        def scan_step(i, state):
            r0 = pl.multiple_of(i * B, B)
            dA_i  = dA_scr[pl.ds(r0, B), :, :]                            # (B, N, Di)
            dBu_i = dBu_scr[pl.ds(r0, B), :, :]                           # (B, N, Di)
            cm_i  = cm_scr[pl.ds(r0, B), :, :]                            # (B, N, 1)
            state = dA_i * state + dBu_i
            y_scr[i] = jnp.sum(state * cm_i, axis=1)                      # (B, Di)
            return state

        lax.fori_loop(0, L, scan_step,
                      jnp.zeros((B, N, Di), jnp.float32), unroll=True)

        # reassemble y rows into the (M, Di) row view (static per-timestep reads)
        y = jnp.concatenate([y_scr[t] for t in range(L)], axis=0)         # (M, Di)

        y = (y + u * d_par) * _silu(res)                                  # D skip + gate
        x = x + jnp.dot(y, w_out, preferred_element_type=jnp.float32)     # residual

    # --- final RMSNorm ---
    ms = jnp.mean(x * x, axis=-1, keepdims=True)
    o_ref[...] = x * lax.rsqrt(ms + EPS) * normf_ref[...]


# ------------------------------- wrappers -------------------------------------------
def _full_spec(shape):
    nd = len(shape)

    def idx(i):
        return (0,) * nd

    return pl.BlockSpec(shape, idx)


def _pack_params(params):
    ls = params['layers']
    st = lambda xs: jnp.stack(xs, axis=0)
    return [
        params['emb'],                                      # (V, D)
        st([p['rms_w'] for p in ls]),                       # (NL, 1, D)
        st([p['w_in'][:, :D_INNER] for p in ls]),           # (NL, D, Di)   conv path
        st([p['w_in'][:, D_INNER:] for p in ls]),           # (NL, D, Di)   gate path
        st([p['conv_w_t'] for p in ls]),                    # (NL, K, Di)
        st([p['conv_b'] for p in ls]),                      # (NL, 1, Di)
        st([p['wx_b'] for p in ls]),                        # (NL, Di, N)
        st([p['wx_c'] for p in ls]),                        # (NL, Di, N)
        st([p['wx_dt'] @ p['w_dt'] for p in ls]),           # (NL, Di, Di)  dt folded
        st([p['b_dt'] for p in ls]),                        # (NL, 1, Di)
        st([p['a_log'].T for p in ls]),                     # (NL, N, Di)
        st([p['d_par'] for p in ls]),                       # (NL, 1, Di)
        st([p['w_out'] for p in ls]),                       # (NL, Di, D)
        params['norm_f'],                                   # (1, D)
    ]


def mamba_encoder(input_ids, params):
    B, L = input_ids.shape
    M = B * L
    ids_tm = input_ids.T.reshape(M, 1).astype(jnp.int32)    # time-major rows
    inputs = [ids_tm] + _pack_params(params)

    kernel = functools.partial(_encoder_kernel, B, L)
    out = pl.pallas_call(
        kernel,
        out_shape=jax.ShapeDtypeStruct((M, D_MODEL), jnp.float32),
        grid=(1,),
        in_specs=[_full_spec(a.shape) for a in inputs],
        out_specs=_full_spec((M, D_MODEL)),
        scratch_shapes=[
            pltpu.VMEM((M, D_STATE, D_INNER), jnp.float32),   # dA per step
            pltpu.VMEM((M, D_STATE, D_INNER), jnp.float32),   # dB*u per step
            pltpu.VMEM((M, D_STATE, 1), jnp.float32),         # C per step
            pltpu.VMEM((L, B, D_INNER), jnp.float32),         # y rows
        ],
        compiler_params=pltpu.CompilerParams(dimension_semantics=("arbitrary",)),
    )(*inputs)
    return out.reshape(L, B, D_MODEL).transpose(1, 0, 2)      # back to (B, L, D)


# ------------------------------- parameter init -------------------------------------
def init_params(key):
    keys = jax.random.split(key, 1 + N_LAYER)
    emb = 0.1 * jax.random.normal(keys[0], (VOCAB, D_MODEL), jnp.float32)
    layers = []
    for li in range(N_LAYER):
        ks = jax.random.split(keys[1 + li], 9)
        sc = 0.1
        layers.append(dict(
            rms_w=jnp.ones((1, D_MODEL), jnp.float32),
            w_in=sc * jax.random.normal(ks[0], (D_MODEL, 2 * D_INNER), jnp.float32),
            conv_w_t=sc * jax.random.normal(ks[1], (D_CONV, D_INNER), jnp.float32),
            conv_b=sc * jax.random.normal(ks[2], (1, D_INNER), jnp.float32),
            wx_dt=sc * jax.random.normal(ks[3], (D_INNER, DT_RANK), jnp.float32),
            wx_b=sc * jax.random.normal(ks[4], (D_INNER, D_STATE), jnp.float32),
            wx_c=sc * jax.random.normal(ks[5], (D_INNER, D_STATE), jnp.float32),
            w_dt=sc * jax.random.normal(ks[6], (DT_RANK, D_INNER), jnp.float32),
            b_dt=sc * jax.random.normal(ks[7], (1, D_INNER), jnp.float32),
            a_log=jnp.log(jnp.tile(jnp.arange(1, D_STATE + 1, dtype=jnp.float32)[None, :],
                                   (D_INNER, 1))),
            d_par=jnp.ones((1, D_INNER), jnp.float32),
            w_out=sc * jax.random.normal(ks[8], (D_INNER, D_MODEL), jnp.float32),
        ))
    return dict(emb=emb, layers=layers, norm_f=jnp.ones((1, D_MODEL), jnp.float32))


# ------------------------------- pure-JAX reference ---------------------------------
def ref_encoder(input_ids, params):
    Di, N, K = D_INNER, D_STATE, D_CONV
    x = params['emb'][input_ids]
    B, L, _ = x.shape
    for p in params['layers']:
        xn = x * lax.rsqrt(jnp.mean(x * x, -1, keepdims=True) + EPS) * p['rms_w'][0]
        xr = xn @ p['w_in']
        xc, res = xr[..., :Di], xr[..., Di:]
        xpad = jnp.pad(xc, ((0, 0), (K - 1, 0), (0, 0)))
        acc = jnp.zeros_like(xc) + p['conv_b'][0]
        for k in range(K):
            acc = acc + xpad[:, k:k + L, :] * p['conv_w_t'][k]
        u = _silu(acc)
        dtl, Bm, Cm = u @ p['wx_dt'], u @ p['wx_b'], u @ p['wx_c']
        delta = jax.nn.softplus(dtl @ p['w_dt'] + p['b_dt'][0])
        A = -jnp.exp(p['a_log'])
        dA = jnp.exp(delta[..., None] * A)
        dBu = (delta * u)[..., None] * Bm[:, :, None, :]
        state = jnp.zeros((B, Di, N), jnp.float32)
        ys = []
        for i in range(L):
            state = dA[:, i] * state + dBu[:, i]
            ys.append(jnp.einsum('bdn,bn->bd', state, Cm[:, i]))
        y = jnp.stack(ys, axis=1)
        y = (y + u * p['d_par'][0]) * _silu(res)
        x = x + y @ p['w_out']
    return x * lax.rsqrt(jnp.mean(x * x, -1, keepdims=True) + EPS) * params['norm_f'][0]


if __name__ == "__main__":
    key = jax.random.PRNGKey(0)
    pkey, ikey = jax.random.split(key)
    params = init_params(pkey)

    B, L = 2, 8
    input_ids = jax.random.randint(ikey, (B, L), 0, VOCAB, dtype=jnp.int32)

    out = mamba_encoder(input_ids, params)
    out = jax.block_until_ready(out)
    assert out.shape == (B, L, D_MODEL) and out.dtype == jnp.float32

    ref = ref_encoder(input_ids, params)
    if not jnp.allclose(out, ref, atol=2e-2, rtol=2e-2):
        raise AssertionError("Pallas output mismatch vs pure-JAX reference, "
                             f"max abs diff = {float(jnp.max(jnp.abs(out - ref)))}")

    print("KERNEL_OK")
</pallas_src>

<mosaic_0001>
module attributes {stable_mosaic.version = 11 : i64} {
  func.func @_encoder_kernel(%arg0: i32, %arg1: memref<16x1xi32, #tpu.memory_space<vmem>>, %arg2: memref<64x32xf32, #tpu.memory_space<vmem>>, %arg3: memref<2x1x32xf32, #tpu.memory_space<vmem>>, %arg4: memref<2x32x64xf32, #tpu.memory_space<vmem>>, %arg5: memref<2x32x64xf32, #tpu.memory_space<vmem>>, %arg6: memref<2x4x64xf32, #tpu.memory_space<vmem>>, %arg7: memref<2x1x64xf32, #tpu.memory_space<vmem>>, %arg8: memref<2x64x16xf32, #tpu.memory_space<vmem>>, %arg9: memref<2x64x16xf32, #tpu.memory_space<vmem>>, %arg10: memref<2x64x64xf32, #tpu.memory_space<vmem>>, %arg11: memref<2x1x64xf32, #tpu.memory_space<vmem>>, %arg12: memref<2x16x64xf32, #tpu.memory_space<vmem>>, %arg13: memref<2x1x64xf32, #tpu.memory_space<vmem>>, %arg14: memref<2x64x32xf32, #tpu.memory_space<vmem>>, %arg15: memref<1x32xf32, #tpu.memory_space<vmem>>, %arg16: memref<16x32xf32, #tpu.memory_space<vmem>>, %arg17: memref<16x16x64xf32, #tpu.memory_space<vmem>>, %arg18: memref<16x16x64xf32, #tpu.memory_space<vmem>>, %arg19: memref<16x16x1xf32, #tpu.memory_space<vmem>>, %arg20: memref<8x2x64xf32, #tpu.memory_space<vmem>>) attributes {dimension_semantics = [#tpu.dimension_semantics<arbitrary>], iteration_bounds = array<i64: 1>, scalar_prefetch = 0 : i64, scratch_operands = 4 : i64, tpu.core_type = #tpu.core_type<tc>, window_params = [{pipeline_mode = #tpu.pipeline_mode<synchronous>, transform_indices = @transform_0, window_bounds = array<i64: 16, 1>}, {pipeline_mode = #tpu.pipeline_mode<synchronous>, transform_indices = @transform_1, window_bounds = array<i64: 64, 32>}, {pipeline_mode = #tpu.pipeline_mode<synchronous>, transform_indices = @transform_2, window_bounds = array<i64: 2, 1, 32>}, {pipeline_mode = #tpu.pipeline_mode<synchronous>, transform_indices = @transform_3, window_bounds = array<i64: 2, 32, 64>}, {pipeline_mode = #tpu.pipeline_mode<synchronous>, transform_indices = @transform_4, window_bounds = array<i64: 2, 32, 64>}, {pipeline_mode = #tpu.pipeline_mode<synchronous>, transform_indices = @transform_5, window_bounds = array<i64: 2, 4, 64>}, {pipeline_mode = #tpu.pipeline_mode<synchronous>, transform_indices = @transform_6, window_bounds = array<i64: 2, 1, 64>}, {pipeline_mode = #tpu.pipeline_mode<synchronous>, transform_indices = @transform_7, window_bounds = array<i64: 2, 64, 16>}, {pipeline_mode = #tpu.pipeline_mode<synchronous>, transform_indices = @transform_8, window_bounds = array<i64: 2, 64, 16>}, {pipeline_mode = #tpu.pipeline_mode<synchronous>, transform_indices = @transform_9, window_bounds = array<i64: 2, 64, 64>}, {pipeline_mode = #tpu.pipeline_mode<synchronous>, transform_indices = @transform_10, window_bounds = array<i64: 2, 1, 64>}, {pipeline_mode = #tpu.pipeline_mode<synchronous>, transform_indices = @transform_11, window_bounds = array<i64: 2, 16, 64>}, {pipeline_mode = #tpu.pipeline_mode<synchronous>, transform_indices = @transform_12, window_bounds = array<i64: 2, 1, 64>}, {pipeline_mode = #tpu.pipeline_mode<synchronous>, transform_indices = @transform_13, window_bounds = array<i64: 2, 64, 32>}, {pipeline_mode = #tpu.pipeline_mode<synchronous>, transform_indices = @transform_14, window_bounds = array<i64: 1, 32>}, {pipeline_mode = #tpu.pipeline_mode<synchronous>, transform_indices = @transform_15, window_bounds = array<i64: 16, 32>}]} {
    %c0 = arith.constant 0 : index
    %c0_0 = arith.constant 0 : index
    %0 = vector.load %arg1[%c0, %c0_0] : memref<16x1xi32, #tpu.memory_space<vmem>>, vector<16x1xi32>
    %1 = tpu.iota {dimensions = array<i32: 1>} : vector<16x64xi32>
    %2 = vector.broadcast %0 : vector<16x1xi32> to vector<16x64xi32>
    %3 = arith.cmpi eq, %2, %1 : vector<16x64xi32>
    %4 = arith.extui %3 : vector<16x64xi1> to vector<16x64xi32>
    %5 = arith.sitofp %4 : vector<16x64xi32> to vector<16x64xf32>
    %c0_1 = arith.constant 0 : index
    %c0_2 = arith.constant 0 : index
    %6 = vector.load %arg2[%c0_1, %c0_2] : memref<64x32xf32, #tpu.memory_space<vmem>>, vector<64x32xf32>
    %cst = arith.constant dense<0.000000e+00> : vector<16x32xf32>
    %7 = tpu.matmul %5, %6, %cst {dimension_numbers = #tpu.dot_dimension_numbers<[1], [0], [0], [1], [0, 0, 1, 1], [], []>} : vector<16x64xf32>, vector<64x32xf32>, vector<16x32xf32> -> vector<16x32xf32>
    %8 = tpu.iota {dimensions = array<i32: 0>} : vector<16x16xi32>
    %9 = tpu.iota {dimensions = array<i32: 1>} : vector<16x16xi32>
    %c0_3 = arith.constant 0 : index
    %c0_4 = arith.constant 0 : index
    %c0_5 = arith.constant 0 : index
    %10 = vector.load %arg3[%c0_3, %c0_4, %c0_5] : memref<2x1x32xf32, #tpu.memory_space<vmem>>, vector<1x1x32xf32>
    %11 = vector.shape_cast %10 : vector<1x1x32xf32> to vector<1x32xf32>
    %c0_6 = arith.constant 0 : index
    %c0_7 = arith.constant 0 : index
    %c0_8 = arith.constant 0 : index
    %12 = vector.load %arg4[%c0_6, %c0_7, %c0_8] : memref<2x32x64xf32, #tpu.memory_space<vmem>>, vector<1x32x64xf32>
    %13 = vector.shape_cast %12 : vector<1x32x64xf32> to vector<32x64xf32>
    %c0_9 = arith.constant 0 : index
    %c0_10 = arith.constant 0 : index
    %c0_11 = arith.constant 0 : index
    %14 = vector.load %arg5[%c0_9, %c0_10, %c0_11] : memref<2x32x64xf32, #tpu.memory_space<vmem>>, vector<1x32x64xf32>
    %15 = vector.shape_cast %14 : vector<1x32x64xf32> to vector<32x64xf32>
    %c0_12 = arith.constant 0 : index
    %c0_13 = arith.constant 0 : index
    %c0_14 = arith.constant 0 : index
    %16 = vector.load %arg6[%c0_12, %c0_13, %c0_14] : memref<2x4x64xf32, #tpu.memory_space<vmem>>, vector<1x4x64xf32>
    %17 = vector.shape_cast %16 : vector<1x4x64xf32> to vector<4x64xf32>
    %c0_15 = arith.constant 0 : index
    %c0_16 = arith.constant 0 : index
    %c0_17 = arith.constant 0 : index
    %18 = vector.load %arg7[%c0_15, %c0_16, %c0_17] : memref<2x1x64xf32, #tpu.memory_space<vmem>>, vector<1x1x64xf32>
    %19 = vector.shape_cast %18 : vector<1x1x64xf32> to vector<1x64xf32>
    %c0_18 = arith.constant 0 : index
    %c0_19 = arith.constant 0 : index
    %c0_20 = arith.constant 0 : index
    %20 = vector.load %arg8[%c0_18, %c0_19, %c0_20] : memref<2x64x16xf32, #tpu.memory_space<vmem>>, vector<1x64x16xf32>
    %21 = vector.shape_cast %20 : vector<1x64x16xf32> to vector<64x16xf32>
    %c0_21 = arith.constant 0 : index
    %c0_22 = arith.constant 0 : index
    %c0_23 = arith.constant 0 : index
    %22 = vector.load %arg9[%c0_21, %c0_22, %c0_23] : memref<2x64x16xf32, #tpu.memory_space<vmem>>, vector<1x64x16xf32>
    %23 = vector.shape_cast %22 : vector<1x64x16xf32> to vector<64x16xf32>
    %c0_24 = arith.constant 0 : index
    %c0_25 = arith.constant 0 : index
    %c0_26 = arith.constant 0 : index
    %24 = vector.load %arg10[%c0_24, %c0_25, %c0_26] : memref<2x64x64xf32, #tpu.memory_space<vmem>>, vector<1x64x64xf32>
    %25 = vector.shape_cast %24 : vector<1x64x64xf32> to vector<64x64xf32>
    %c0_27 = arith.constant 0 : index
    %c0_28 = arith.constant 0 : index
    %c0_29 = arith.constant 0 : index
    %26 = vector.load %arg11[%c0_27, %c0_28, %c0_29] : memref<2x1x64xf32, #tpu.memory_space<vmem>>, vector<1x1x64xf32>
    %27 = vector.shape_cast %26 : vector<1x1x64xf32> to vector<1x64xf32>
    %c0_30 = arith.constant 0 : index
    %c0_31 = arith.constant 0 : index
    %c0_32 = arith.constant 0 : index
    %28 = vector.load %arg12[%c0_30, %c0_31, %c0_32] : memref<2x16x64xf32, #tpu.memory_space<vmem>>, vector<1x16x64xf32>
    %29 = vector.shape_cast %28 : vector<1x16x64xf32> to vector<16x64xf32>
    %30 = math.exp %29 : vector<16x64xf32>
    %cst_33 = arith.constant 0.000000e+00 : f32
    %31 = vector.broadcast %cst_33 : f32 to vector<16x64xf32>
    %32 = arith.subf %31, %30 : vector<16x64xf32>
    %c0_34 = arith.constant 0 : index
    %c0_35 = arith.constant 0 : index
    %c0_36 = arith.constant 0 : index
    %33 = vector.load %arg13[%c0_34, %c0_35, %c0_36] : memref<2x1x64xf32, #tpu.memory_space<vmem>>, vector<1x1x64xf32>
    %34 = vector.shape_cast %33 : vector<1x1x64xf32> to vector<1x64xf32>
    %c0_37 = arith.constant 0 : index
    %c0_38 = arith.constant 0 : index
    %c0_39 = arith.constant 0 : index
    %35 = vector.load %arg14[%c0_37, %c0_38, %c0_39] : memref<2x64x32xf32, #tpu.memory_space<vmem>>, vector<1x64x32xf32>
    %36 = vector.shape_cast %35 : vector<1x64x32xf32> to vector<64x32xf32>
    %37 = arith.mulf %7, %7 : vector<16x32xf32>
    %cst_40 = arith.constant dense<0.000000e+00> : vector<16xf32>
    %38 = vector.multi_reduction <add>, %37, %cst_40 [1] : vector<16x32xf32> to vector<16xf32>
    %39 = vector.shape_cast %38 : vector<16xf32> to vector<16x1xf32>
    %cst_41 = arith.constant 3.200000e+01 : f32
    %40 = vector.broadcast %cst_41 : f32 to vector<16x1xf32>
    %41 = arith.divf %39, %40 : vector<16x1xf32>
    %cst_42 = arith.constant 9.99999974E-6 : f32
    %42 = vector.broadcast %cst_42 : f32 to vector<16x1xf32>
    %43 = arith.addf %41, %42 : vector<16x1xf32>
    %44 = math.rsqrt %43 : vector<16x1xf32>
    %45 = vector.broadcast %44 : vector<16x1xf32> to vector<16x32xf32>
    %46 = arith.mulf %7, %45 : vector<16x32xf32>
    %47 = vector.broadcast %11 : vector<1x32xf32> to vector<16x32xf32>
    %48 = arith.mulf %46, %47 : vector<16x32xf32>
    %cst_43 = arith.constant dense<0.000000e+00> : vector<16x64xf32>
    %49 = tpu.matmul %48, %13, %cst_43 {dimension_numbers = #tpu.dot_dimension_numbers<[1], [0], [0], [1], [0, 0, 1, 1], [], []>} : vector<16x32xf32>, vector<32x64xf32>, vector<16x64xf32> -> vector<16x64xf32>
    %cst_44 = arith.constant dense<0.000000e+00> : vector<16x64xf32>
    %50 = tpu.matmul %48, %15, %cst_44 {dimension_numbers = #tpu.dot_dimension_numbers<[1], [0], [0], [1], [0, 0, 1, 1], [], []>} : vector<16x32xf32>, vector<32x64xf32>, vector<16x64xf32> -> vector<16x64xf32>
    %51 = vector.extract_strided_slice %17 {offsets = [3, 0], sizes = [1, 64], strides = [1, 1]} : vector<4x64xf32> to vector<1x64xf32>
    %52 = vector.broadcast %51 : vector<1x64xf32> to vector<16x64xf32>
    %53 = arith.mulf %52, %49 : vector<16x64xf32>
    %54 = vector.broadcast %19 : vector<1x64xf32> to vector<16x64xf32>
    %55 = arith.addf %54, %53 : vector<16x64xf32>
    %c2_i32 = arith.constant 2 : i32
    %56 = vector.broadcast %c2_i32 : i32 to vector<16x16xi32>
    %57 = arith.subi %8, %56 : vector<16x16xi32>
    %58 = arith.cmpi eq, %9, %57 : vector<16x16xi32>
    %59 = arith.extui %58 : vector<16x16xi1> to vector<16x16xi32>
    %60 = arith.sitofp %59 : vector<16x16xi32> to vector<16x16xf32>
    %cst_45 = arith.constant dense<0.000000e+00> : vector<16x64xf32>
    %61 = tpu.matmul %60, %49, %cst_45 {dimension_numbers = #tpu.dot_dimension_numbers<[1], [0], [0], [1], [0, 0, 1, 1], [], []>} : vector<16x16xf32>, vector<16x64xf32>, vector<16x64xf32> -> vector<16x64xf32>
    %62 = vector.extract_strided_slice %17 {offsets = [2, 0], sizes = [1, 64], strides = [1, 1]} : vector<4x64xf32> to vector<1x64xf32>
    %63 = vector.broadcast %62 : vector<1x64xf32> to vector<16x64xf32>
    %64 = arith.mulf %63, %61 : vector<16x64xf32>
    %65 = arith.addf %55, %64 : vector<16x64xf32>
    %c4_i32 = arith.constant 4 : i32
    %66 = vector.broadcast %c4_i32 : i32 to vector<16x16xi32>
    %67 = arith.subi %8, %66 : vector<16x16xi32>
    %68 = arith.cmpi eq, %9, %67 : vector<16x16xi32>
    %69 = arith.extui %68 : vector<16x16xi1> to vector<16x16xi32>
    %70 = arith.sitofp %69 : vector<16x16xi32> to vector<16x16xf32>
    %cst_46 = arith.constant dense<0.000000e+00> : vector<16x64xf32>
    %71 = tpu.matmul %70, %49, %cst_46 {dimension_numbers = #tpu.dot_dimension_numbers<[1], [0], [0], [1], [0, 0, 1, 1], [], []>} : vector<16x16xf32>, vector<16x64xf32>, vector<16x64xf32> -> vector<16x64xf32>
    %72 = vector.extract_strided_slice %17 {offsets = [1, 0], sizes = [1, 64], strides = [1, 1]} : vector<4x64xf32> to vector<1x64xf32>
    %73 = vector.broadcast %72 : vector<1x64xf32> to vector<16x64xf32>
    %74 = arith.mulf %73, %71 : vector<16x64xf32>
    %75 = arith.addf %65, %74 : vector<16x64xf32>
    %c6_i32 = arith.constant 6 : i32
    %76 = vector.broadcast %c6_i32 : i32 to vector<16x16xi32>
    %77 = arith.subi %8, %76 : vector<16x16xi32>
    %78 = arith.cmpi eq, %9, %77 : vector<16x16xi32>
    %79 = arith.extui %78 : vector<16x16xi1> to vector<16x16xi32>
    %80 = arith.sitofp %79 : vector<16x16xi32> to vector<16x16xf32>
    %cst_47 = arith.constant dense<0.000000e+00> : vector<16x64xf32>
    %81 = tpu.matmul %80, %49, %cst_47 {dimension_numbers = #tpu.dot_dimension_numbers<[1], [0], [0], [1], [0, 0, 1, 1], [], []>} : vector<16x16xf32>, vector<16x64xf32>, vector<16x64xf32> -> vector<16x64xf32>
    %82 = vector.extract_strided_slice %17 {offsets = [0, 0], sizes = [1, 64], strides = [1, 1]} : vector<4x64xf32> to vector<1x64xf32>
    %83 = vector.broadcast %82 : vector<1x64xf32> to vector<16x64xf32>
    %84 = arith.mulf %83, %81 : vector<16x64xf32>
    %85 = arith.addf %75, %84 : vector<16x64xf32>
    %86 = arith.negf %85 : vector<16x64xf32>
    %87 = math.exp %86 : vector<16x64xf32>
    %cst_48 = arith.constant 1.000000e+00 : f32
    %88 = vector.broadcast %cst_48 : f32 to vector<16x64xf32>
    %89 = arith.addf %88, %87 : vector<16x64xf32>
    %90 = arith.divf %88, %89 : vector<16x64xf32>
    %91 = arith.mulf %85, %90 : vector<16x64xf32>
    %cst_49 = arith.constant dense<0.000000e+00> : vector<16x16xf32>
    %92 = tpu.matmul %91, %21, %cst_49 {dimension_numbers = #tpu.dot_dimension_numbers<[1], [0], [0], [1], [0, 0, 1, 1], [], []>} : vector<16x64xf32>, vector<64x16xf32>, vector<16x16xf32> -> vector<16x16xf32>
    %cst_50 = arith.constant dense<0.000000e+00> : vector<16x16xf32>
    %93 = tpu.matmul %91, %23, %cst_50 {dimension_numbers = #tpu.dot_dimension_numbers<[1], [0], [0], [1], [0, 0, 1, 1], [], []>} : vector<16x64xf32>, vector<64x16xf32>, vector<16x16xf32> -> vector<16x16xf32>
    %cst_51 = arith.constant dense<0.000000e+00> : vector<16x64xf32>
    %94 = tpu.matmul %91, %25, %cst_51 {dimension_numbers = #tpu.dot_dimension_numbers<[1], [0], [0], [1], [0, 0, 1, 1], [], []>} : vector<16x64xf32>, vector<64x64xf32>, vector<16x64xf32> -> vector<16x64xf32>
    %95 = vector.broadcast %27 : vector<1x64xf32> to vector<16x64xf32>
    %96 = arith.addf %94, %95 : vector<16x64xf32>
    %cst_52 = arith.constant 0.000000e+00 : f32
    %97 = vector.broadcast %cst_52 : f32 to vector<16x64xf32>
    %98 = arith.maximumf %96, %97 : vector<16x64xf32>
    %99 = vector.broadcast %cst_52 : f32 to vector<16x64xf32>
    %100 = arith.subf %96, %99 : vector<16x64xf32>
    %101 = arith.cmpf one, %100, %100 : vector<16x64xf32>
    %102 = vector.broadcast %cst_52 : f32 to vector<16x64xf32>
    %103 = arith.addf %96, %102 : vector<16x64xf32>
    %104 = math.absf %100 : vector<16x64xf32>
    %cst_53 = arith.constant 0.000000e+00 : f32
    %105 = vector.broadcast %cst_53 : f32 to vector<16x64xf32>
    %106 = arith.subf %105, %104 : vector<16x64xf32>
    %107 = math.exp %106 : vector<16x64xf32>
    %108 = math.log1p %107 : vector<16x64xf32>
    %109 = arith.addf %98, %108 : vector<16x64xf32>
    %110 = arith.select %101, %103, %109 : vector<16x64xi1>, vector<16x64xf32>
    %111 = vector.shape_cast %110 : vector<16x64xf32> to vector<16x1x64xf32>
    %112 = vector.shape_cast %32 : vector<16x64xf32> to vector<1x16x64xf32>
    %113 = vector.broadcast %111 : vector<16x1x64xf32> to vector<16x16x64xf32>
    %114 = vector.broadcast %112 : vector<1x16x64xf32> to vector<16x16x64xf32>
    %115 = arith.mulf %113, %114 : vector<16x16x64xf32>
    %116 = math.exp %115 : vector<16x16x64xf32>
    %c0_54 = arith.constant 0 : index
    %c0_55 = arith.constant 0 : index
    %c0_56 = arith.constant 0 : index
    %117 = vector.load %arg17[%c0_54, %c0_55, %c0_56] : memref<16x16x64xf32, #tpu.memory_space<vmem>>, vector<16x16x64xf32>
    tpu.vector_store %arg17[%c0_54, %c0_55, %c0_56], %116 {strides = array<i32>} : memref<16x16x64xf32, #tpu.memory_space<vmem>>, vector<16x16x64xf32>,
    %118 = arith.mulf %110, %91 : vector<16x64xf32>
    %119 = vector.shape_cast %118 : vector<16x64xf32> to vector<16x1x64xf32>
    %120 = vector.shape_cast %92 : vector<16x16xf32> to vector<16x16x1xf32>
    %121 = vector.broadcast %119 : vector<16x1x64xf32> to vector<16x16x64xf32>
    %122 = vector.broadcast %120 : vector<16x16x1xf32> to vector<16x16x64xf32>
    %123 = arith.mulf %121, %122 : vector<16x16x64xf32>
    %c0_57 = arith.constant 0 : index
    %c0_58 = arith.constant 0 : index
    %c0_59 = arith.constant 0 : index
    %124 = vector.load %arg18[%c0_57, %c0_58, %c0_59] : memref<16x16x64xf32, #tpu.memory_space<vmem>>, vector<16x16x64xf32>
    tpu.vector_store %arg18[%c0_57, %c0_58, %c0_59], %123 {strides = array<i32>} : memref<16x16x64xf32, #tpu.memory_space<vmem>>, vector<16x16x64xf32>,
    %125 = vector.shape_cast %93 : vector<16x16xf32> to vector<16x16x1xf32>
    %c0_60 = arith.constant 0 : index
    %c0_61 = arith.constant 0 : index
    %c0_62 = arith.constant 0 : index
    %126 = vector.load %arg19[%c0_60, %c0_61, %c0_62] : memref<16x16x1xf32, #tpu.memory_space<vmem>>, vector<16x16x1xf32>
    tpu.vector_store %arg19[%c0_60, %c0_61, %c0_62], %125 {strides = array<i32>} : memref<16x16x1xf32, #tpu.memory_space<vmem>>, vector<16x16x1xf32>,
    %cst_63 = arith.constant 0.000000e+00 : f32
    %127 = vector.broadcast %cst_63 : f32 to vector<2x16x64xf32>
    %c0_i32 = arith.constant 0 : i32
    %c2_i32_64 = arith.constant 2 : i32
    %128 = arith.muli %c0_i32, %c2_i32_64 : i32
    %129 = tpu.assume_multiple %128, 2 : i32
    %130 = arith.index_cast %129 : i32 to index
    %c0_65 = arith.constant 0 : index
    %c0_66 = arith.constant 0 : index
    %131 = vector.load %arg17[%130, %c0_65, %c0_66] : memref<16x16x64xf32, #tpu.memory_space<vmem>>, vector<2x16x64xf32>
    %132 = arith.index_cast %129 : i32 to index
    %c0_67 = arith.constant 0 : index
    %c0_68 = arith.constant 0 : index
    %133 = vector.load %arg18[%132, %c0_67, %c0_68] : memref<16x16x64xf32, #tpu.memory_space<vmem>>, vector<2x16x64xf32>
    %134 = arith.index_cast %129 : i32 to index
    %c0_69 = arith.constant 0 : index
    %c0_70 = arith.constant 0 : index
    %135 = vector.load %arg19[%134, %c0_69, %c0_70] : memref<16x16x1xf32, #tpu.memory_space<vmem>>, vector<2x16x1xf32>
    %136 = arith.mulf %131, %127 : vector<2x16x64xf32>
    %137 = arith.addf %136, %133 : vector<2x16x64xf32>
    %138 = vector.broadcast %135 : vector<2x16x1xf32> to vector<2x16x64xf32>
    %139 = arith.mulf %137, %138 : vector<2x16x64xf32>
    %cst_71 = arith.constant dense<0.000000e+00> : vector<2x64xf32>
    %140 = vector.multi_reduction <add>, %139, %cst_71 [1] : vector<2x16x64xf32> to vector<2x64xf32>
    %141 = arith.index_cast %c0_i32 : i32 to index
    %c0_72 = arith.constant 0 : index
    %c0_73 = arith.constant 0 : index
    %142 = vector.load %arg20[%141, %c0_72, %c0_73] : memref<8x2x64xf32, #tpu.memory_space<vmem>>, vector<1x2x64xf32>
    %143 = vector.shape_cast %142 : vector<1x2x64xf32> to vector<2x64xf32>
    %144 = vector.shape_cast %140 : vector<2x64xf32> to vector<1x2x64xf32>
    tpu.vector_store %arg20[%141, %c0_72, %c0_73], %144 {strides = array<i32>} : memref<8x2x64xf32, #tpu.memory_space<vmem>>, vector<1x2x64xf32>,
    %c1_i32 = arith.constant 1 : i32
    %c2_i32_74 = arith.constant 2 : i32
    %145 = arith.muli %c1_i32, %c2_i32_74 : i32
    %146 = tpu.assume_multiple %145, 2 : i32
    %147 = arith.index_cast %146 : i32 to index
    %c0_75 = arith.constant 0 : index
    %c0_76 = arith.constant 0 : index
    %148 = vector.load %arg17[%147, %c0_75, %c0_76] : memref<16x16x64xf32, #tpu.memory_space<vmem>>, vector<2x16x64xf32>
    %149 = arith.index_cast %146 : i32 to index
    %c0_77 = arith.constant 0 : index
    %c0_78 = arith.constant 0 : index
    %150 = vector.load %arg18[%149, %c0_77, %c0_78] : memref<16x16x64xf32, #tpu.memory_space<vmem>>, vector<2x16x64xf32>
    %151 = arith.index_cast %146 : i32 to index
    %c0_79 = arith.constant 0 : index
    %c0_80 = arith.constant 0 : index
    %152 = vector.load %arg19[%151, %c0_79, %c0_80] : memref<16x16x1xf32, #tpu.memory_space<vmem>>, vector<2x16x1xf32>
    %153 = arith.mulf %148, %137 : vector<2x16x64xf32>
    %154 = arith.addf %153, %150 : vector<2x16x64xf32>
    %155 = vector.broadcast %152 : vector<2x16x1xf32> to vector<2x16x64xf32>
    %156 = arith.mulf %154, %155 : vector<2x16x64xf32>
    %cst_81 = arith.constant dense<0.000000e+00> : vector<2x64xf32>
    %157 = vector.multi_reduction <add>, %156, %cst_81 [1] : vector<2x16x64xf32> to vector<2x64xf32>
    %158 = arith.index_cast %c1_i32 : i32 to index
    %c0_82 = arith.constant 0 : index
    %c0_83 = arith.constant 0 : index
    %159 = vector.load %arg20[%158, %c0_82, %c0_83] : memref<8x2x64xf32, #tpu.memory_space<vmem>>, vector<1x2x64xf32>
    %160 = vector.shape_cast %159 : vector<1x2x64xf32> to vector<2x64xf32>
    %161 = vector.shape_cast %157 : vector<2x64xf32> to vector<1x2x64xf32>
    tpu.vector_store %arg20[%158, %c0_82, %c0_83], %161 {strides = array<i32>} : memref<8x2x64xf32, #tpu.memory_space<vmem>>, vector<1x2x64xf32>,
    %c2_i32_84 = arith.constant 2 : i32
    %c2_i32_85 = arith.constant 2 : i32
    %162 = arith.muli %c2_i32_84, %c2_i32_85 : i32
    %163 = tpu.assume_multiple %162, 2 : i32
    %164 = arith.index_cast %163 : i32 to index
    %c0_86 = arith.constant 0 : index
    %c0_87 = arith.constant 0 : index
    %165 = vector.load %arg17[%164, %c0_86, %c0_87] : memref<16x16x64xf32, #tpu.memory_space<vmem>>, vector<2x16x64xf32>
    %166 = arith.index_cast %163 : i32 to index
    %c0_88 = arith.constant 0 : index
    %c0_89 = arith.constant 0 : index
    %167 = vector.load %arg18[%166, %c0_88, %c0_89] : memref<16x16x64xf32, #tpu.memory_space<vmem>>, vector<2x16x64xf32>
    %168 = arith.index_cast %163 : i32 to index
    %c0_90 = arith.constant 0 : index
    %c0_91 = arith.constant 0 : index
    %169 = vector.load %arg19[%168, %c0_90, %c0_91] : memref<16x16x1xf32, #tpu.memory_space<vmem>>, vector<2x16x1xf32>
    %170 = arith.mulf %165, %154 : vector<2x16x64xf32>
    %171 = arith.addf %170, %167 : vector<2x16x64xf32>
    %172 = vector.broadcast %169 : vector<2x16x1xf32> to vector<2x16x64xf32>
    %173 = arith.mulf %171, %172 : vector<2x16x64xf32>
    %cst_92 = arith.constant dense<0.000000e+00> : vector<2x64xf32>
    %174 = vector.multi_reduction <add>, %173, %cst_92 [1] : vector<2x16x64xf32> to vector<2x64xf32>
    %175 = arith.index_cast %c2_i32_84 : i32 to index
    %c0_93 = arith.constant 0 : index
    %c0_94 = arith.constant 0 : index
    %176 = vector.load %arg20[%175, %c0_93, %c0_94] : memref<8x2x64xf32, #tpu.memory_space<vmem>>, vector<1x2x64xf32>
    %177 = vector.shape_cast %176 : vector<1x2x64xf32> to vector<2x64xf32>
    %178 = vector.shape_cast %174 : vector<2x64xf32> to vector<1x2x64xf32>
    tpu.vector_store %arg20[%175, %c0_93, %c0_94], %178 {strides = array<i32>} : memref<8x2x64xf32, #tpu.memory_space<vmem>>, vector<1x2x64xf32>,
    %c3_i32 = arith.constant 3 : i32
    %c2_i32_95 = arith.constant 2 : i32
    %179 = arith.muli %c3_i32, %c2_i32_95 : i32
    %180 = tpu.assume_multiple %179, 2 : i32
    %181 = arith.index_cast %180 : i32 to index
    %c0_96 = arith.constant 0 : index
    %c0_97 = arith.constant 0 : index
    %182 = vector.load %arg17[%181, %c0_96, %c0_97] : memref<16x16x64xf32, #tpu.memory_space<vmem>>, vector<2x16x64xf32>
    %183 = arith.index_cast %180 : i32 to index
    %c0_98 = arith.constant 0 : index
    %c0_99 = arith.constant 0 : index
    %184 = vector.load %arg18[%183, %c0_98, %c0_99] : memref<16x16x64xf32, #tpu.memory_space<vmem>>, vector<2x16x64xf32>
    %185 = arith.index_cast %180 : i32 to index
    %c0_100 = arith.constant 0 : index
    %c0_101 = arith.constant 0 : index
    %186 = vector.load %arg19[%185, %c0_100, %c0_101] : memref<16x16x1xf32, #tpu.memory_space<vmem>>, vector<2x16x1xf32>
    %187 = arith.mulf %182, %171 : vector<2x16x64xf32>
    %188 = arith.addf %187, %184 : vector<2x16x64xf32>
    %189 = vector.broadcast %186 : vector<2x16x1xf32> to vector<2x16x64xf32>
    %190 = arith.mulf %188, %189 : vector<2x16x64xf32>
    %cst_102 = arith.constant dense<0.000000e+00> : vector<2x64xf32>
    %191 = vector.multi_reduction <add>, %190, %cst_102 [1] : vector<2x16x64xf32> to vector<2x64xf32>
    %192 = arith.index_cast %c3_i32 : i32 to index
    %c0_103 = arith.constant 0 : index
    %c0_104 = arith.constant 0 : index
    %193 = vector.load %arg20[%192, %c0_103, %c0_104] : memref<8x2x64xf32, #tpu.memory_space<vmem>>, vector<1x2x64xf32>
    %194 = vector.shape_cast %193 : vector<1x2x64xf32> to vector<2x64xf32>
    %195 = vector.shape_cast %191 : vector<2x64xf32> to vector<1x2x64xf32>
    tpu.vector_store %arg20[%192, %c0_103, %c0_104], %195 {strides = array<i32>} : memref<8x2x64xf32, #tpu.memory_space<vmem>>, vector<1x2x64xf32>,
    %c4_i32_105 = arith.constant 4 : i32
    %c2_i32_106 = arith.constant 2 : i32
    %196 = arith.muli %c4_i32_105, %c2_i32_106 : i32
    %197 = tpu.assume_multiple %196, 2 : i32
    %198 = arith.index_cast %197 : i32 to index
    %c0_107 = arith.constant 0 : index
    %c0_108 = arith.constant 0 : index
    %199 = vector.load %arg17[%198, %c0_107, %c0_108] : memref<16x16x64xf32, #tpu.memory_space<vmem>>, vector<2x16x64xf32>
    %200 = arith.index_cast %197 : i32 to index
    %c0_109 = arith.constant 0 : index
    %c0_110 = arith.constant 0 : index
    %201 = vector.load %arg18[%200, %c0_109, %c0_110] : memref<16x16x64xf32, #tpu.memory_space<vmem>>, vector<2x16x64xf32>
    %202 = arith.index_cast %197 : i32 to index
    %c0_111 = arith.constant 0 : index
    %c0_112 = arith.constant 0 : index
    %203 = vector.load %arg19[%202, %c0_111, %c0_112] : memref<16x16x1xf32, #tpu.memory_space<vmem>>, vector<2x16x1xf32>
    %204 = arith.mulf %199, %188 : vector<2x16x64xf32>
    %205 = arith.addf %204, %201 : vector<2x16x64xf32>
    %206 = vector.broadcast %203 : vector<2x16x1xf32> to vector<2x16x64xf32>
    %207 = arith.mulf %205, %206 : vector<2x16x64xf32>
    %cst_113 = arith.constant dense<0.000000e+00> : vector<2x64xf32>
    %208 = vector.multi_reduction <add>, %207, %cst_113 [1] : vector<2x16x64xf32> to vector<2x64xf32>
    %209 = arith.index_cast %c4_i32_105 : i32 to index
    %c0_114 = arith.constant 0 : index
    %c0_115 = arith.constant 0 : index
    %210 = vector.load %arg20[%209, %c0_114, %c0_115] : memref<8x2x64xf32, #tpu.memory_space<vmem>>, vector<1x2x64xf32>
    %211 = vector.shape_cast %210 : vector<1x2x64xf32> to vector<2x64xf32>
    %212 = vector.shape_cast %208 : vector<2x64xf32> to vector<1x2x64xf32>
    tpu.vector_store %arg20[%209, %c0_114, %c0_115], %212 {strides = array<i32>} : memref<8x2x64xf32, #tpu.memory_space<vmem>>, vector<1x2x64xf32>,
    %c5_i32 = arith.constant 5 : i32
    %c2_i32_116 = arith.constant 2 : i32
    %213 = arith.muli %c5_i32, %c2_i32_116 : i32
    %214 = tpu.assume_multiple %213, 2 : i32
    %215 = arith.index_cast %214 : i32 to index
    %c0_117 = arith.constant 0 : index
    %c0_118 = arith.constant 0 : index
    %216 = vector.load %arg17[%215, %c0_117, %c0_118] : memref<16x16x64xf32, #tpu.memory_space<vmem>>, vector<2x16x64xf32>
    %217 = arith.index_cast %214 : i32 to index
    %c0_119 = arith.constant 0 : index
    %c0_120 = arith.constant 0 : index
    %218 = vector.load %arg18[%217, %c0_119, %c0_120] : memref<16x16x64xf32, #tpu.memory_space<vmem>>, vector<2x16x64xf32>
    %219 = arith.index_cast %214 : i32 to index
    %c0_121 = arith.constant 0 : index
    %c0_122 = arith.constant 0 : index
    %220 = vector.load %arg19[%219, %c0_121, %c0_122] : memref<16x16x1xf32, #tpu.memory_space<vmem>>, vector<2x16x1xf32>
    %221 = arith.mulf %216, %205 : vector<2x16x64xf32>
    %222 = arith.addf %221, %218 : vector<2x16x64xf32>
    %223 = vector.broadcast %220 : vector<2x16x1xf32> to vector<2x16x64xf32>
    %224 = arith.mulf %222, %223 : vector<2x16x64xf32>
    %cst_123 = arith.constant dense<0.000000e+00> : vector<2x64xf32>
    %225 = vector.multi_reduction <add>, %224, %cst_123 [1] : vector<2x16x64xf32> to vector<2x64xf32>
    %226 = arith.index_cast %c5_i32 : i32 to index
    %c0_124 = arith.constant 0 : index
    %c0_125 = arith.constant 0 : index
    %227 = vector.load %arg20[%226, %c0_124, %c0_125] : memref<8x2x64xf32, #tpu.memory_space<vmem>>, vector<1x2x64xf32>
    %228 = vector.shape_cast %227 : vector<1x2x64xf32> to vector<2x64xf32>
    %229 = vector.shape_cast %225 : vector<2x64xf32> to vector<1x2x64xf32>
    tpu.vector_store %arg20[%226, %c0_124, %c0_125], %229 {strides = array<i32>} : memref<8x2x64xf32, #tpu.memory_space<vmem>>, vector<1x2x64xf32>,
    %c6_i32_126 = arith.constant 6 : i32
    %c2_i32_127 = arith.constant 2 : i32
    %230 = arith.muli %c6_i32_126, %c2_i32_127 : i32
    %231 = tpu.assume_multiple %230, 2 : i32
    %232 = arith.index_cast %231 : i32 to index
    %c0_128 = arith.constant 0 : index
    %c0_129 = arith.constant 0 : index
    %233 = vector.load %arg17[%232, %c0_128, %c0_129] : memref<16x16x64xf32, #tpu.memory_space<vmem>>, vector<2x16x64xf32>
    %234 = arith.index_cast %231 : i32 to index
    %c0_130 = arith.constant 0 : index
    %c0_131 = arith.constant 0 : index
    %235 = vector.load %arg18[%234, %c0_130, %c0_131] : memref<16x16x64xf32, #tpu.memory_space<vmem>>, vector<2x16x64xf32>
    %236 = arith.index_cast %231 : i32 to index
    %c0_132 = arith.constant 0 : index
    %c0_133 = arith.constant 0 : index
    %237 = vector.load %arg19[%236, %c0_132, %c0_133] : memref<16x16x1xf32, #tpu.memory_space<vmem>>, vector<2x16x1xf32>
    %238 = arith.mulf %233, %222 : vector<2x16x64xf32>
    %239 = arith.addf %238, %235 : vector<2x16x64xf32>
    %240 = vector.broadcast %237 : vector<2x16x1xf32> to vector<2x16x64xf32>
    %241 = arith.mulf %239, %240 : vector<2x16x64xf32>
    %cst_134 = arith.constant dense<0.000000e+00> : vector<2x64xf32>
    %242 = vector.multi_reduction <add>, %241, %cst_134 [1] : vector<2x16x64xf32> to vector<2x64xf32>
    %243 = arith.index_cast %c6_i32_126 : i32 to index
    %c0_135 = arith.constant 0 : index
    %c0_136 = arith.constant 0 : index
    %244 = vector.load %arg20[%243, %c0_135, %c0_136] : memref<8x2x64xf32, #tpu.memory_space<vmem>>, vector<1x2x64xf32>
    %245 = vector.shape_cast %244 : vector<1x2x64xf32> to vector<2x64xf32>
    %246 = vector.shape_cast %242 : vector<2x64xf32> to vector<1x2x64xf32>
    tpu.vector_store %arg20[%243, %c0_135, %c0_136], %246 {strides = array<i32>} : memref<8x2x64xf32, #tpu.memory_space<vmem>>, vector<1x2x64xf32>,
    %c7_i32 = arith.constant 7 : i32
    %c2_i32_137 = arith.constant 2 : i32
    %247 = arith.muli %c7_i32, %c2_i32_137 : i32
    %248 = tpu.assume_multiple %247, 2 : i32
    %249 = arith.index_cast %248 : i32 to index
    %c0_138 = arith.constant 0 : index
    %c0_139 = arith.constant 0 : index
    %250 = vector.load %arg17[%249, %c0_138, %c0_139] : memref<16x16x64xf32, #tpu.memory_space<vmem>>, vector<2x16x64xf32>
    %251 = arith.index_cast %248 : i32 to index
    %c0_140 = arith.constant 0 : index
    %c0_141 = arith.constant 0 : index
    %252 = vector.load %arg18[%251, %c0_140, %c0_141] : memref<16x16x64xf32, #tpu.memory_space<vmem>>, vector<2x16x64xf32>
    %253 = arith.index_cast %248 : i32 to index
    %c0_142 = arith.constant 0 : index
    %c0_143 = arith.constant 0 : index
    %254 = vector.load %arg19[%253, %c0_142, %c0_143] : memref<16x16x1xf32, #tpu.memory_space<vmem>>, vector<2x16x1xf32>
    %255 = arith.mulf %250, %239 : vector<2x16x64xf32>
    %256 = arith.addf %255, %252 : vector<2x16x64xf32>
    %257 = vector.broadcast %254 : vector<2x16x1xf32> to vector<2x16x64xf32>
    %258 = arith.mulf %256, %257 : vector<2x16x64xf32>
    %cst_144 = arith.constant dense<0.000000e+00> : vector<2x64xf32>
    %259 = vector.multi_reduction <add>, %258, %cst_144 [1] : vector<2x16x64xf32> to vector<2x64xf32>
    %260 = arith.index_cast %c7_i32 : i32 to index
    %c0_145 = arith.constant 0 : index
    %c0_146 = arith.constant 0 : index
    %261 = vector.load %arg20[%260, %c0_145, %c0_146] : memref<8x2x64xf32, #tpu.memory_space<vmem>>, vector<1x2x64xf32>
    %262 = vector.shape_cast %261 : vector<1x2x64xf32> to vector<2x64xf32>
    %263 = vector.shape_cast %259 : vector<2x64xf32> to vector<1x2x64xf32>
    tpu.vector_store %arg20[%260, %c0_145, %c0_146], %263 {strides = array<i32>} : memref<8x2x64xf32, #tpu.memory_space<vmem>>, vector<1x2x64xf32>,
    %c8_i32 = arith.constant 8 : i32
    %c0_147 = arith.constant 0 : index
    %c0_148 = arith.constant 0 : index
    %c0_149 = arith.constant 0 : index
    %264 = vector.load %arg20[%c0_147, %c0_148, %c0_149] : memref<8x2x64xf32, #tpu.memory_space<vmem>>, vector<1x2x64xf32>
    %265 = vector.shape_cast %264 : vector<1x2x64xf32> to vector<2x64xf32>
    %c1 = arith.constant 1 : index
    %c0_150 = arith.constant 0 : index
    %c0_151 = arith.constant 0 : index
    %266 = vector.load %arg20[%c1, %c0_150, %c0_151] : memref<8x2x64xf32, #tpu.memory_space<vmem>>, vector<1x2x64xf32>
    %267 = vector.shape_cast %266 : vector<1x2x64xf32> to vector<2x64xf32>
    %c2 = arith.constant 2 : index
    %c0_152 = arith.constant 0 : index
    %c0_153 = arith.constant 0 : index
    %268 = vector.load %arg20[%c2, %c0_152, %c0_153] : memref<8x2x64xf32, #tpu.memory_space<vmem>>, vector<1x2x64xf32>
    %269 = vector.shape_cast %268 : vector<1x2x64xf32> to vector<2x64xf32>
    %c3 = arith.constant 3 : index
    %c0_154 = arith.constant 0 : index
    %c0_155 = arith.constant 0 : index
    %270 = vector.load %arg20[%c3, %c0_154, %c0_155] : memref<8x2x64xf32, #tpu.memory_space<vmem>>, vector<1x2x64xf32>
    %271 = vector.shape_cast %270 : vector<1x2x64xf32> to vector<2x64xf32>
    %c4 = arith.constant 4 : index
    %c0_156 = arith.constant 0 : index
    %c0_157 = arith.constant 0 : index
    %272 = vector.load %arg20[%c4, %c0_156, %c0_157] : memref<8x2x64xf32, #tpu.memory_space<vmem>>, vector<1x2x64xf32>
    %273 = vector.shape_cast %272 : vector<1x2x64xf32> to vector<2x64xf32>
    %c5 = arith.constant 5 : index
    %c0_158 = arith.constant 0 : index
    %c0_159 = arith.constant 0 : index
    %274 = vector.load %arg20[%c5, %c0_158, %c0_159] : memref<8x2x64xf32, #tpu.memory_space<vmem>>, vector<1x2x64xf32>
    %275 = vector.shape_cast %274 : vector<1x2x64xf32> to vector<2x64xf32>
    %c6 = arith.constant 6 : index
    %c0_160 = arith.constant 0 : index
    %c0_161 = arith.constant 0 : index
    %276 = vector.load %arg20[%c6, %c0_160, %c0_161] : memref<8x2x64xf32, #tpu.memory_space<vmem>>, vector<1x2x64xf32>
    %277 = vector.shape_cast %276 : vector<1x2x64xf32> to vector<2x64xf32>
    %c7 = arith.constant 7 : index
    %c0_162 = arith.constant 0 : index
    %c0_163 = arith.constant 0 : index
    %278 = vector.load %arg20[%c7, %c0_162, %c0_163] : memref<8x2x64xf32, #tpu.memory_space<vmem>>, vector<1x2x64xf32>
    %279 = vector.shape_cast %278 : vector<1x2x64xf32> to vector<2x64xf32>
    %280 = tpu.concatenate %265, %267, %269, %271, %273, %275, %277, %279 in 0 : vector<2x64xf32>, vector<2x64xf32>, vector<2x64xf32>, vector<2x64xf32>, vector<2x64xf32>, vector<2x64xf32>, vector<2x64xf32>, vector<2x64xf32> -> vector<16x64xf32>
    %281 = vector.broadcast %34 : vector<1x64xf32> to vector<16x64xf32>
    %282 = arith.mulf %91, %281 : vector<16x64xf32>
    %283 = arith.addf %280, %282 : vector<16x64xf32>
    %284 = arith.negf %50 : vector<16x64xf32>
    %285 = math.exp %284 : vector<16x64xf32>
    %cst_164 = arith.constant 1.000000e+00 : f32
    %286 = vector.broadcast %cst_164 : f32 to vector<16x64xf32>
    %287 = arith.addf %286, %285 : vector<16x64xf32>
    %288 = arith.divf %286, %287 : vector<16x64xf32>
    %289 = arith.mulf %50, %288 : vector<16x64xf32>
    %290 = arith.mulf %283, %289 : vector<16x64xf32>
    %cst_165 = arith.constant dense<0.000000e+00> : vector<16x32xf32>
    %291 = tpu.matmul %290, %36, %cst_165 {dimension_numbers = #tpu.dot_dimension_numbers<[1], [0], [0], [1], [0, 0, 1, 1], [], []>} : vector<16x64xf32>, vector<64x32xf32>, vector<16x32xf32> -> vector<16x32xf32>
    %292 = arith.addf %7, %291 : vector<16x32xf32>
    %c1_166 = arith.constant 1 : index
    %c0_167 = arith.constant 0 : index
    %c0_168 = arith.constant 0 : index
    %293 = vector.load %arg3[%c1_166, %c0_167, %c0_168] : memref<2x1x32xf32, #tpu.memory_space<vmem>>, vector<1x1x32xf32>
    %294 = vector.shape_cast %293 : vector<1x1x32xf32> to vector<1x32xf32>
    %c1_169 = arith.constant 1 : index
    %c0_170 = arith.constant 0 : index
    %c0_171 = arith.constant 0 : index
    %295 = vector.load %arg4[%c1_169, %c0_170, %c0_171] : memref<2x32x64xf32, #tpu.memory_space<vmem>>, vector<1x32x64xf32>
    %296 = vector.shape_cast %295 : vector<1x32x64xf32> to vector<32x64xf32>
    %c1_172 = arith.constant 1 : index
    %c0_173 = arith.constant 0 : index
    %c0_174 = arith.constant 0 : index
    %297 = vector.load %arg5[%c1_172, %c0_173, %c0_174] : memref<2x32x64xf32, #tpu.memory_space<vmem>>, vector<1x32x64xf32>
    %298 = vector.shape_cast %297 : vector<1x32x64xf32> to vector<32x64xf32>
    %c1_175 = arith.constant 1 : index
    %c0_176 = arith.constant 0 : index
    %c0_177 = arith.constant 0 : index
    %299 = vector.load %arg6[%c1_175, %c0_176, %c0_177] : memref<2x4x64xf32, #tpu.memory_space<vmem>>, vector<1x4x64xf32>
    %300 = vector.shape_cast %299 : vector<1x4x64xf32> to vector<4x64xf32>
    %c1_178 = arith.constant 1 : index
    %c0_179 = arith.constant 0 : index
    %c0_180 = arith.constant 0 : index
    %301 = vector.load %arg7[%c1_178, %c0_179, %c0_180] : memref<2x1x64xf32, #tpu.memory_space<vmem>>, vector<1x1x64xf32>
    %302 = vector.shape_cast %301 : vector<1x1x64xf32> to vector<1x64xf32>
    %c1_181 = arith.constant 1 : index
    %c0_182 = arith.constant 0 : index
    %c0_183 = arith.constant 0 : index
    %303 = vector.load %arg8[%c1_181, %c0_182, %c0_183] : memref<2x64x16xf32, #tpu.memory_space<vmem>>, vector<1x64x16xf32>
    %304 = vector.shape_cast %303 : vector<1x64x16xf32> to vector<64x16xf32>
    %c1_184 = arith.constant 1 : index
    %c0_185 = arith.constant 0 : index
    %c0_186 = arith.constant 0 : index
    %305 = vector.load %arg9[%c1_184, %c0_185, %c0_186] : memref<2x64x16xf32, #tpu.memory_space<vmem>>, vector<1x64x16xf32>
    %306 = vector.shape_cast %305 : vector<1x64x16xf32> to vector<64x16xf32>
    %c1_187 = arith.constant 1 : index
    %c0_188 = arith.constant 0 : index
    %c0_189 = arith.constant 0 : index
    %307 = vector.load %arg10[%c1_187, %c0_188, %c0_189] : memref<2x64x64xf32, #tpu.memory_space<vmem>>, vector<1x64x64xf32>
    %308 = vector.shape_cast %307 : vector<1x64x64xf32> to vector<64x64xf32>
    %c1_190 = arith.constant 1 : index
    %c0_191 = arith.constant 0 : index
    %c0_192 = arith.constant 0 : index
    %309 = vector.load %arg11[%c1_190, %c0_191, %c0_192] : memref<2x1x64xf32, #tpu.memory_space<vmem>>, vector<1x1x64xf32>
    %310 = vector.shape_cast %309 : vector<1x1x64xf32> to vector<1x64xf32>
    %c1_193 = arith.constant 1 : index
    %c0_194 = arith.constant 0 : index
    %c0_195 = arith.constant 0 : index
    %311 = vector.load %arg12[%c1_193, %c0_194, %c0_195] : memref<2x16x64xf32, #tpu.memory_space<vmem>>, vector<1x16x64xf32>
    %312 = vector.shape_cast %311 : vector<1x16x64xf32> to vector<16x64xf32>
    %313 = math.exp %312 : vector<16x64xf32>
    %cst_196 = arith.constant 0.000000e+00 : f32
    %314 = vector.broadcast %cst_196 : f32 to vector<16x64xf32>
    %315 = arith.subf %314, %313 : vector<16x64xf32>
    %c1_197 = arith.constant 1 : index
    %c0_198 = arith.constant 0 : index
    %c0_199 = arith.constant 0 : index
    %316 = vector.load %arg13[%c1_197, %c0_198, %c0_199] : memref<2x1x64xf32, #tpu.memory_space<vmem>>, vector<1x1x64xf32>
    %317 = vector.shape_cast %316 : vector<1x1x64xf32> to vector<1x64xf32>
    %c1_200 = arith.constant 1 : index
    %c0_201 = arith.constant 0 : index
    %c0_202 = arith.constant 0 : index
    %318 = vector.load %arg14[%c1_200, %c0_201, %c0_202] : memref<2x64x32xf32, #tpu.memory_space<vmem>>, vector<1x64x32xf32>
    %319 = vector.shape_cast %318 : vector<1x64x32xf32> to vector<64x32xf32>
    %320 = arith.mulf %292, %292 : vector<16x32xf32>
    %cst_203 = arith.constant dense<0.000000e+00> : vector<16xf32>
    %321 = vector.multi_reduction <add>, %320, %cst_203 [1] : vector<16x32xf32> to vector<16xf32>
    %322 = vector.shape_cast %321 : vector<16xf32> to vector<16x1xf32>
    %cst_204 = arith.constant 3.200000e+01 : f32
    %323 = vector.broadcast %cst_204 : f32 to vector<16x1xf32>
    %324 = arith.divf %322, %323 : vector<16x1xf32>
    %cst_205 = arith.constant 9.99999974E-6 : f32
    %325 = vector.broadcast %cst_205 : f32 to vector<16x1xf32>
    %326 = arith.addf %324, %325 : vector<16x1xf32>
    %327 = math.rsqrt %326 : vector<16x1xf32>
    %328 = vector.broadcast %327 : vector<16x1xf32> to vector<16x32xf32>
    %329 = arith.mulf %292, %328 : vector<16x32xf32>
    %330 = vector.broadcast %294 : vector<1x32xf32> to vector<16x32xf32>
    %331 = arith.mulf %329, %330 : vector<16x32xf32>
    %cst_206 = arith.constant dense<0.000000e+00> : vector<16x64xf32>
    %332 = tpu.matmul %331, %296, %cst_206 {dimension_numbers = #tpu.dot_dimension_numbers<[1], [0], [0], [1], [0, 0, 1, 1], [], []>} : vector<16x32xf32>, vector<32x64xf32>, vector<16x64xf32> -> vector<16x64xf32>
    %cst_207 = arith.constant dense<0.000000e+00> : vector<16x64xf32>
    %333 = tpu.matmul %331, %298, %cst_207 {dimension_numbers = #tpu.dot_dimension_numbers<[1], [0], [0], [1], [0, 0, 1, 1], [], []>} : vector<16x32xf32>, vector<32x64xf32>, vector<16x64xf32> -> vector<16x64xf32>
    %334 = vector.extract_strided_slice %300 {offsets = [3, 0], sizes = [1, 64], strides = [1, 1]} : vector<4x64xf32> to vector<1x64xf32>
    %335 = vector.broadcast %334 : vector<1x64xf32> to vector<16x64xf32>
    %336 = arith.mulf %335, %332 : vector<16x64xf32>
    %337 = vector.broadcast %302 : vector<1x64xf32> to vector<16x64xf32>
    %338 = arith.addf %337, %336 : vector<16x64xf32>
    %c2_i32_208 = arith.constant 2 : i32
    %339 = vector.broadcast %c2_i32_208 : i32 to vector<16x16xi32>
    %340 = arith.subi %8, %339 : vector<16x16xi32>
    %341 = arith.cmpi eq, %9, %340 : vector<16x16xi32>
    %342 = arith.extui %341 : vector<16x16xi1> to vector<16x16xi32>
    %343 = arith.sitofp %342 : vector<16x16xi32> to vector<16x16xf32>
    %cst_209 = arith.constant dense<0.000000e+00> : vector<16x64xf32>
    %344 = tpu.matmul %343, %332, %cst_209 {dimension_numbers = #tpu.dot_dimension_numbers<[1], [0], [0], [1], [0, 0, 1, 1], [], []>} : vector<16x16xf32>, vector<16x64xf32>, vector<16x64xf32> -> vector<16x64xf32>
    %345 = vector.extract_strided_slice %300 {offsets = [2, 0], sizes = [1, 64], strides = [1, 1]} : vector<4x64xf32> to vector<1x64xf32>
    %346 = vector.broadcast %345 : vector<1x64xf32> to vector<16x64xf32>
    %347 = arith.mulf %346, %344 : vector<16x64xf32>
    %348 = arith.addf %338, %347 : vector<16x64xf32>
    %c4_i32_210 = arith.constant 4 : i32
    %349 = vector.broadcast %c4_i32_210 : i32 to vector<16x16xi32>
    %350 = arith.subi %8, %349 : vector<16x16xi32>
    %351 = arith.cmpi eq, %9, %350 : vector<16x16xi32>
    %352 = arith.extui %351 : vector<16x16xi1> to vector<16x16xi32>
    %353 = arith.sitofp %352 : vector<16x16xi32> to vector<16x16xf32>
    %cst_211 = arith.constant dense<0.000000e+00> : vector<16x64xf32>
    %354 = tpu.matmul %353, %332, %cst_211 {dimension_numbers = #tpu.dot_dimension_numbers<[1], [0], [0], [1], [0, 0, 1, 1], [], []>} : vector<16x16xf32>, vector<16x64xf32>, vector<16x64xf32> -> vector<16x64xf32>
    %355 = vector.extract_strided_slice %300 {offsets = [1, 0], sizes = [1, 64], strides = [1, 1]} : vector<4x64xf32> to vector<1x64xf32>
    %356 = vector.broadcast %355 : vector<1x64xf32> to vector<16x64xf32>
    %357 = arith.mulf %356, %354 : vector<16x64xf32>
    %358 = arith.addf %348, %357 : vector<16x64xf32>
    %c6_i32_212 = arith.constant 6 : i32
    %359 = vector.broadcast %c6_i32_212 : i32 to vector<16x16xi32>
    %360 = arith.subi %8, %359 : vector<16x16xi32>
    %361 = arith.cmpi eq, %9, %360 : vector<16x16xi32>
    %362 = arith.extui %361 : vector<16x16xi1> to vector<16x16xi32>
    %363 = arith.sitofp %362 : vector<16x16xi32> to vector<16x16xf32>
    %cst_213 = arith.constant dense<0.000000e+00> : vector<16x64xf32>
    %364 = tpu.matmul %363, %332, %cst_213 {dimension_numbers = #tpu.dot_dimension_numbers<[1], [0], [0], [1], [0, 0, 1, 1], [], []>} : vector<16x16xf32>, vector<16x64xf32>, vector<16x64xf32> -> vector<16x64xf32>
    %365 = vector.extract_strided_slice %300 {offsets = [0, 0], sizes = [1, 64], strides = [1, 1]} : vector<4x64xf32> to vector<1x64xf32>
    %366 = vector.broadcast %365 : vector<1x64xf32> to vector<16x64xf32>
    %367 = arith.mulf %366, %364 : vector<16x64xf32>
    %368 = arith.addf %358, %367 : vector<16x64xf32>
    %369 = arith.negf %368 : vector<16x64xf32>
    %370 = math.exp %369 : vector<16x64xf32>
    %cst_214 = arith.constant 1.000000e+00 : f32
    %371 = vector.broadcast %cst_214 : f32 to vector<16x64xf32>
    %372 = arith.addf %371, %370 : vector<16x64xf32>
    %373 = arith.divf %371, %372 : vector<16x64xf32>
    %374 = arith.mulf %368, %373 : vector<16x64xf32>
    %cst_215 = arith.constant dense<0.000000e+00> : vector<16x16xf32>
    %375 = tpu.matmul %374, %304, %cst_215 {dimension_numbers = #tpu.dot_dimension_numbers<[1], [0], [0], [1], [0, 0, 1, 1], [], []>} : vector<16x64xf32>, vector<64x16xf32>, vector<16x16xf32> -> vector<16x16xf32>
    %cst_216 = arith.constant dense<0.000000e+00> : vector<16x16xf32>
    %376 = tpu.matmul %374, %306, %cst_216 {dimension_numbers = #tpu.dot_dimension_numbers<[1], [0], [0], [1], [0, 0, 1, 1], [], []>} : vector<16x64xf32>, vector<64x16xf32>, vector<16x16xf32> -> vector<16x16xf32>
    %cst_217 = arith.constant dense<0.000000e+00> : vector<16x64xf32>
    %377 = tpu.matmul %374, %308, %cst_217 {dimension_numbers = #tpu.dot_dimension_numbers<[1], [0], [0], [1], [0, 0, 1, 1], [], []>} : vector<16x64xf32>, vector<64x64xf32>, vector<16x64xf32> -> vector<16x64xf32>
    %378 = vector.broadcast %310 : vector<1x64xf32> to vector<16x64xf32>
    %379 = arith.addf %377, %378 : vector<16x64xf32>
    %cst_218 = arith.constant 0.000000e+00 : f32
    %380 = vector.broadcast %cst_218 : f32 to vector<16x64xf32>
    %381 = arith.maximumf %379, %380 : vector<16x64xf32>
    %382 = vector.broadcast %cst_218 : f32 to vector<16x64xf32>
    %383 = arith.subf %379, %382 : vector<16x64xf32>
    %384 = arith.cmpf one, %383, %383 : vector<16x64xf32>
    %385 = vector.broadcast %cst_218 : f32 to vector<16x64xf32>
    %386 = arith.addf %379, %385 : vector<16x64xf32>
    %387 = math.absf %383 : vector<16x64xf32>
    %cst_219 = arith.constant 0.000000e+00 : f32
    %388 = vector.broadcast %cst_219 : f32 to vector<16x64xf32>
    %389 = arith.subf %388, %387 : vector<16x64xf32>
    %390 = math.exp %389 : vector<16x64xf32>
    %391 = math.log1p %390 : vector<16x64xf32>
    %392 = arith.addf %381, %391 : vector<16x64xf32>
    %393 = arith.select %384, %386, %392 : vector<16x64xi1>, vector<16x64xf32>
    %394 = vector.shape_cast %393 : vector<16x64xf32> to vector<16x1x64xf32>
    %395 = vector.shape_cast %315 : vector<16x64xf32> to vector<1x16x64xf32>
    %396 = vector.broadcast %394 : vector<16x1x64xf32> to vector<16x16x64xf32>
    %397 = vector.broadcast %395 : vector<1x16x64xf32> to vector<16x16x64xf32>
    %398 = arith.mulf %396, %397 : vector<16x16x64xf32>
    %399 = math.exp %398 : vector<16x16x64xf32>
    %c0_220 = arith.constant 0 : index
    %c0_221 = arith.constant 0 : index
    %c0_222 = arith.constant 0 : index
    %400 = vector.load %arg17[%c0_220, %c0_221, %c0_222] : memref<16x16x64xf32, #tpu.memory_space<vmem>>, vector<16x16x64xf32>
    tpu.vector_store %arg17[%c0_220, %c0_221, %c0_222], %399 {strides = array<i32>} : memref<16x16x64xf32, #tpu.memory_space<vmem>>, vector<16x16x64xf32>,
    %401 = arith.mulf %393, %374 : vector<16x64xf32>
    %402 = vector.shape_cast %401 : vector<16x64xf32> to vector<16x1x64xf32>
    %403 = vector.shape_cast %375 : vector<16x16xf32> to vector<16x16x1xf32>
    %404 = vector.broadcast %402 : vector<16x1x64xf32> to vector<16x16x64xf32>
    %405 = vector.broadcast %403 : vector<16x16x1xf32> to vector<16x16x64xf32>
    %406 = arith.mulf %404, %405 : vector<16x16x64xf32>
    %c0_223 = arith.constant 0 : index
    %c0_224 = arith.constant 0 : index
    %c0_225 = arith.constant 0 : index
    %407 = vector.load %arg18[%c0_223, %c0_224, %c0_225] : memref<16x16x64xf32, #tpu.memory_space<vmem>>, vector<16x16x64xf32>
    tpu.vector_store %arg18[%c0_223, %c0_224, %c0_225], %406 {strides = array<i32>} : memref<16x16x64xf32, #tpu.memory_space<vmem>>, vector<16x16x64xf32>,
    %408 = vector.shape_cast %376 : vector<16x16xf32> to vector<16x16x1xf32>
    %c0_226 = arith.constant 0 : index
    %c0_227 = arith.constant 0 : index
    %c0_228 = arith.constant 0 : index
    %409 = vector.load %arg19[%c0_226, %c0_227, %c0_228] : memref<16x16x1xf32, #tpu.memory_space<vmem>>, vector<16x16x1xf32>
    tpu.vector_store %arg19[%c0_226, %c0_227, %c0_228], %408 {strides = array<i32>} : memref<16x16x1xf32, #tpu.memory_space<vmem>>, vector<16x16x1xf32>,
    %cst_229 = arith.constant 0.000000e+00 : f32
    %410 = vector.broadcast %cst_229 : f32 to vector<2x16x64xf32>
    %c0_i32_230 = arith.constant 0 : i32
    %c2_i32_231 = arith.constant 2 : i32
    %411 = arith.muli %c0_i32_230, %c2_i32_231 : i32
    %412 = tpu.assume_multiple %411, 2 : i32
    %413 = arith.index_cast %412 : i32 to index
    %c0_232 = arith.constant 0 : index
    %c0_233 = arith.constant 0 : index
    %414 = vector.load %arg17[%413, %c0_232, %c0_233] : memref<16x16x64xf32, #tpu.memory_space<vmem>>, vector<2x16x64xf32>
    %415 = arith.index_cast %412 : i32 to index
    %c0_234 = arith.constant 0 : index
    %c0_235 = arith.constant 0 : index
    %416 = vector.load %arg18[%415, %c0_234, %c0_235] : memref<16x16x64xf32, #tpu.memory_space<vmem>>, vector<2x16x64xf32>
    %417 = arith.index_cast %412 : i32 to index
    %c0_236 = arith.constant 0 : index
    %c0_237 = arith.constant 0 : index
    %418 = vector.load %arg19[%417, %c0_236, %c0_237] : memref<16x16x1xf32, #tpu.memory_space<vmem>>, vector<2x16x1xf32>
    %419 = arith.mulf %414, %410 : vector<2x16x64xf32>
    %420 = arith.addf %419, %416 : vector<2x16x64xf32>
    %421 = vector.broadcast %418 : vector<2x16x1xf32> to vector<2x16x64xf32>
    %422 = arith.mulf %420, %421 : vector<2x16x64xf32>
    %cst_238 = arith.constant dense<0.000000e+00> : vector<2x64xf32>
    %423 = vector.multi_reduction <add>, %422, %cst_238 [1] : vector<2x16x64xf32> to vector<2x64xf32>
    %424 = arith.index_cast %c0_i32_230 : i32 to index
    %c0_239 = arith.constant 0 : index
    %c0_240 = arith.constant 0 : index
    %425 = vector.load %arg20[%424, %c0_239, %c0_240] : memref<8x2x64xf32, #tpu.memory_space<vmem>>, vector<1x2x64xf32>
    %426 = vector.shape_cast %425 : vector<1x2x64xf32> to vector<2x64xf32>
    %427 = vector.shape_cast %423 : vector<2x64xf32> to vector<1x2x64xf32>
    tpu.vector_store %arg20[%424, %c0_239, %c0_240], %427 {strides = array<i32>} : memref<8x2x64xf32, #tpu.memory_space<vmem>>, vector<1x2x64xf32>,
    %c1_i32_241 = arith.constant 1 : i32
    %c2_i32_242 = arith.constant 2 : i32
    %428 = arith.muli %c1_i32_241, %c2_i32_242 : i32
    %429 = tpu.assume_multiple %428, 2 : i32
    %430 = arith.index_cast %429 : i32 to index
    %c0_243 = arith.constant 0 : index
    %c0_244 = arith.constant 0 : index
    %431 = vector.load %arg17[%430, %c0_243, %c0_244] : memref<16x16x64xf32, #tpu.memory_space<vmem>>, vector<2x16x64xf32>
    %432 = arith.index_cast %429 : i32 to index
    %c0_245 = arith.constant 0 : index
    %c0_246 = arith.constant 0 : index
    %433 = vector.load %arg18[%432, %c0_245, %c0_246] : memref<16x16x64xf32, #tpu.memory_space<vmem>>, vector<2x16x64xf32>
    %434 = arith.index_cast %429 : i32 to index
    %c0_247 = arith.constant 0 : index
    %c0_248 = arith.constant 0 : index
    %435 = vector.load %arg19[%434, %c0_247, %c0_248] : memref<16x16x1xf32, #tpu.memory_space<vmem>>, vector<2x16x1xf32>
    %436 = arith.mulf %431, %420 : vector<2x16x64xf32>
    %437 = arith.addf %436, %433 : vector<2x16x64xf32>
    %438 = vector.broadcast %435 : vector<2x16x1xf32> to vector<2x16x64xf32>
    %439 = arith.mulf %437, %438 : vector<2x16x64xf32>
    %cst_249 = arith.constant dense<0.000000e+00> : vector<2x64xf32>
    %440 = vector.multi_reduction <add>, %439, %cst_249 [1] : vector<2x16x64xf32> to vector<2x64xf32>
    %441 = arith.index_cast %c1_i32_241 : i32 to index
    %c0_250 = arith.constant 0 : index
    %c0_251 = arith.constant 0 : index
    %442 = vector.load %arg20[%441, %c0_250, %c0_251] : memref<8x2x64xf32, #tpu.memory_space<vmem>>, vector<1x2x64xf32>
    %443 = vector.shape_cast %442 : vector<1x2x64xf32> to vector<2x64xf32>
    %444 = vector.shape_cast %440 : vector<2x64xf32> to vector<1x2x64xf32>
    tpu.vector_store %arg20[%441, %c0_250, %c0_251], %444 {strides = array<i32>} : memref<8x2x64xf32, #tpu.memory_space<vmem>>, vector<1x2x64xf32>,
    %c2_i32_252 = arith.constant 2 : i32
    %c2_i32_253 = arith.constant 2 : i32
    %445 = arith.muli %c2_i32_252, %c2_i32_253 : i32
    %446 = tpu.assume_multiple %445, 2 : i32
    %447 = arith.index_cast %446 : i32 to index
    %c0_254 = arith.constant 0 : index
    %c0_255 = arith.constant 0 : index
    %448 = vector.load %arg17[%447, %c0_254, %c0_255] : memref<16x16x64xf32, #tpu.memory_space<vmem>>, vector<2x16x64xf32>
    %449 = arith.index_cast %446 : i32 to index
    %c0_256 = arith.constant 0 : index
    %c0_257 = arith.constant 0 : index
    %450 = vector.load %arg18[%449, %c0_256, %c0_257] : memref<16x16x64xf32, #tpu.memory_space<vmem>>, vector<2x16x64xf32>
    %451 = arith.index_cast %446 : i32 to index
    %c0_258 = arith.constant 0 : index
    %c0_259 = arith.constant 0 : index
    %452 = vector.load %arg19[%451, %c0_258, %c0_259] : memref<16x16x1xf32, #tpu.memory_space<vmem>>, vector<2x16x1xf32>
    %453 = arith.mulf %448, %437 : vector<2x16x64xf32>
    %454 = arith.addf %453, %450 : vector<2x16x64xf32>
    %455 = vector.broadcast %452 : vector<2x16x1xf32> to vector<2x16x64xf32>
    %456 = arith.mulf %454, %455 : vector<2x16x64xf32>
    %cst_260 = arith.constant dense<0.000000e+00> : vector<2x64xf32>
    %457 = vector.multi_reduction <add>, %456, %cst_260 [1] : vector<2x16x64xf32> to vector<2x64xf32>
    %458 = arith.index_cast %c2_i32_252 : i32 to index
    %c0_261 = arith.constant 0 : index
    %c0_262 = arith.constant 0 : index
    %459 = vector.load %arg20[%458, %c0_261, %c0_262] : memref<8x2x64xf32, #tpu.memory_space<vmem>>, vector<1x2x64xf32>
    %460 = vector.shape_cast %459 : vector<1x2x64xf32> to vector<2x64xf32>
    %461 = vector.shape_cast %457 : vector<2x64xf32> to vector<1x2x64xf32>
    tpu.vector_store %arg20[%458, %c0_261, %c0_262], %461 {strides = array<i32>} : memref<8x2x64xf32, #tpu.memory_space<vmem>>, vector<1x2x64xf32>,
    %c3_i32_263 = arith.constant 3 : i32
    %c2_i32_264 = arith.constant 2 : i32
    %462 = arith.muli %c3_i32_263, %c2_i32_264 : i32
    %463 = tpu.assume_multiple %462, 2 : i32
    %464 = arith.index_cast %463 : i32 to index
    %c0_265 = arith.constant 0 : index
    %c0_266 = arith.constant 0 : index
    %465 = vector.load %arg17[%464, %c0_265, %c0_266] : memref<16x16x64xf32, #tpu.memory_space<vmem>>, vector<2x16x64xf32>
    %466 = arith.index_cast %463 : i32 to index
    %c0_267 = arith.constant 0 : index
    %c0_268 = arith.constant 0 : index
    %467 = vector.load %arg18[%466, %c0_267, %c0_268] : memref<16x16x64xf32, #tpu.memory_space<vmem>>, vector<2x16x64xf32>
    %468 = arith.index_cast %463 : i32 to index
    %c0_269 = arith.constant 0 : index
    %c0_270 = arith.constant 0 : index
    %469 = vector.load %arg19[%468, %c0_269, %c0_270] : memref<16x16x1xf32, #tpu.memory_space<vmem>>, vector<2x16x1xf32>
    %470 = arith.mulf %465, %454 : vector<2x16x64xf32>
    %471 = arith.addf %470, %467 : vector<2x16x64xf32>
    %472 = vector.broadcast %469 : vector<2x16x1xf32> to vector<2x16x64xf32>
    %473 = arith.mulf %471, %472 : vector<2x16x64xf32>
    %cst_271 = arith.constant dense<0.000000e+00> : vector<2x64xf32>
    %474 = vector.multi_reduction <add>, %473, %cst_271 [1] : vector<2x16x64xf32> to vector<2x64xf32>
    %475 = arith.index_cast %c3_i32_263 : i32 to index
    %c0_272 = arith.constant 0 : index
    %c0_273 = arith.constant 0 : index
    %476 = vector.load %arg20[%475, %c0_272, %c0_273] : memref<8x2x64xf32, #tpu.memory_space<vmem>>, vector<1x2x64xf32>
    %477 = vector.shape_cast %476 : vector<1x2x64xf32> to vector<2x64xf32>
    %478 = vector.shape_cast %474 : vector<2x64xf32> to vector<1x2x64xf32>
    tpu.vector_store %arg20[%475, %c0_272, %c0_273], %478 {strides = array<i32>} : memref<8x2x64xf32, #tpu.memory_space<vmem>>, vector<1x2x64xf32>,
    %c4_i32_274 = arith.constant 4 : i32
    %c2_i32_275 = arith.constant 2 : i32
    %479 = arith.muli %c4_i32_274, %c2_i32_275 : i32
    %480 = tpu.assume_multiple %479, 2 : i32
    %481 = arith.index_cast %480 : i32 to index
    %c0_276 = arith.constant 0 : index
    %c0_277 = arith.constant 0 : index
    %482 = vector.load %arg17[%481, %c0_276, %c0_277] : memref<16x16x64xf32, #tpu.memory_space<vmem>>, vector<2x16x64xf32>
    %483 = arith.index_cast %480 : i32 to index
    %c0_278 = arith.constant 0 : index
    %c0_279 = arith.constant 0 : index
    %484 = vector.load %arg18[%483, %c0_278, %c0_279] : memref<16x16x64xf32, #tpu.memory_space<vmem>>, vector<2x16x64xf32>
    %485 = arith.index_cast %480 : i32 to index
    %c0_280 = arith.constant 0 : index
    %c0_281 = arith.constant 0 : index
    %486 = vector.load %arg19[%485, %c0_280, %c0_281] : memref<16x16x1xf32, #tpu.memory_space<vmem>>, vector<2x16x1xf32>
    %487 = arith.mulf %482, %471 : vector<2x16x64xf32>
    %488 = arith.addf %487, %484 : vector<2x16x64xf32>
    %489 = vector.broadcast %486 : vector<2x16x1xf32> to vector<2x16x64xf32>
    %490 = arith.mulf %488, %489 : vector<2x16x64xf32>
    %cst_282 = arith.constant dense<0.000000e+00> : vector<2x64xf32>
    %491 = vector.multi_reduction <add>, %490, %cst_282 [1] : vector<2x16x64xf32> to vector<2x64xf32>
    %492 = arith.index_cast %c4_i32_274 : i32 to index
    %c0_283 = arith.constant 0 : index
    %c0_284 = arith.constant 0 : index
    %493 = vector.load %arg20[%492, %c0_283, %c0_284] : memref<8x2x64xf32, #tpu.memory_space<vmem>>, vector<1x2x64xf32>
    %494 = vector.shape_cast %493 : vector<1x2x64xf32> to vector<2x64xf32>
    %495 = vector.shape_cast %491 : vector<2x64xf32> to vector<1x2x64xf32>
    tpu.vector_store %arg20[%492, %c0_283, %c0_284], %495 {strides = array<i32>} : memref<8x2x64xf32, #tpu.memory_space<vmem>>, vector<1x2x64xf32>,
    %c5_i32_285 = arith.constant 5 : i32
    %c2_i32_286 = arith.constant 2 : i32
    %496 = arith.muli %c5_i32_285, %c2_i32_286 : i32
    %497 = tpu.assume_multiple %496, 2 : i32
    %498 = arith.index_cast %497 : i32 to index
    %c0_287 = arith.constant 0 : index
    %c0_288 = arith.constant 0 : index
    %499 = vector.load %arg17[%498, %c0_287, %c0_288] : memref<16x16x64xf32, #tpu.memory_space<vmem>>, vector<2x16x64xf32>
    %500 = arith.index_cast %497 : i32 to index
    %c0_289 = arith.constant 0 : index
    %c0_290 = arith.constant 0 : index
    %501 = vector.load %arg18[%500, %c0_289, %c0_290] : memref<16x16x64xf32, #tpu.memory_space<vmem>>, vector<2x16x64xf32>
    %502 = arith.index_cast %497 : i32 to index
    %c0_291 = arith.constant 0 : index
    %c0_292 = arith.constant 0 : index
    %503 = vector.load %arg19[%502, %c0_291, %c0_292] : memref<16x16x1xf32, #tpu.memory_space<vmem>>, vector<2x16x1xf32>
    %504 = arith.mulf %499, %488 : vector<2x16x64xf32>
    %505 = arith.addf %504, %501 : vector<2x16x64xf32>
    %506 = vector.broadcast %503 : vector<2x16x1xf32> to vector<2x16x64xf32>
    %507 = arith.mulf %505, %506 : vector<2x16x64xf32>
    %cst_293 = arith.constant dense<0.000000e+00> : vector<2x64xf32>
    %508 = vector.multi_reduction <add>, %507, %cst_293 [1] : vector<2x16x64xf32> to vector<2x64xf32>
    %509 = arith.index_cast %c5_i32_285 : i32 to index
    %c0_294 = arith.constant 0 : index
    %c0_295 = arith.constant 0 : index
    %510 = vector.load %arg20[%509, %c0_294, %c0_295] : memref<8x2x64xf32, #tpu.memory_space<vmem>>, vector<1x2x64xf32>
    %511 = vector.shape_cast %510 : vector<1x2x64xf32> to vector<2x64xf32>
    %512 = vector.shape_cast %508 : vector<2x64xf32> to vector<1x2x64xf32>
    tpu.vector_store %arg20[%509, %c0_294, %c0_295], %512 {strides = array<i32>} : memref<8x2x64xf32, #tpu.memory_space<vmem>>, vector<1x2x64xf32>,
    %c6_i32_296 = arith.constant 6 : i32
    %c2_i32_297 = arith.constant 2 : i32
    %513 = arith.muli %c6_i32_296, %c2_i32_297 : i32
    %514 = tpu.assume_multiple %513, 2 : i32
    %515 = arith.index_cast %514 : i32 to index
    %c0_298 = arith.constant 0 : index
    %c0_299 = arith.constant 0 : index
    %516 = vector.load %arg17[%515, %c0_298, %c0_299] : memref<16x16x64xf32, #tpu.memory_space<vmem>>, vector<2x16x64xf32>
    %517 = arith.index_cast %514 : i32 to index
    %c0_300 = arith.constant 0 : index
    %c0_301 = arith.constant 0 : index
    %518 = vector.load %arg18[%517, %c0_300, %c0_301] : memref<16x16x64xf32, #tpu.memory_space<vmem>>, vector<2x16x64xf32>
    %519 = arith.index_cast %514 : i32 to index
    %c0_302 = arith.constant 0 : index
    %c0_303 = arith.constant 0 : index
    %520 = vector.load %arg19[%519, %c0_302, %c0_303] : memref<16x16x1xf32, #tpu.memory_space<vmem>>, vector<2x16x1xf32>
    %521 = arith.mulf %516, %505 : vector<2x16x64xf32>
    %522 = arith.addf %521, %518 : vector<2x16x64xf32>
    %523 = vector.broadcast %520 : vector<2x16x1xf32> to vector<2x16x64xf32>
    %524 = arith.mulf %522, %523 : vector<2x16x64xf32>
    %cst_304 = arith.constant dense<0.000000e+00> : vector<2x64xf32>
    %525 = vector.multi_reduction <add>, %524, %cst_304 [1] : vector<2x16x64xf32> to vector<2x64xf32>
    %526 = arith.index_cast %c6_i32_296 : i32 to index
    %c0_305 = arith.constant 0 : index
    %c0_306 = arith.constant 0 : index
    %527 = vector.load %arg20[%526, %c0_305, %c0_306] : memref<8x2x64xf32, #tpu.memory_space<vmem>>, vector<1x2x64xf32>
    %528 = vector.shape_cast %527 : vector<1x2x64xf32> to vector<2x64xf32>
    %529 = vector.shape_cast %525 : vector<2x64xf32> to vector<1x2x64xf32>
    tpu.vector_store %arg20[%526, %c0_305, %c0_306], %529 {strides = array<i32>} : memref<8x2x64xf32, #tpu.memory_space<vmem>>, vector<1x2x64xf32>,
    %c7_i32_307 = arith.constant 7 : i32
    %c2_i32_308 = arith.constant 2 : i32
    %530 = arith.muli %c7_i32_307, %c2_i32_308 : i32
    %531 = tpu.assume_multiple %530, 2 : i32
    %532 = arith.index_cast %531 : i32 to index
    %c0_309 = arith.constant 0 : index
    %c0_310 = arith.constant 0 : index
    %533 = vector.load %arg17[%532, %c0_309, %c0_310] : memref<16x16x64xf32, #tpu.memory_space<vmem>>, vector<2x16x64xf32>
    %534 = arith.index_cast %531 : i32 to index
    %c0_311 = arith.constant 0 : index
    %c0_312 = arith.constant 0 : index
    %535 = vector.load %arg18[%534, %c0_311, %c0_312] : memref<16x16x64xf32, #tpu.memory_space<vmem>>, vector<2x16x64xf32>
    %536 = arith.index_cast %531 : i32 to index
    %c0_313 = arith.constant 0 : index
    %c0_314 = arith.constant 0 : index
    %537 = vector.load %arg19[%536, %c0_313, %c0_314] : memref<16x16x1xf32, #tpu.memory_space<vmem>>, vector<2x16x1xf32>
    %538 = arith.mulf %533, %522 : vector<2x16x64xf32>
    %539 = arith.addf %538, %535 : vector<2x16x64xf32>
    %540 = vector.broadcast %537 : vector<2x16x1xf32> to vector<2x16x64xf32>
    %541 = arith.mulf %539, %540 : vector<2x16x64xf32>
    %cst_315 = arith.constant dense<0.000000e+00> : vector<2x64xf32>
    %542 = vector.multi_reduction <add>, %541, %cst_315 [1] : vector<2x16x64xf32> to vector<2x64xf32>
    %543 = arith.index_cast %c7_i32_307 : i32 to index
    %c0_316 = arith.constant 0 : index
    %c0_317 = arith.constant 0 : index
    %544 = vector.load %arg20[%543, %c0_316, %c0_317] : memref<8x2x64xf32, #tpu.memory_space<vmem>>, vector<1x2x64xf32>
    %545 = vector.shape_cast %544 : vector<1x2x64xf32> to vector<2x64xf32>
    %546 = vector.shape_cast %542 : vector<2x64xf32> to vector<1x2x64xf32>
    tpu.vector_store %arg20[%543, %c0_316, %c0_317], %546 {strides = array<i32>} : memref<8x2x64xf32, #tpu.memory_space<vmem>>, vector<1x2x64xf32>,
    %c8_i32_318 = arith.constant 8 : i32
    %c0_319 = arith.constant 0 : index
    %c0_320 = arith.constant 0 : index
    %c0_321 = arith.constant 0 : index
    %547 = vector.load %arg20[%c0_319, %c0_320, %c0_321] : memref<8x2x64xf32, #tpu.memory_space<vmem>>, vector<1x2x64xf32>
    %548 = vector.shape_cast %547 : vector<1x2x64xf32> to vector<2x64xf32>
    %c1_322 = arith.constant 1 : index
    %c0_323 = arith.constant 0 : index
    %c0_324 = arith.constant 0 : index
    %549 = vector.load %arg20[%c1_322, %c0_323, %c0_324] : memref<8x2x64xf32, #tpu.memory_space<vmem>>, vector<1x2x64xf32>
    %550 = vector.shape_cast %549 : vector<1x2x64xf32> to vector<2x64xf32>
    %c2_325 = arith.constant 2 : index
    %c0_326 = arith.constant 0 : index
    %c0_327 = arith.constant 0 : index
    %551 = vector.load %arg20[%c2_325, %c0_326, %c0_327] : memref<8x2x64xf32, #tpu.memory_space<vmem>>, vector<1x2x64xf32>
    %552 = vector.shape_cast %551 : vector<1x2x64xf32> to vector<2x64xf32>
    %c3_328 = arith.constant 3 : index
    %c0_329 = arith.constant 0 : index
    %c0_330 = arith.constant 0 : index
    %553 = vector.load %arg20[%c3_328, %c0_329, %c0_330] : memref<8x2x64xf32, #tpu.memory_space<vmem>>, vector<1x2x64xf32>
    %554 = vector.shape_cast %553 : vector<1x2x64xf32> to vector<2x64xf32>
    %c4_331 = arith.constant 4 : index
    %c0_332 = arith.constant 0 : index
    %c0_333 = arith.constant 0 : index
    %555 = vector.load %arg20[%c4_331, %c0_332, %c0_333] : memref<8x2x64xf32, #tpu.memory_space<vmem>>, vector<1x2x64xf32>
    %556 = vector.shape_cast %555 : vector<1x2x64xf32> to vector<2x64xf32>
    %c5_334 = arith.constant 5 : index
    %c0_335 = arith.constant 0 : index
    %c0_336 = arith.constant 0 : index
    %557 = vector.load %arg20[%c5_334, %c0_335, %c0_336] : memref<8x2x64xf32, #tpu.memory_space<vmem>>, vector<1x2x64xf32>
    %558 = vector.shape_cast %557 : vector<1x2x64xf32> to vector<2x64xf32>
    %c6_337 = arith.constant 6 : index
    %c0_338 = arith.constant 0 : index
    %c0_339 = arith.constant 0 : index
    %559 = vector.load %arg20[%c6_337, %c0_338, %c0_339] : memref<8x2x64xf32, #tpu.memory_space<vmem>>, vector<1x2x64xf32>
    %560 = vector.shape_cast %559 : vector<1x2x64xf32> to vector<2x64xf32>
    %c7_340 = arith.constant 7 : index
    %c0_341 = arith.constant 0 : index
    %c0_342 = arith.constant 0 : index
    %561 = vector.load %arg20[%c7_340, %c0_341, %c0_342] : memref<8x2x64xf32, #tpu.memory_space<vmem>>, vector<1x2x64xf32>
    %562 = vector.shape_cast %561 : vector<1x2x64xf32> to vector<2x64xf32>
    %563 = tpu.concatenate %548, %550, %552, %554, %556, %558, %560, %562 in 0 : vector<2x64xf32>, vector<2x64xf32>, vector<2x64xf32>, vector<2x64xf32>, vector<2x64xf32>, vector<2x64xf32>, vector<2x64xf32>, vector<2x64xf32> -> vector<16x64xf32>
    %564 = vector.broadcast %317 : vector<1x64xf32> to vector<16x64xf32>
    %565 = arith.mulf %374, %564 : vector<16x64xf32>
    %566 = arith.addf %563, %565 : vector<16x64xf32>
    %567 = arith.negf %333 : vector<16x64xf32>
    %568 = math.exp %567 : vector<16x64xf32>
    %cst_343 = arith.constant 1.000000e+00 : f32
    %569 = vector.broadcast %cst_343 : f32 to vector<16x64xf32>
    %570 = arith.addf %569, %568 : vector<16x64xf32>
    %571 = arith.divf %569, %570 : vector<16x64xf32>
    %572 = arith.mulf %333, %571 : vector<16x64xf32>
    %573 = arith.mulf %566, %572 : vector<16x64xf32>
    %cst_344 = arith.constant dense<0.000000e+00> : vector<16x32xf32>
    %574 = tpu.matmul %573, %319, %cst_344 {dimension_numbers = #tpu.dot_dimension_numbers<[1], [0], [0], [1], [0, 0, 1, 1], [], []>} : vector<16x64xf32>, vector<64x32xf32>, vector<16x32xf32> -> vector<16x32xf32>
    %575 = arith.addf %292, %574 : vector<16x32xf32>
    %576 = arith.mulf %575, %575 : vector<16x32xf32>
    %cst_345 = arith.constant dense<0.000000e+00> : vector<16xf32>
    %577 = vector.multi_reduction <add>, %576, %cst_345 [1] : vector<16x32xf32> to vector<16xf32>
    %578 = vector.shape_cast %577 : vector<16xf32> to vector<16x1xf32>
    %cst_346 = arith.constant 3.200000e+01 : f32
    %579 = vector.broadcast %cst_346 : f32 to vector<16x1xf32>
    %580 = arith.divf %578, %579 : vector<16x1xf32>
    %cst_347 = arith.constant 9.99999974E-6 : f32
    %581 = vector.broadcast %cst_347 : f32 to vector<16x1xf32>
    %582 = arith.addf %580, %581 : vector<16x1xf32>
    %583 = math.rsqrt %582 : vector<16x1xf32>
    %584 = vector.broadcast %583 : vector<16x1xf32> to vector<16x32xf32>
    %585 = arith.mulf %575, %584 : vector<16x32xf32>
    %c0_348 = arith.constant 0 : index
    %c0_349 = arith.constant 0 : index
    %586 = vector.load %arg15[%c0_348, %c0_349] : memref<1x32xf32, #tpu.memory_space<vmem>>, vector<1x32xf32>
    %587 = vector.broadcast %586 : vector<1x32xf32> to vector<16x32xf32>
    %588 = arith.mulf %585, %587 : vector<16x32xf32>
    %c0_350 = arith.constant 0 : index
    %c0_351 = arith.constant 0 : index
    %589 = vector.load %arg16[%c0_350, %c0_351] : memref<16x32xf32, #tpu.memory_space<vmem>>, vector<16x32xf32>
    tpu.vector_store %arg16[%c0_350, %c0_351], %588 {strides = array<i32>} : memref<16x32xf32, #tpu.memory_space<vmem>>, vector<16x32xf32>,
    return
  }
  func.func @transform_0(%arg0: i32) -> (i32, i32) {
    %c0_i32 = arith.constant 0 : i32
    %c0_i32_0 = arith.constant 0 : i32
    %c0_i32_1 = arith.constant 0 : i32
    return %c0_i32, %c0_i32_0 : i32, i32
  }
  func.func @transform_1(%arg0: i32) -> (i32, i32) {
    %c0_i32 = arith.constant 0 : i32
    %c0_i32_0 = arith.constant 0 : i32
    %c0_i32_1 = arith.constant 0 : i32
    return %c0_i32, %c0_i32_0 : i32, i32
  }
  func.func @transform_2(%arg0: i32) -> (i32, i32, i32) {
    %c0_i32 = arith.constant 0 : i32
    %c0_i32_0 = arith.constant 0 : i32
    %c0_i32_1 = arith.constant 0 : i32
    %c0_i32_2 = arith.constant 0 : i32
    return %c0_i32, %c0_i32_0, %c0_i32_1 : i32, i32, i32
  }
  func.func @transform_3(%arg0: i32) -> (i32, i32, i32) {
    %c0_i32 = arith.constant 0 : i32
    %c0_i32_0 = arith.constant 0 : i32
    %c0_i32_1 = arith.constant 0 : i32
    %c0_i32_2 = arith.constant 0 : i32
    return %c0_i32, %c0_i32_0, %c0_i32_1 : i32, i32, i32
  }
  func.func @transform_4(%arg0: i32) -> (i32, i32, i32) {
    %c0_i32 = arith.constant 0 : i32
    %c0_i32_0 = arith.constant 0 : i32
    %c0_i32_1 = arith.constant 0 : i32
    %c0_i32_2 = arith.constant 0 : i32
    return %c0_i32, %c0_i32_0, %c0_i32_1 : i32, i32, i32
  }
  func.func @transform_5(%arg0: i32) -> (i32, i32, i32) {
    %c0_i32 = arith.constant 0 : i32
    %c0_i32_0 = arith.constant 0 : i32
    %c0_i32_1 = arith.constant 0 : i32
    %c0_i32_2 = arith.constant 0 : i32
    return %c0_i32, %c0_i32_0, %c0_i32_1 : i32, i32, i32
  }
  func.func @transform_6(%arg0: i32) -> (i32, i32, i32) {
    %c0_i32 = arith.constant 0 : i32
    %c0_i32_0 = arith.constant 0 : i32
    %c0_i32_1 = arith.constant 0 : i32
    %c0_i32_2 = arith.constant 0 : i32
    return %c0_i32, %c0_i32_0, %c0_i32_1 : i32, i32, i32
  }
  func.func @transform_7(%arg0: i32) -> (i32, i32, i32) {
    %c0_i32 = arith.constant 0 : i32
    %c0_i32_0 = arith.constant 0 : i32
    %c0_i32_1 = arith.constant 0 : i32
    %c0_i32_2 = arith.constant 0 : i32
    return %c0_i32, %c0_i32_0, %c0_i32_1 : i32, i32, i32
  }
  func.func @transform_8(%arg0: i32) -> (i32, i32, i32) {
    %c0_i32 = arith.constant 0 : i32
    %c0_i32_0 = arith.constant 0 : i32
    %c0_i32_1 = arith.constant 0 : i32
    %c0_i32_2 = arith.constant 0 : i32
    return %c0_i32, %c0_i32_0, %c0_i32_1 : i32, i32, i32
  }
  func.func @transform_9(%arg0: i32) -> (i32, i32, i32) {
    %c0_i32 = arith.constant 0 : i32
    %c0_i32_0 = arith.constant 0 : i32
    %c0_i32_1 = arith.constant 0 : i32
    %c0_i32_2 = arith.constant 0 : i32
    return %c0_i32, %c0_i32_0, %c0_i32_1 : i32, i32, i32
  }
  func.func @transform_10(%arg0: i32) -> (i32, i32, i32) {
    %c0_i32 = arith.constant 0 : i32
    %c0_i32_0 = arith.constant 0 : i32
    %c0_i32_1 = arith.constant 0 : i32
    %c0_i32_2 = arith.constant 0 : i32
    return %c0_i32, %c0_i32_0, %c0_i32_1 : i32, i32, i32
  }
  func.func @transform_11(%arg0: i32) -> (i32, i32, i32) {
    %c0_i32 = arith.constant 0 : i32
    %c0_i32_0 = arith.constant 0 : i32
    %c0_i32_1 = arith.constant 0 : i32
    %c0_i32_2 = arith.constant 0 : i32
    return %c0_i32, %c0_i32_0, %c0_i32_1 : i32, i32, i32
  }
  func.func @transform_12(%arg0: i32) -> (i32, i32, i32) {
    %c0_i32 = arith.constant 0 : i32
    %c0_i32_0 = arith.constant 0 : i32
    %c0_i32_1 = arith.constant 0 : i32
    %c0_i32_2 = arith.constant 0 : i32
    return %c0_i32, %c0_i32_0, %c0_i32_1 : i32, i32, i32
  }
  func.func @transform_13(%arg0: i32) -> (i32, i32, i32) {
    %c0_i32 = arith.constant 0 : i32
    %c0_i32_0 = arith.constant 0 : i32
    %c0_i32_1 = arith.constant 0 : i32
    %c0_i32_2 = arith.constant 0 : i32
    return %c0_i32, %c0_i32_0, %c0_i32_1 : i32, i32, i32
  }
  func.func @transform_14(%arg0: i32) -> (i32, i32) {
    %c0_i32 = arith.constant 0 : i32
    %c0_i32_0 = arith.constant 0 : i32
    %c0_i32_1 = arith.constant 0 : i32
    return %c0_i32, %c0_i32_0 : i32, i32
  }
  func.func @transform_15(%arg0: i32) -> (i32, i32) {
    %c0_i32 = arith.constant 0 : i32
    %c0_i32_0 = arith.constant 0 : i32
    %c0_i32_1 = arith.constant 0 : i32
    return %c0_i32, %c0_i32_0 : i32, i32
  }
}

</mosaic_0001>

<bundles_post_ra>
// kernel: tpu_custom_call.1
= control target key start
LH: loop header
LB: loop body
LE: loop exit
PB: predicated region body
PF: predicated region fallthrough
CT: control target
= control target key end

     0   :  { %v53_v2 = vlaneseq  ;;  %v4278_v3 = vmov 0   ;;  %s5869_s0 = inlined_call_operand.vmem [shape: s32[16,1], index: 0, kind: input, shape index: {}]   ;;  %s5870_s1 = inlined_call_operand.vmem [shape: f32[64,32], index: 1, kind: input, shape index: {}]   ;;  %s5871_s2 = inlined_call_operand.vmem [shape: f32[2,1,32], index: 2, kind: input, shape index: {}]   ;;  %s5872_s3 = inlined_call_operand.vmem [shape: f32[2,32,64], index: 3, kind: input, shape index: {}]   ;;  %s5873_s4 = inlined_call_operand.vmem [shape: f32[2,32,64], index: 4, kind: input, shape index: {}]   ;;  %s5874_s5 = inlined_call_operand.vmem [shape: f32[2,4,64], index: 5, kind: input, shape index: {}]   ;;  %s5875_s6 = inlined_call_operand.vmem [shape: f32[2,1,64], index: 6, kind: input, shape index: {}]   ;;  %s5876_s7 = inlined_call_operand.vmem [shape: f32[2,64,16], index: 7, kind: input, shape index: {}]   ;;  %s5877_s8 = inlined_call_operand.vmem [shape: f32[2,64,16], index: 8, kind: input, shape index: {}]   ;;  %s5878_s9 = inlined_call_operand.vmem [shape: f32[2,64,64], index: 9, kind: input, shape index: {}]   ;;  %s5879_s10 = inlined_call_operand.vmem [shape: f32[2,1,64], index: 10, kind: input, shape index: {}]   ;;  %s5880_s11 = inlined_call_operand.vmem [shape: f32[2,16,64], index: 11, kind: input, shape index: {}]   ;;  %s5881_s12 = inlined_call_operand.vmem [shape: f32[2,1,64], index: 12, kind: input, shape index: {}]   ;;  %s5882_s13 = inlined_call_operand.vmem [shape: f32[2,64,32], index: 13, kind: input, shape index: {}]   ;;  %s5883_s14 = inlined_call_operand.vmem [shape: f32[1,32], index: 14, kind: input, shape index: {}]   ;;  %s5884_s15 = inlined_call_operand.hbm [shape: f32[16,32], index: 15, kind: output, shape index: {}]  }
   0x1   :  { %v51_v0 = vld [vmem:[%s5869_s0] sm:$0xff]  ;;  %v74_v1 = vld [vmem:[%s5870_s1 + $0x38] sm:$0xff]  ;;  %3962 = vset.pattern.permute.xlu0 %v4278_v3  ;;  %v73_v4 = vld [vmem:[%s5870_s1 + $0x30] sm:$0xff] }
   0x2   :  { %90 = vmatpush.msra.mxu0 %v74_v1  ;;  %56 = vperm.xlu0 %3962, %v51_v0   ;;  %v72_v5 = vld [vmem:[%s5870_s1 + $0x28] sm:$0xff]  ;;  %v71_v6 = vld [vmem:[%s5870_s1 + $0x20] sm:$0xff]  ;;  %v4380_v7 = vshrl.u32 %v53_v2, 7  ;;  %v70_v8 = vld [vmem:[%s5870_s1 + $0x18] sm:$0xff] }
   0x4   :  { %91 = vmatpush.msra.mxu0 %v73_v4  ;;  %3965 = vset.pattern.permute.xlu1 %v4380_v7 }
   0x6   :  { %92 = vmatpush.msra.mxu0 %v72_v5 }
   0x7   :  { %20 = vsyncpa [#allocation7], 0  ;;  %v52_v9 = vld [vmem:[%s5869_s0 + $0x8] sm:$0xff]  ;;  %v69_v10 = vld [vmem:[%s5870_s1 + $0x10] sm:$0xff]  ;;  %v4399_v13 = vand.u32 127, %v53_v2  ;;  %vm75_vm0 = vcmask 523264  }
   0x8   :  { %93 = vmatpush.msra.mxu0 %v71_v6  ;;  %v68_v11 = vld [vmem:[%s5870_s1 + $0x8] sm:$0xff]  ;;  %v67_v12 = vld [vmem:[%s5870_s1] sm:$0xff]  ;;  %v4279_v15 = vmov 0.0   ;;  %vm163_vm3 = vcmask 261120   ;;  %v4280_v25 = vmov 32.0   ;;  %v112_v29 = vld [vmem:[%s5872_s3 + $0x18] sm:$0xff] }
   0x9   :  { %4054 = vrcp.f32 %v4280_v25  ;;  %v116_v30 = vld [vmem:[%s5873_s4 + $0x18] sm:$0xff]  ;;  %226 = vmatpush.msra.mxu1 %v112_v29  ;;  %v111_v31 = vld [vmem:[%s5872_s3 + $0x10] sm:$0xff]  ;;  %v110_v34 = vld [vmem:[%s5872_s3 + $0x8] sm:$0xff]  ;;  %v4455_v1 = vadd.s32 8, %v4380_v7  ;;  %v3857_v4 = vadd.s32 4294967294, %v4380_v7  ;;  %v3869_v5 = vadd.s32 4294967290, %v4380_v7 }
   0xa   :  { %94 = vmatpush.msra.mxu0 %v70_v8  ;;  %59 = vperm.xlu0 %3962, %v52_v9   ;;  %v115_v32 = vld [vmem:[%s5873_s4 + $0x10] sm:$0xff]  ;;  %v114_v35 = vld [vmem:[%s5873_s4 + $0x8] sm:$0xff]  ;;  %v109_v36 = vld [vmem:[%s5872_s3] sm:$0xff]  ;;  %vm276_vm13 = vcmask 130048  }
   0xb   :  { %249 = vmatpush.msra.mxu2 %v116_v30  ;;  %227 = vmatpush.msra.mxu1 %v111_v31  ;;  %v113_v37 = vld [vmem:[%s5873_s4] sm:$0xff]  ;;  %vm270_vm11 = vcmp.eq.s32.totalorder %v4399_v13, %v3857_v4  ;;  %vm355_vm12 = vcmp.eq.s32.totalorder %v4399_v13, %v3869_v5  ;;  %v141_v29 = vld [vmem:[%s5878_s9 + $0x30] sm:$0xff]  ;;  %v124_v31 = vld [vmem:[%s5876_s7 + $0x28] sm:$0xff] }
   0xc   :  { %95 = vmatpush.msra.mxu0 %v69_v10  ;;  %v4045_v54 = vld [vmem:[%s5871_s2] ss:$0 sm:$0xff]  ;;  %3964 = vset.pattern.permute.xlu2 %v4455_v1  ;;  %v4467_v8 = vsel %vm270_vm11, 1.0, %v4279_v15  ;;  %v4470_v9 = vsel %vm355_vm12, 1.0, %v4279_v15  ;;  %v3858_v10 = vadd.s32 4294967294, %v4455_v1 }
   0xd   :  { %250 = vmatpush.msra.mxu2 %v115_v32  ;;  %228 = vmatpush.msra.mxu1 %v110_v34  ;;  %v132_v32 = vld [vmem:[%s5877_s8 + $0x28] sm:$0xff] }
   0xe   :  { %96 = vmatpush.msra.mxu0 %v68_v11  ;;  %v3870_v11 = vadd.s32 4294967290, %v4455_v1  ;;  %vm271_vm14 = vcmp.eq.s32.totalorder %v4399_v13, %v3858_v10 }
   0xf   :  { %v4055_v26 = vpop.eup %4054  ;;  %251 = vmatpush.msra.mxu2 %v114_v35  ;;  %229 = vmatpush.msra.mxu1 %v109_v36  ;;  %v4046_v35 = vld [vmem:[%s5875_s6] ss:$0 sm:$0xff] }
  0x10   :  { %97 = vmatpush.msra.mxu0 %v67_v12  ;;  %v171_v27 = vmul.f32 32.0, %v4055_v26  ;;  %vm175_vm4 = vweird.f32 %v4055_v26  ;;  %vm356_vm15 = vcmp.eq.s32.totalorder %v4399_v13, %v3870_v11  ;;  %v4482_v12 = vsel %vm271_vm14, 1.0, %v4279_v15 }
  0x11   :  { %252 = vmatpush.msra.mxu2 %v113_v37  ;;  %v123_v37 = vld [vmem:[%s5876_s7 + $0x20] sm:$0xff] }
  0x12   :  { %3963 = vset.pattern.permute.xlu0 %v4380_v7  ;;  %v172_v28 = vsub.f32 1.0, %v171_v27  ;;  %v125_v27 = vld [vmem:[%s5876_s7 + $0x30] sm:$0xff] }
  0x14   :  { %v173_v33 = vmul.f32 %v4055_v26, %v172_v28  ;;  %v133_v28 = vld [vmem:[%s5877_s8 + $0x30] sm:$0xff] }
  0x16   :  { %v174_v38 = vadd.f32 %v4055_v26, %v173_v33  ;;  %v140_v33 = vld [vmem:[%s5878_s9 + $0x28] sm:$0xff] }
  0x18   :  { %v4441_v39 = vsel %vm175_vm4, %v4055_v26, %v174_v38  ;;  %v131_v38 = vld [vmem:[%s5877_s8 + $0x20] sm:$0xff] }
  0x74   :  { %v57_v14 = vpop.permute.xlu0 %56 }
  0x75   :  { %vm61_vm1 = vcmp.eq.s32.totalorder %v57_v14, %v4399_v13  ;;  %v4485_v14 = vsel %vm356_vm15, 1.0, %v4279_v15 }
  0x76   :  { %v3849_v16 = vsel %vm61_vm1, 1.0, %v4279_v15 }
  0x77   :  { %3851 = vmatmul.msk.f32.vlgmr.msra.gmra.mxu0 %vm75_vm0, %v3849_v16  ;;  %v3863_v16 = vadd.s32 4294967292, %v4380_v7 }
  0x79   :  { %vm313_vm1 = vcmp.eq.s32.totalorder %v4399_v13, %v3863_v16 }
  0x7c   :  { %v60_v17 = vpop.permute.xlu0 %59 }
  0x7d   :  { %vm62_vm2 = vcmp.eq.s32.totalorder %v60_v17, %v4399_v13  ;;  %v4494_v17 = vsel %vm313_vm1, 1.0, %v4279_v15 }
  0x7e   :  { %v3850_v18 = vsel %vm62_vm2, 1.0, %v4279_v15 }
  0x7f   :  { %3852 = vmatmul.msk.f32.gmra.mxu0 %vm75_vm0, %v3850_v18  ;;  %v3864_v18 = vadd.s32 4294967292, %v4455_v1 }
  0x81   :  { %vm314_vm2 = vcmp.eq.s32.totalorder %v4399_v13, %v3864_v18  ;;  %v134_v13 = vld [vmem:[%s5877_s8 + $0x38] sm:$0xff] }
  0x82   :  { %472 = vmatpush.msrb.mxu0 %v134_v13 }
  0x84   :  { %473 = vmatpush.msrb.mxu0 %v133_v28 }
  0x86   :  { %474 = vmatpush.msrb.mxu0 %v132_v32 }
  0x88   :  { %475 = vmatpush.msrb.mxu0 %v131_v38 }
  0xf4   :  { %v4407_v19 = vpop.f32.mrf.mxu0 }
  0xf5   :  { %v161_v20 = vmul.f32 %v4407_v19, %v4407_v19 }
  0xf7   :  { %v164_v21 = vsel %vm163_vm3, %v161_v20, 0.0  ;;  %v4501_v20 = vsel %vm314_vm2, 1.0, %v4279_v15  ;;  %v142_v15 = vld [vmem:[%s5878_s9 + $0x38] sm:$0xff]  ;;  %vm1255_vm2 = vcmask 7168  }
  0xf8   :  { %165 = vadd.xlane.f32.xlu1 %v164_v21 }
  0xfc   :  { %v4412_v22 = vpop.f32.mrf.mxu0 }
  0xfd   :  { %v162_v23 = vmul.f32 %v4412_v22, %v4412_v22 }
  0xff   :  { %v167_v24 = vsel %vm163_vm3, %v162_v23, 0.0  ;;  %v4508_v23 = vld [vmem:[%s5874_s5] sm:$0xf] }
 0x100   :  { %168 = vadd.xlane.f32.xlu1 %v167_v24  ;;  %v126_v24 = vld [vmem:[%s5876_s7 + $0x38] sm:$0xff]  ;;  %v260_v25 = vperm.slane %v4508_v23, 3  ;;  %v306_v30 = vperm.slane %v4508_v23, 2 }
 0x101   :  { %449 = vmatpush.msrb.mxu2 %v126_v24 }
 0x103   :  { %450 = vmatpush.msrb.mxu2 %v125_v27 }
 0x105   :  { %451 = vmatpush.msrb.mxu2 %v124_v31 }
 0x107   :  { %452 = vmatpush.msrb.mxu2 %v123_v37 }
 0x16b   :  { %v166_v40 = vpop.xlane.xlu1 %165 }
 0x16c   :  { %v177_v41 = vmul.f32 %v4441_v39, %v166_v40  ;;  %v139_v40 = vld [vmem:[%s5878_s9 + $0x20] sm:$0xff] }
 0x16e   :  { %v179_v42 = vadd.f32 1e-05, %v177_v41 }
 0x170   :  { %4056 = vrsqrt.f32 %v179_v42  ;;  %vm187_vm6 = vweird.f32 %v179_v42 }
 0x173   :  { %v169_v43 = vpop.xlane.xlu1 %168 }
 0x174   :  { %v178_v44 = vmul.f32 %v4441_v39, %v169_v43  ;;  %v390_v43 = vperm.slane %v4508_v23, 0 }
 0x176   :  { %v4057_v45 = vpop.eup %4056  ;;  %v180_v46 = vadd.f32 1e-05, %v178_v44  ;;  %v122_v44 = vld [vmem:[%s5876_s7 + $0x18] sm:$0xff] }
 0x177   :  { %v182_v47 = vmul.f32 %v4057_v45, %v179_v42  ;;  %vm188_vm5 = vweird.f32 %v4057_v45  ;;  %v348_v42 = vperm.slane %v4508_v23, 1  ;;  %453 = vmatpush.msrb.mxu2 %v122_v44 }
 0x178   :  { %4058 = vrsqrt.f32 %v180_v46  ;;  %vm189_vm7 = vmor %vm187_vm6, %vm188_vm5  ;;  %vm197_vm9 = vweird.f32 %v180_v46 }
 0x179   :  { %v183_v48 = vmul.f32 %v4057_v45, %v182_v47 }
 0x17b   :  { %v184_v49 = vmul.f32 0.5, %v183_v48 }
 0x17d   :  { %v185_v50 = vsub.f32 1.5, %v184_v49  ;;  %v121_v49 = vld [vmem:[%s5876_s7 + $0x10] sm:$0xff] }
 0x17e   :  { %v4059_v51 = vpop.eup %4058  ;;  %454 = vmatpush.msrb.mxu2 %v121_v49 }
 0x17f   :  { %v192_v52 = vmul.f32 %v4059_v51, %v180_v46  ;;  %v186_v53 = vmul.f32 %v4057_v45, %v185_v50  ;;  %vm198_vm8 = vweird.f32 %v4059_v51  ;;  %v138_v46 = vld [vmem:[%s5878_s9 + $0x18] sm:$0xff]  ;;  %v129_v50 = vld [vmem:[%s5877_s8 + $0x10] sm:$0xff] }
 0x180   :  { %vm199_vm10 = vmor %vm197_vm9, %vm198_vm8 }
 0x181   :  { %v193_v55 = vmul.f32 %v4059_v51, %v192_v52  ;;  %v190_v56 = vsel %vm189_vm7, %v4057_v45, %v186_v53  ;;  %v130_v45 = vld [vmem:[%s5877_s8 + $0x18] sm:$0xff] }
 0x182   :  { %v201_v57 = vmul.f32 %v190_v56, %v4407_v19  ;;  %476 = vmatpush.msrb.mxu0 %v130_v45  ;;  %v128_v56 = vld [vmem:[%s5877_s8 + $0x8] sm:$0xff] }
 0x183   :  { %v194_v58 = vmul.f32 0.5, %v193_v55  ;;  %v120_v55 = vld [vmem:[%s5876_s7 + $0x8] sm:$0xff] }
 0x184   :  { %v206_v59 = vmul.f32 %v4045_v54, %v201_v57  ;;  %477 = vmatpush.msrb.mxu0 %v129_v50  ;;  %v136_v57 = vld [vmem:[%s5878_s9 + $0x8] sm:$0xff]  ;;  %455 = vmatpush.msrb.mxu2 %v120_v55 }
 0x185   :  { %v195_v60 = vsub.f32 1.5, %v194_v58 }
 0x186   :  { %3853 = vmatmul.msk.f32.vlgmr.msra.gmra.mxu1 %vm163_vm3, %v206_v59  ;;  %3855 = vmatmul.msk.f32.vlgmr.msra.gmra.mxu2 %vm163_vm3, %v206_v59 }
 0x187   :  { %v196_v61 = vmul.f32 %v4059_v51, %v195_v60  ;;  %478 = vmatpush.msrb.mxu0 %v128_v56  ;;  %v119_v60 = vld [vmem:[%s5876_s7] sm:$0xff] }
 0x188   :  { %456 = vmatpush.msrb.mxu2 %v119_v60 }
 0x189   :  { %v200_v62 = vsel %vm199_vm10, %v4059_v51, %v196_v61  ;;  %v137_v51 = vld [vmem:[%s5878_s9 + $0x10] sm:$0xff]  ;;  %v127_v61 = vld [vmem:[%s5877_s8] sm:$0xff] }
 0x18a   :  { %v202_v63 = vmul.f32 %v200_v62, %v4412_v22  ;;  %v135_v62 = vld [vmem:[%s5878_s9] sm:$0xff]  ;;  %479 = vmatpush.msrb.mxu0 %v127_v61 }
 0x18c   :  { %v207_v0 = vmul.f32 %v4045_v54, %v202_v63 }
 0x18e   :  { %3854 = vmatmul.msk.f32.gmra.mxu1 %vm163_vm3, %v207_v0  ;;  %3856 = vmatmul.msk.f32.gmra.mxu2 %vm163_vm3, %v207_v0 }
 0x203   :  { %v231_v2 = vpop.f32.mrf.mxu1 }
 0x204   :  { %v261_v34 = vmul.f32 %v260_v25, %v231_v2 }
 0x206   :  { %v266_v47 = vadd.f32 %v4046_v35, %v261_v34 }
 0x20b   :  { %v4462_v6 = vpop.f32.mrf.mxu1 }
 0x20c   :  { %297 = vmatpush.msra.mxu3 %v4462_v6  ;;  %381 = vmatpush.msrb.mxu1 %v4462_v6  ;;  %v262_v58 = vmul.f32 %v260_v25, %v4462_v6 }
 0x20e   :  { %298 = vmatpush.msra.mxu3 %v231_v2  ;;  %382 = vmatpush.msrb.mxu1 %v231_v2  ;;  %v267_v4 = vadd.f32 %v4046_v35, %v262_v58 }
 0x20f   :  { %3861 = vmatmul.msk.f32.vlgmr.msra.gmra.mxu3 %vm276_vm13, %v4467_v8  ;;  %3873 = vmatmul.msk.f32.vlgmr.msrb.gmra.mxu1 %vm276_vm13, %v4470_v9 }
 0x210   :  { %339 = vmatpush.msrb.mxu3 %v4462_v6 }
 0x212   :  { %340 = vmatpush.msrb.mxu3 %v231_v2 }
 0x214   :  { %498 = vmatpush.msra.mxu3 %v142_v15 }
 0x216   :  { %499 = vmatpush.msra.mxu3 %v141_v29 }
 0x217   :  { %3862 = vmatmul.msk.f32.gmra.mxu3 %vm276_vm13, %v4482_v12  ;;  %3874 = vmatmul.msk.f32.gmra.mxu1 %vm276_vm13, %v4485_v14 }
 0x218   :  { %500 = vmatpush.msra.mxu3 %v140_v33 }
 0x21a   :  { %501 = vmatpush.msra.mxu3 %v139_v40 }
 0x21c   :  { %502 = vmatpush.msra.mxu3 %v138_v46 }
 0x21e   :  { %503 = vmatpush.msra.mxu3 %v137_v51 }
 0x21f   :  { %3867 = vmatmul.msk.f32.vlgmr.msrb.gmra.mxu3 %vm276_vm13, %v4494_v17 }
 0x220   :  { %504 = vmatpush.msra.mxu3 %v136_v57 }
 0x222   :  { %505 = vmatpush.msra.mxu3 %v135_v62  ;;  %v144_v62 = vld [vmem:[%s5880_s11] sm:$0xff] }
 0x227   :  { %3868 = vmatmul.msk.f32.gmra.mxu3 %vm276_vm13, %v4501_v20 }
 0x28c   :  { %v384_v36 = vpop.f32.mrf.mxu1 }
 0x28d   :  { %v391_v54 = vmul.f32 %v390_v43, %v384_v36 }
 0x292   :  { %v300_v21 = vpop.f32.mrf.mxu3 }
 0x293   :  { %v307_v41 = vmul.f32 %v306_v30, %v300_v21 }
 0x294   :  { %v387_v2 = vpop.f32.mrf.mxu1 }
 0x295   :  { %v309_v52 = vadd.f32 %v307_v41, %v266_v47  ;;  %v392_v16 = vmul.f32 %v390_v43, %v387_v2 }
 0x29a   :  { %v303_v26 = vpop.f32.mrf.mxu3 }
 0x29b   :  { %v308_v63 = vmul.f32 %v306_v30, %v303_v26 }
 0x29d   :  { %v310_v10 = vadd.f32 %v308_v63, %v267_v4  ;;  %v145_v63 = vld [vmem:[%s5880_s11 + $0x8] sm:$0xff]  ;;  %v146_v4 = vmul.f32 1.442695, %v144_v62 }
 0x2a2   :  { %v342_v48 = vpop.f32.mrf.mxu3 }
 0x2a3   :  { %v349_v53 = vmul.f32 %v348_v42, %v342_v48 }
 0x2a5   :  { %v351_v59 = vadd.f32 %v349_v53, %v309_v52  ;;  %v4047_v52 = vld [vmem:[%s5879_s10] ss:$0 sm:$0xff] }
 0x2a7   :  { %v393_v0 = vadd.f32 %v391_v54, %v351_v59 }
 0x2a9   :  { %v3875_v5 = vmul.f32 -1.442695, %v393_v0 }
 0x2aa   :  { %v345_v6 = vpop.f32.mrf.mxu3 }
 0x2ab   :  { %4060 = vpow2.f32 %v3875_v5  ;;  %v350_v11 = vmul.f32 %v348_v42, %v345_v6  ;;  %v148_v6 = vmul.f32 1.442695, %v145_v63 }
 0x2ad   :  { %v352_v18 = vadd.f32 %v350_v11, %v310_v10 }
 0x2af   :  { %v394_v21 = vadd.f32 %v392_v16, %v352_v18 }
 0x2b1   :  { %v4061_v23 = vpop.eup %4060  ;;  %v3876_v24 = vmul.f32 -1.442695, %v394_v21 }
 0x2b2   :  { %v401_v13 = vadd.f32 1.0, %v4061_v23 }
 0x2b3   :  { %4062 = vpow2.f32 %v3876_v24 }
 0x2b4   :  { %4064 = vrcp.f32 %v401_v13  ;;  %v414_v29 = vand.u32 2147483648, %v401_v13  ;;  %v412_v31 = vand.u32 2147483647, %v401_v13  ;;  %vm408_vm5 = vweird.f32 %v401_v13 }
 0x2b6   :  { %v415_v34 = vor.u32 1.1754944e-38, %v414_v29  ;;  %vm413_vm7 = vcmp.eq.f32.partialorder %v412_v31, 8.507059e+37 }
 0x2b9   :  { %v4063_v15 = vpop.eup %4062 }
 0x2ba   :  { %v4065_v25 = vpop.eup %4064  ;;  %v402_v26 = vadd.f32 1.0, %v4063_v15 }
 0x2bb   :  { %v404_v27 = vmul.f32 %v4065_v25, %v401_v13  ;;  %vm409_vm4 = vweird.f32 %v4065_v25 }
 0x2bc   :  { %4066 = vrcp.f32 %v402_v26  ;;  %vm410_vm6 = vmor %vm408_vm5, %vm409_vm4  ;;  %v429_v41 = vand.u32 2147483648, %v402_v26  ;;  %v427_v43 = vand.u32 2147483647, %v402_v26  ;;  %vm423_vm9 = vweird.f32 %v402_v26 }
 0x2bd   :  { %v405_v28 = vsub.f32 1.0, %v404_v27  ;;  %vm1356_vm4 = vcmask 1041409   ;;  %vm1359_vm5 = vcmask 517120  }
 0x2be   :  { %v430_v45 = vor.u32 1.1754944e-38, %v429_v41  ;;  %vm428_vm11 = vcmp.eq.f32.partialorder %v427_v43, 8.507059e+37 }
 0x2bf   :  { %v406_v30 = vmul.f32 %v4065_v25, %v405_v28 }
 0x2c1   :  { %v407_v32 = vadd.f32 %v4065_v25, %v406_v30 }
 0x2c2   :  { %v4067_v33 = vpop.eup %4066 }
 0x2c3   :  { %v411_v35 = vsel %vm410_vm6, %v4065_v25, %v407_v32  ;;  %v419_v36 = vmul.f32 %v4067_v33, %v402_v26  ;;  %vm424_vm8 = vweird.f32 %v4067_v33 }
 0x2c4   :  { %v416_v37 = vsel %vm413_vm7, %v415_v34, %v411_v35  ;;  %vm425_vm10 = vmor %vm423_vm9, %vm424_vm8 }
 0x2c5   :  { %v4590_v38 = vmul.f32 %v416_v37, %v393_v0  ;;  %v420_v40 = vsub.f32 1.0, %v419_v36 }
 0x2c7   :  { %v421_v42 = vmul.f32 %v4067_v33, %v420_v40  ;;  %3877 = vmatmul.msk.f32.vlgmr.msrb.gmra.mxu2 %vm75_vm0, %v4590_v38  ;;  %3879 = vmatmul.msk.f32.vlgmr.msrb.gmra.mxu0 %vm75_vm0, %v4590_v38 }
 0x2c8   :  { %3881 = vmatmul.msk.f32.vlgmr.msra.gmra.mxu3 %vm75_vm0, %v4590_v38 }
 0x2c9   :  { %v422_v44 = vadd.f32 %v4067_v33, %v421_v42 }
 0x2cb   :  { %v426_v46 = vsel %vm425_vm10, %v4067_v33, %v422_v44  ;;  %vm1891_vm10 = vcmask 1041408  }
 0x2cc   :  { %v431_v47 = vsel %vm428_vm11, %v430_v45, %v426_v46  ;;  %vm1893_vm11 = vcmask 1043456  }
 0x2cd   :  { %v4598_v48 = vmul.f32 %v431_v47, %v394_v21 }
 0x2cf   :  { %3878 = vmatmul.msk.f32.gmra.mxu2 %vm75_vm0, %v4598_v48  ;;  %3880 = vmatmul.msk.f32.gmra.mxu0 %vm75_vm0, %v4598_v48 }
 0x2d0   :  { %3882 = vmatmul.msk.f32.gmra.mxu3 %vm75_vm0, %v4598_v48 }
 0x344   :  { %v4606_v49 = vpop.f32.mrf.mxu0 }
 0x345   :  { %v1086_v50 = vperm.slane %v4606_v49, 3  ;;  %v1073_v51 = vperm.slane %v4606_v49, 2  ;;  %v1099_v55 = vperm.slane %v4606_v49, 4  ;;  %v1112_v16 = vperm.slane %v4606_v49, 5 }
 0x346   :  { %v1047_v26 = vperm.slane %v4606_v49, 0  ;;  %v1060_v29 = vperm.slane %v4606_v49, 1  ;;  %v1125_v63 = vperm.slane %v4606_v49, 6 }
 0x347   :  { %1091 = vperm.xlu1 %3965, %v1086_v50   ;;  %1084 = vperm.xlu2 %3964, %v1073_v51  }
 0x348   :  { %1078 = vperm.xlu0 %3963, %v1073_v51  }
 0x34b   :  { %v507_v53 = vpop.f32.mrf.mxu3 }
 0x34c   :  { %v508_v54 = vadd.f32 %v4047_v52, %v507_v53 }
 0x34e   :  { %v519_v56 = vand.u32 2147483647, %v508_v54  ;;  %v513_v25 = vmax.f32 %v508_v54, 0.0  ;;  %vm515_vm14 = vcmp.ne.f32.partialorder %v508_v54, %v508_v54 }
 0x34f   :  { %1104 = vperm.xlu1 %3965, %v1099_v55   ;;  %1097 = vperm.xlu2 %3964, %v1086_v50  }
 0x350   :  { %v521_v57 = vsub.f32 0.0, %v519_v56  ;;  %3966 = vset.pattern.permute.xlu0 %v4455_v1 }
 0x352   :  { %v523_v58 = vmul.f32 1.442695, %v521_v57  ;;  %v1138_v57 = vperm.slane %v4606_v49, 7 }
 0x353   :  { %v510_v59 = vpop.f32.mrf.mxu3 }
 0x354   :  { %4068 = vpow2.f32 %v523_v58  ;;  %v4615_v60 = vadd.f32 %v4047_v52, %v510_v59  ;;  %v4656_v58 = vpop.f32.mrf.mxu2 }
 0x356   :  { %v520_v61 = vand.u32 2147483647, %v4615_v60  ;;  %vm516_vm1 = vcmp.ne.f32.partialorder %v4615_v60, %v4615_v60 }
 0x357   :  { %3968 = vset.pattern.permute.xlu1 %v4455_v1  ;;  %3967 = vset.pattern.permute.xlu2 %v4380_v7 }
 0x358   :  { %1110 = vperm.xlu0 %3966, %v1099_v55   ;;  %v522_v0 = vsub.f32 0.0, %v520_v61  ;;  %v514_v61 = vmax.f32 %v4615_v60, 0.0 }
 0x35a   :  { %v4069_v2 = vpop.eup %4068  ;;  %v525_v11 = vmul.f32 1.442695, %v522_v0 }
 0x35b   :  { %v527_v5 = vadd.f32 1.0, %v4069_v2  ;;  %v530_v10 = vmul.f32 -0.5, %v4069_v2  ;;  %v533_v21 = vand.u32 2147483647, %v4069_v2 }
 0x35d   :  { %4070 = vlog2.f32 %v527_v5  ;;  %v531_v18 = vadd.f32 1.0, %v530_v10  ;;  %vm534_vm12 = vcmp.lt.f32.partialorder %v533_v21, 0.0004427343 }
 0x35e   :  { %4072 = vpow2.f32 %v146_v4 }
 0x35f   :  { %1123 = vperm.xlu1 %3968, %v1112_v16   ;;  %1117 = vperm.xlu2 %3967, %v1112_v16   ;;  %4074 = vpow2.f32 %v148_v6  ;;  %v532_v13 = vmul.f32 %v4069_v2, %v531_v18 }
 0x360   :  { %3969 = vset.pattern.permute.xlu0 %v4380_v7  ;;  %4076 = vpow2.f32 %v525_v11 }
 0x363   :  { %v4071_v23 = vpop.eup %4070 }
 0x364   :  { %v529_v24 = vmul.f32 0.6931472, %v4071_v23  ;;  %v4073_v15 = vpop.eup %4072 }
 0x365   :  { %v4075_v27 = vpop.eup %4074  ;;  %v4634_v32 = vsub.f32 0.0, %v4073_v15 }
 0x366   :  { %v535_v28 = vsel %vm534_vm12, %v532_v13, %v529_v24  ;;  %v4630_v30 = vpop.eup %4076  ;;  %v4636_v33 = vsub.f32 0.0, %v4075_v27  ;;  %vm1895_vm12 = vcmask 1045504  }
 0x367   :  { %v545_v31 = vadd.f32 %v535_v28, %v513_v25  ;;  %1058 = vperm.xlu1 %3968, %v1047_v26   ;;  %1052 = vperm.xlu2 %3967, %v1047_v26   ;;  %v536_v40 = vadd.f32 1.0, %v4630_v30  ;;  %v539_v45 = vmul.f32 -0.5, %v4630_v30  ;;  %v542_v25 = vand.u32 2147483647, %v4630_v30 }
 0x368   :  { %1065 = vperm.xlu0 %3969, %v1060_v29  }
 0x369   :  { %v4638_v34 = vsel %vm515_vm14, %v508_v54, %v545_v31  ;;  %4078 = vlog2.f32 %v536_v40  ;;  %v540_v62 = vadd.f32 1.0, %v539_v45  ;;  %vm543_vm15 = vcmp.lt.f32.partialorder %v542_v25, 0.0004427343 }
 0x36a   :  { %v551_v35 = vrot.slane %v4638_v34, 1  ;;  %v552_v36 = vrot.slane %v4638_v34, 2  ;;  %v553_v37 = vrot.slane %v4638_v34, 3  ;;  %v554_v41 = vrot.slane %v4638_v34, 4 }
 0x36b   :  { %v565_v42 = vperm.slane %v4638_v34, 0  ;;  %v555_v46 = vrot.slane %v4638_v34, 5  ;;  %v556_v54 = vrot.slane %v4638_v34, 6  ;;  %v557_v0 = vrot.slane %v4638_v34, 7 }
 0x36c   :  { %v566_v43 = vperm.slane %v551_v35, 0  ;;  %v567_v44 = vperm.slane %v552_v36, 0  ;;  %v568_v47 = vperm.slane %v553_v37, 0  ;;  %v569_v55 = vperm.slane %v554_v41, 0 }
 0x36d   :  { %v597_v50 = vmul.f32 %v565_v42, %v4634_v32  ;;  %v598_v51 = vmul.f32 %v565_v42, %v4636_v33  ;;  %v570_v2 = vperm.slane %v555_v46, 0  ;;  %v571_v18 = vperm.slane %v556_v54, 0 }
 0x36e   :  { %v599_v52 = vmul.f32 %v566_v43, %v4634_v32  ;;  %v600_v53 = vmul.f32 %v566_v43, %v4636_v33  ;;  %v601_v56 = vmul.f32 %v567_v44, %v4634_v32  ;;  %v602_v59 = vmul.f32 %v567_v44, %v4636_v33 }
 0x36f   :  { %3971 = vset.pattern.permute.xlu1 %v4380_v7  ;;  %v603_v4 = vmul.f32 %v568_v47, %v4634_v32  ;;  %v629_v5 = vmul.f32 1.442695, %v597_v50  ;;  %3970 = vset.pattern.permute.xlu2 %v4455_v1  ;;  %v604_v6 = vmul.f32 %v568_v47, %v4636_v33  ;;  %v631_v10 = vmul.f32 1.442695, %v598_v51  ;;  %v4079_v24 = vpop.eup %4078  ;;  %v4681_v50 = vpop.f32.mrf.mxu2 }
 0x370   :  { %3972 = vset.pattern.permute.xlu0 %v4455_v1  ;;  %v633_v11 = vmul.f32 1.442695, %v599_v52  ;;  %v635_v16 = vmul.f32 1.442695, %v600_v53  ;;  %v605_v21 = vmul.f32 %v569_v55, %v4634_v32  ;;  %v637_v23 = vmul.f32 1.442695, %v601_v56 }
 0x371   :  { %4080 = vpow2.f32 %v629_v5  ;;  %v606_v13 = vmul.f32 %v569_v55, %v4636_v33  ;;  %v639_v15 = vmul.f32 1.442695, %v602_v59  ;;  %v572_v26 = vperm.slane %v557_v0, 0 }
 0x372   :  { %4082 = vpow2.f32 %v631_v10  ;;  %v607_v27 = vmul.f32 %v570_v2, %v4634_v32  ;;  %v641_v28 = vmul.f32 1.442695, %v603_v4  ;;  %v608_v31 = vmul.f32 %v570_v2, %v4636_v33 }
 0x373   :  { %4084 = vpow2.f32 %v633_v11  ;;  %v643_v35 = vmul.f32 1.442695, %v604_v6  ;;  %v541_v36 = vmul.f32 %v4630_v30, %v540_v62  ;;  %v609_v37 = vmul.f32 %v571_v18, %v4634_v32 }
 0x374   :  { %4086 = vpow2.f32 %v635_v16  ;;  %v645_v40 = vmul.f32 1.442695, %v605_v21  ;;  %v538_v41 = vmul.f32 0.6931472, %v4079_v24  ;;  %v610_v42 = vmul.f32 %v571_v18, %v4636_v33 }
 0x375   :  { %4088 = vpow2.f32 %v637_v23  ;;  %v647_v43 = vmul.f32 1.442695, %v606_v13  ;;  %v611_v45 = vmul.f32 %v572_v26, %v4634_v32  ;;  %v649_v30 = vmul.f32 1.442695, %v607_v27 }
 0x376   :  { %4090 = vpow2.f32 %v639_v15  ;;  %v544_v46 = vsel %vm543_vm15, %v541_v36, %v538_v41  ;;  %v612_v51 = vmul.f32 %v572_v26, %v4636_v33  ;;  %v651_v52 = vmul.f32 1.442695, %v608_v31 }
 0x377   :  { %1130 = vperm.xlu1 %3971, %v1125_v63   ;;  %v4081_v44 = vpop.eup %4080  ;;  %4092 = vpow2.f32 %v641_v28  ;;  %1071 = vperm.xlu2 %3970, %v1060_v29   ;;  %v546_v53 = vadd.f32 %v544_v46, %v514_v61  ;;  %v653_v55 = vmul.f32 1.442695, %v609_v37  ;;  %v655_v29 = vmul.f32 1.442695, %v610_v42 }
 0x378   :  { %1149 = vperm.xlu0 %3972, %v1138_v57   ;;  %v4083_v47 = vpop.eup %4082  ;;  %4094 = vpow2.f32 %v643_v35  ;;  %693 = vst.msk [vmem:[#allocation2] sm:$0xff] %vm75_vm0, %v4081_v44  ;;  %v657_v0 = vmul.f32 1.442695, %v611_v45  ;;  %v659_v5 = vmul.f32 1.442695, %v612_v51 }
 0x379   :  { %v4085_v54 = vpop.eup %4084  ;;  %4096 = vpow2.f32 %v645_v40  ;;  %694 = vst.msk [vmem:[#allocation2 + $0x8] sm:$0xff] %vm75_vm0, %v4083_v47  ;;  %v4690_v59 = vsel %vm516_vm1, %v4615_v60, %v546_v53 }
 0x37a   :  { %v4087_v56 = vpop.eup %4086  ;;  %4098 = vpow2.f32 %v647_v43  ;;  %695 = vst.msk [vmem:[#allocation2 + $0x10] sm:$0xff] %vm75_vm0, %v4085_v54  ;;  %v558_v61 = vrot.slane %v4690_v59, 1  ;;  %v559_v2 = vrot.slane %v4690_v59, 2  ;;  %v560_v6 = vrot.slane %v4690_v59, 3 }
 0x37b   :  { %v4089_v62 = vpop.eup %4088  ;;  %4100 = vpow2.f32 %v649_v30  ;;  %696 = vst.msk [vmem:[#allocation2 + $0x18] sm:$0xff] %vm75_vm0, %v4087_v56  ;;  %v573_v60 = vperm.slane %v4690_v59, 0  ;;  %v561_v18 = vrot.slane %v4690_v59, 4  ;;  %v562_v24 = vrot.slane %v4690_v59, 5 }
 0x37c   :  { %v4091_v4 = vpop.eup %4090  ;;  %4102 = vpow2.f32 %v651_v52  ;;  %697 = vst.msk [vmem:[#allocation2 + $0x20] sm:$0xff] %vm75_vm0, %v4089_v62  ;;  %v574_v11 = vperm.slane %v558_v61, 0  ;;  %v575_v21 = vperm.slane %v559_v2, 0  ;;  %v576_v15 = vperm.slane %v560_v6, 0 }
 0x37d   :  { %v4093_v10 = vpop.eup %4092  ;;  %4104 = vpow2.f32 %v653_v55  ;;  %698 = vst.msk [vmem:[#allocation2 + $0x28] sm:$0xff] %vm75_vm0, %v4091_v4  ;;  %v613_v25 = vmul.f32 %v573_v60, %v4634_v32  ;;  %v614_v26 = vmul.f32 %v573_v60, %v4636_v33  ;;  %v577_v35 = vperm.slane %v561_v18, 0 }
 0x37e   :  { %v4095_v16 = vpop.eup %4094  ;;  %4106 = vpow2.f32 %v655_v29  ;;  %699 = vst.msk [vmem:[#allocation2 + $0x30] sm:$0xff] %vm75_vm0, %v4093_v10  ;;  %v615_v28 = vmul.f32 %v574_v11, %v4634_v32  ;;  %v616_v31 = vmul.f32 %v574_v11, %v4636_v33  ;;  %v617_v36 = vmul.f32 %v575_v21, %v4634_v32 }
 0x37f   :  { %1143 = vperm.xlu1 %3971, %v1138_v57   ;;  %v4097_v23 = vpop.eup %4096  ;;  %4108 = vpow2.f32 %v657_v0  ;;  %700 = vst.msk [vmem:[#allocation2 + $0x38] sm:$0xff] %vm75_vm0, %v4095_v16  ;;  %1136 = vperm.xlu2 %3970, %v1125_v63   ;;  %v4708_v57 = vpop.f32.mrf.mxu2  ;;  %v563_v63 = vrot.slane %v4690_v59, 6  ;;  %v564_v40 = vrot.slane %v4690_v59, 7  ;;  %v618_v41 = vmul.f32 %v575_v21, %v4636_v33 }
 0x380   :  { %3975 = vset.pattern.permute.xlu0 %v4380_v7  ;;  %v4099_v13 = vpop.eup %4098  ;;  %4110 = vpow2.f32 %v659_v5  ;;  %701 = vst.msk [vmem:[#allocation2 + $0x40] sm:$0xff] %vm75_vm0, %v4097_v23  ;;  %v756_v42 = vperm.slane %v4708_v57, 1  ;;  %v578_v44 = vperm.slane %v562_v24, 0  ;;  %v619_v45 = vmul.f32 %v576_v15, %v4634_v32 }
 0x381   :  { %v4101_v27 = vpop.eup %4100  ;;  %702 = vst.msk [vmem:[#allocation2 + $0x48] sm:$0xff] %vm75_vm0, %v4099_v13  ;;  %v661_v30 = vmul.f32 1.442695, %v613_v25  ;;  %v663_v46 = vmul.f32 1.442695, %v614_v26  ;;  %v620_v51 = vmul.f32 %v576_v15, %v4636_v33  ;;  %v579_v55 = vperm.slane %v563_v63, 0 }
 0x382   :  { %v4103_v49 = vpop.eup %4102  ;;  %703 = vst.msk [vmem:[#allocation2 + $0x50] sm:$0xff] %vm75_vm0, %v4101_v27  ;;  %v665_v52 = vmul.f32 1.442695, %v615_v28  ;;  %v667_v53 = vmul.f32 1.442695, %v616_v31  ;;  %v621_v56 = vmul.f32 %v577_v35, %v4634_v32  ;;  %v622_v62 = vmul.f32 %v577_v35, %v4636_v33 }
 0x383   :  { %v4105_v37 = vpop.eup %4104  ;;  %704 = vst.msk [vmem:[#allocation2 + $0x58] sm:$0xff] %vm75_vm0, %v4103_v49  ;;  %4112 = vpow2.f32 %v661_v30  ;;  %v669_v29 = vmul.f32 1.442695, %v617_v36  ;;  %v671_v0 = vmul.f32 1.442695, %v618_v41  ;;  %v580_v61 = vperm.slane %v564_v40, 0 }
 0x384   :  { %v4107_v43 = vpop.eup %4106  ;;  %705 = vst.msk [vmem:[#allocation2 + $0x60] sm:$0xff] %vm75_vm0, %v4105_v37  ;;  %4114 = vpow2.f32 %v663_v46  ;;  %v623_v2 = vmul.f32 %v578_v44, %v4634_v32  ;;  %v673_v4 = vmul.f32 1.442695, %v619_v45  ;;  %v624_v5 = vmul.f32 %v578_v44, %v4636_v33 }
 0x385   :  { %v4109_v47 = vpop.eup %4108  ;;  %706 = vst.msk [vmem:[#allocation2 + $0x68] sm:$0xff] %vm75_vm0, %v4107_v43  ;;  %4116 = vpow2.f32 %v665_v52  ;;  %v675_v6 = vmul.f32 1.442695, %v620_v51  ;;  %v625_v10 = vmul.f32 %v579_v55, %v4634_v32  ;;  %v677_v60 = vmul.f32 1.442695, %v621_v56  ;;  %v4773_v56 = vpop.f32.mrf.mxu0 }
 0x386   :  { %v4111_v54 = vpop.eup %4110  ;;  %707 = vst.msk [vmem:[#allocation2 + $0x70] sm:$0xff] %vm75_vm0, %v4109_v47  ;;  %4118 = vpow2.f32 %v667_v53  ;;  %v626_v11 = vmul.f32 %v579_v55, %v4636_v33  ;;  %v679_v16 = vmul.f32 1.442695, %v622_v62  ;;  %v627_v21 = vmul.f32 %v580_v61, %v4634_v32 }
 0x387   :  { %3976 = vset.pattern.permute.xlu1 %v4455_v1  ;;  %708 = vst.msk [vmem:[#allocation2 + $0x78] sm:$0xff] %vm75_vm0, %v4111_v54  ;;  %3973 = vset.pattern.permute.xlu2 %v4380_v7  ;;  %4120 = vpow2.f32 %v669_v29  ;;  %v681_v23 = vmul.f32 1.442695, %v623_v2  ;;  %v782_v24 = vperm.slane %v4708_v57, 3  ;;  %v628_v15 = vmul.f32 %v580_v61, %v4636_v33 }
 0x388   :  { %761 = vperm.xlu0 %3975, %v756_v42   ;;  %4122 = vpow2.f32 %v671_v0  ;;  %v683_v25 = vmul.f32 1.442695, %v624_v5  ;;  %v743_v26 = vperm.slane %v4708_v57, 0  ;;  %v685_v28 = vmul.f32 1.442695, %v625_v10 }
 0x389   :  { %v4113_v18 = vpop.eup %4112  ;;  %4124 = vpow2.f32 %v673_v4  ;;  %v687_v31 = vmul.f32 1.442695, %v626_v11  ;;  %v689_v49 = vmul.f32 1.442695, %v627_v21  ;;  %v691_v35 = vmul.f32 1.442695, %v628_v15  ;;  %v4809_v15 = vpop.f32.mrf.mxu2 }
 0x38a   :  { %v4115_v13 = vpop.eup %4114  ;;  %4126 = vpow2.f32 %v675_v6  ;;  %709 = vst.msk [vmem:[#allocation2 + $0x80] sm:$0xff] %vm75_vm0, %v4113_v18  ;;  %v795_v41 = vperm.slane %v4708_v57, 4  ;;  %v808_v51 = vperm.slane %v4708_v57, 5  ;;  %v821_v54 = vperm.slane %v4708_v57, 6 }
 0x38b   :  { %v4117_v27 = vpop.eup %4116  ;;  %4128 = vpow2.f32 %v677_v60  ;;  %710 = vst.msk [vmem:[#allocation2 + $0x88] sm:$0xff] %vm75_vm0, %v4115_v13  ;;  %v769_v55 = vperm.slane %v4708_v57, 2  ;;  %v834_v29 = vperm.slane %v4708_v57, 7  ;;  %v1203_v62 = vperm.slane %v4773_v56, 4 }
 0x38c   :  { %v4119_v32 = vpop.eup %4118  ;;  %4130 = vpow2.f32 %v679_v16  ;;  %711 = vst.msk [vmem:[#allocation2 + $0x90] sm:$0xff] %vm75_vm0, %v4117_v27  ;;  %v1177_v4 = vperm.slane %v4773_v56, 2  ;;  %v1190_v10 = vperm.slane %v4773_v56, 3  ;;  %v1151_v60 = vperm.slane %v4773_v56, 0 }
 0x38d   :  { %v4121_v33 = vpop.eup %4120  ;;  %4132 = vpow2.f32 %v681_v23  ;;  %712 = vst.msk [vmem:[#allocation2 + $0x98] sm:$0xff] %vm75_vm0, %v4119_v32  ;;  %v1216_v21 = vperm.slane %v4773_v56, 5  ;;  %v1242_v23 = vperm.slane %v4773_v56, 7 }
 0x38e   :  { %v4123_v63 = vpop.eup %4122  ;;  %4134 = vpow2.f32 %v683_v25  ;;  %713 = vst.msk [vmem:[#allocation2 + $0xa0] sm:$0xff] %vm75_vm0, %v4121_v33  ;;  %v4813_v25 = vmul.f32 %v4638_v34, %v4590_v38 }
 0x38f   :  { %767 = vperm.xlu1 %3976, %v756_v42   ;;  %748 = vperm.xlu2 %3973, %v743_v26   ;;  %v4125_v36 = vpop.eup %4124  ;;  %4136 = vpow2.f32 %v685_v28  ;;  %714 = vst.msk [vmem:[#allocation2 + $0xa8] sm:$0xff] %vm75_vm0, %v4123_v63  ;;  %v1229_v63 = vperm.slane %v4773_v56, 6 }
 0x390   :  { %787 = vperm.xlu0 %3975, %v782_v24   ;;  %v4127_v37 = vpop.eup %4126  ;;  %4138 = vpow2.f32 %v687_v31  ;;  %715 = vst.msk [vmem:[#allocation2 + $0xb0] sm:$0xff] %vm75_vm0, %v4125_v36  ;;  %v951_v32 = vperm.slane %v4813_v25, 0  ;;  %v899_v36 = vperm.slane %v4809_v15, 4 }
 0x391   :  { %v4129_v40 = vpop.eup %4128  ;;  %4140 = vpow2.f32 %v689_v49  ;;  %716 = vst.msk [vmem:[#allocation2 + $0xb8] sm:$0xff] %vm75_vm0, %v4127_v37  ;;  %v1164_v49 = vperm.slane %v4773_v56, 1 }
 0x392   :  { %v4131_v42 = vpop.eup %4130  ;;  %4142 = vpow2.f32 %v691_v35  ;;  %717 = vst.msk [vmem:[#allocation2 + $0xc0] sm:$0xff] %vm75_vm0, %v4129_v40  ;;  %v729_v35 = vrot.slane %v4813_v25, 1 }
 0x393   :  { %v4133_v43 = vpop.eup %4132  ;;  %718 = vst.msk [vmem:[#allocation2 + $0xc8] sm:$0xff] %vm75_vm0, %v4131_v42 }
 0x394   :  { %v4135_v44 = vpop.eup %4134  ;;  %719 = vst.msk [vmem:[#allocation2 + $0xd0] sm:$0xff] %vm75_vm0, %v4133_v43  ;;  %v952_v37 = vperm.slane %v729_v35, 0  ;;  %v735_v35 = vrot.slane %v4813_v25, 7 }
 0x395   :  { %v4137_v45 = vpop.eup %4136  ;;  %720 = vst.msk [vmem:[#allocation2 + $0xd8] sm:$0xff] %vm75_vm0, %v4135_v44  ;;  %v731_v44 = vrot.slane %v4813_v25, 3 }
 0x396   :  { %v4139_v30 = vpop.eup %4138  ;;  %721 = vst.msk [vmem:[#allocation2 + $0xe0] sm:$0xff] %vm75_vm0, %v4137_v45 }
 0x397   :  { %3979 = vset.pattern.permute.xlu1 %v4380_v7  ;;  %3974 = vset.pattern.permute.xlu2 %v4455_v1  ;;  %v4141_v46 = vpop.eup %4140  ;;  %722 = vst.msk [vmem:[#allocation2 + $0xe8] sm:$0xff] %vm75_vm0, %v4139_v30  ;;  %v954_v30 = vperm.slane %v731_v44, 0 }
 0x398   :  { %800 = vperm.xlu0 %3975, %v795_v41   ;;  %v4143_v47 = vpop.eup %4142  ;;  %723 = vst.msk [vmem:[#allocation2 + $0xf0] sm:$0xff] %vm75_vm0, %v4141_v46 }
 0x399   :  { %724 = vst.msk [vmem:[#allocation2 + $0xf8] sm:$0xff] %vm75_vm0, %v4143_v47 }
 0x39f   :  { %813 = vperm.xlu1 %3979, %v808_v51   ;;  %754 = vperm.xlu2 %3974, %v743_v26   ;;  %v860_v26 = vperm.slane %v4809_v15, 1 }
 0x3a0   :  { %3980 = vset.pattern.permute.xlu0 %v4455_v1 }
 0x3a1   :  { %v1085_v52 = vpop.permute.xlu2 %1084 }
 0x3a2   :  { %1261 = vst.msk [vmem:[#allocation4 + $0x28] sm:$0xff] %vm1255_vm2, %v1085_v52  ;;  %v847_v52 = vperm.slane %v4809_v15, 0 }
 0x3a7   :  { %3982 = vset.pattern.permute.xlu1 %v4455_v1  ;;  %3977 = vset.pattern.permute.xlu2 %v4380_v7 }
 0x3a8   :  { %819 = vperm.xlu0 %3980, %v808_v51  }
 0x3a9   :  { %v1098_v53 = vpop.permute.xlu2 %1097 }
 0x3aa   :  { %1263 = vst.msk [vmem:[#allocation4 + $0x38] sm:$0xff] %vm1255_vm2, %v1098_v53  ;;  %v732_v53 = vrot.slane %v4813_v25, 4 }
 0x3af   :  { %832 = vperm.xlu1 %3982, %v821_v54   ;;  %774 = vperm.xlu2 %3977, %v769_v55  }
 0x3b0   :  { %3983 = vset.pattern.permute.xlu0 %v4380_v7 }
 0x3b7   :  { %845 = vperm.xlu1 %3982, %v834_v29   ;;  %3978 = vset.pattern.permute.xlu2 %v4455_v1 }
 0x3b8   :  { %1208 = vperm.xlu0 %3983, %v1203_v62  }
 0x3b9   :  { %v1092_v0 = vpop.permute.xlu1 %1091  ;;  %v1118_v61 = vpop.permute.xlu2 %1117 }
 0x3ba   :  { %1262 = vst.msk [vmem:[#allocation4 + $0x30] sm:$0xff] %vm1255_vm2, %v1092_v0  ;;  %v1079_v2 = vpop.permute.xlu0 %1078 }
 0x3bb   :  { %1266 = vst.msk [vmem:[#allocation4 + $0x50] sm:$0xff] %vm1255_vm2, %v1118_v61 }
 0x3bc   :  { %1260 = vst.msk [vmem:[#allocation4 + $0x20] sm:$0xff] %vm1255_vm2, %v1079_v2 }
 0x3bf   :  { %1188 = vperm.xlu1 %3982, %v1177_v4   ;;  %780 = vperm.xlu2 %3978, %v769_v55   ;;  %v730_v55 = vrot.slane %v4813_v25, 2 }
 0x3c0   :  { %3986 = vset.pattern.permute.xlu0 %v4455_v1 }
 0x3c1   :  { %v1105_v5 = vpop.permute.xlu1 %1104  ;;  %v1053_v6 = vpop.permute.xlu2 %1052  ;;  %v953_v61 = vperm.slane %v730_v55, 0 }
 0x3c2   :  { %1264 = vst.msk [vmem:[#allocation4 + $0x40] sm:$0xff] %vm1255_vm2, %v1105_v5 }
 0x3c3   :  { %1256 = vst.msk [vmem:[#allocation4] sm:$0xff] %vm1255_vm2, %v1053_v6  ;;  %v733_v6 = vrot.slane %v4813_v25, 5 }
 0x3c7   :  { %1201 = vperm.xlu1 %3982, %v1190_v10   ;;  %793 = vperm.xlu2 %3978, %v782_v24  }
 0x3c8   :  { %1162 = vperm.xlu0 %3986, %v1151_v60  }
 0x3ca   :  { %v1111_v11 = vpop.permute.xlu0 %1110 }
 0x3cb   :  { %1265 = vst.msk [vmem:[#allocation4 + $0x48] sm:$0xff] %vm1255_vm2, %v1111_v11 }
 0x3cf   :  { %3985 = vset.pattern.permute.xlu1 %v4380_v7  ;;  %806 = vperm.xlu2 %3978, %v795_v41  }
 0x3d0   :  { %3989 = vset.pattern.permute.xlu0 %v4380_v7 }
 0x3d1   :  { %v1124_v16 = vpop.permute.xlu1 %1123  ;;  %v1072_v18 = vpop.permute.xlu2 %1071 }
 0x3d2   :  { %1267 = vst.msk [vmem:[#allocation4 + $0x58] sm:$0xff] %vm1255_vm2, %v1124_v16 }
 0x3d3   :  { %1259 = vst.msk [vmem:[#allocation4 + $0x18] sm:$0xff] %vm1255_vm2, %v1072_v18 }
 0x3d7   :  { %1221 = vperm.xlu1 %3985, %v1216_v21   ;;  %3981 = vset.pattern.permute.xlu2 %v4380_v7 }
 0x3d8   :  { %1247 = vperm.xlu0 %3989, %v1242_v23  }
 0x3d9   :  { %v1059_v57 = vpop.permute.xlu1 %1058  ;;  %v1137_v13 = vpop.permute.xlu2 %1136  ;;  %v1448_v16 = vld [vmem:[#allocation4 + $0x58] sm:$0xff] }
 0x3da   :  { %v1066_v24 = vpop.permute.xlu0 %1065  ;;  %1257 = vst.msk [vmem:[#allocation4 + $0x8] sm:$0xff] %vm1255_vm2, %v1059_v57 }
 0x3db   :  { %1258 = vst.msk [vmem:[#allocation4 + $0x10] sm:$0xff] %vm1255_vm2, %v1066_v24 }
 0x3dc   :  { %1269 = vst.msk [vmem:[#allocation4 + $0x68] sm:$0xff] %vm1255_vm2, %v1137_v13 }
 0x3df   :  { %1156 = vperm.xlu1 %3985, %v1151_v60   ;;  %826 = vperm.xlu2 %3981, %v821_v54   ;;  %v925_v54 = vperm.slane %v4809_v15, 6  ;;  %v956_v60 = vperm.slane %v733_v6, 0 }
 0x3e0   :  { %3992 = vset.pattern.permute.xlu0 %v4455_v1 }
 0x3e7   :  { %3988 = vset.pattern.permute.xlu1 %v4455_v1  ;;  %839 = vperm.xlu2 %3981, %v834_v29   ;;  %v955_v29 = vperm.slane %v732_v53, 0 }
 0x3e8   :  { %871 = vperm.xlu0 %3992, %v860_v26  }
 0x3e9   :  { %v1131_v27 = vpop.permute.xlu1 %1130  ;;  %v749_v31 = vpop.permute.xlu2 %748 }
 0x3ea   :  { %v1150_v28 = vpop.permute.xlu0 %1149  ;;  %1268 = vst.msk [vmem:[#allocation4 + $0x60] sm:$0xff] %vm1255_vm2, %v1131_v27  ;;  %v983_v33 = vmul.f32 %v951_v32, %v749_v31  ;;  %v1302_v27 = vld [vmem:[#allocation4 + $0x10] sm:$0xff] }
 0x3eb   :  { %1271 = vst.msk [vmem:[#allocation4 + $0x78] sm:$0xff] %vm1255_vm2, %v1150_v28 }
 0x3ec   :  { %1015 = vst.msk [vmem:[#allocation3] sm:$0xff] %vm75_vm0, %v983_v33 }
 0x3ef   :  { %1175 = vperm.xlu1 %3988, %v1164_v49   ;;  %1182 = vperm.xlu2 %3981, %v1177_v4  }
 0x3f0   :  { %3995 = vset.pattern.permute.xlu0 %v4380_v7 }
 0x3f1   :  { %v1144_v34 = vpop.permute.xlu1 %1143 }
 0x3f2   :  { %1270 = vst.msk [vmem:[#allocation4 + $0x70] sm:$0xff] %vm1255_vm2, %v1144_v34 }
 0x3f7   :  { %1240 = vperm.xlu1 %3988, %v1229_v63   ;;  %1195 = vperm.xlu2 %3981, %v1190_v10   ;;  %v1375_v10 = vld [vmem:[#allocation4 + $0x30] sm:$0xff] }
 0x3f8   :  { %904 = vperm.xlu0 %3995, %v899_v36  }
 0x3f9   :  { %v755_v42 = vpop.permute.xlu2 %754 }
 0x3fa   :  { %v762_v40 = vpop.permute.xlu0 %761  ;;  %v984_v43 = vmul.f32 %v951_v32, %v755_v42 }
 0x3fb   :  { %v985_v41 = vmul.f32 %v952_v37, %v762_v40  ;;  %v1518_v40 = vld [vmem:[#allocation4 + $0x68] sm:$0xff] }
 0x3fc   :  { %1016 = vst.msk [vmem:[#allocation3 + $0x8] sm:$0xff] %vm75_vm0, %v984_v43 }
 0x3fd   :  { %1017 = vst.msk [vmem:[#allocation3 + $0x10] sm:$0xff] %vm75_vm0, %v985_v41  ;;  %v958_v41 = vperm.slane %v735_v35, 0 }
 0x3ff   :  { %3991 = vset.pattern.permute.xlu1 %v4380_v7  ;;  %3984 = vset.pattern.permute.xlu2 %v4455_v1 }
 0x400   :  { %3998 = vset.pattern.permute.xlu0 %v4455_v1 }
 0x401   :  { %v768_v45 = vpop.permute.xlu1 %767 }
 0x402   :  { %v986_v46 = vmul.f32 %v952_v37, %v768_v45  ;;  %v788_v47 = vpop.permute.xlu0 %787  ;;  %v886_v37 = vperm.slane %v4809_v15, 3 }
 0x403   :  { %v989_v51 = vmul.f32 %v954_v30, %v788_v47 }
 0x404   :  { %1018 = vst.msk [vmem:[#allocation3 + $0x18] sm:$0xff] %vm75_vm0, %v986_v46 }
 0x405   :  { %1021 = vst.msk [vmem:[#allocation3 + $0x30] sm:$0xff] %vm75_vm0, %v989_v51 }
 0x407   :  { %852 = vperm.xlu1 %3991, %v847_v52   ;;  %1214 = vperm.xlu2 %3984, %v1203_v62  }
 0x408   :  { %936 = vperm.xlu0 %3998, %v925_v54  }
 0x409   :  { %v775_v4 = vpop.permute.xlu2 %774 }
 0x40a   :  { %v801_v0 = vpop.permute.xlu0 %800  ;;  %v987_v5 = vmul.f32 %v953_v61, %v775_v4 }
 0x40b   :  { %v991_v2 = vmul.f32 %v955_v29, %v801_v0 }
 0x40c   :  { %1019 = vst.msk [vmem:[#allocation3 + $0x20] sm:$0xff] %vm75_vm0, %v987_v5  ;;  %v1374_v5 = vld [vmem:[#allocation4 + $0x28] sm:$0xff] }
 0x40d   :  { %1023 = vst.msk [vmem:[#allocation3 + $0x40] sm:$0xff] %vm75_vm0, %v991_v2 }
 0x40f   :  { %865 = vperm.xlu1 %3991, %v860_v26   ;;  %1227 = vperm.xlu2 %3984, %v1216_v21   ;;  %v734_v26 = vrot.slane %v4813_v25, 6  ;;  %v873_v21 = vperm.slane %v4809_v15, 2 }
 0x410   :  { %4003 = vset.pattern.permute.xlu0 %v4278_v3 }
 0x411   :  { %1397 = vperm.xlu0 %4003, %v1375_v10   ;;  %v814_v62 = vpop.permute.xlu1 %813  ;;  %v957_v28 = vperm.slane %v734_v26, 0 }
 0x412   :  { %v993_v11 = vmul.f32 %v956_v60, %v814_v62  ;;  %v1445_v62 = vld [vmem:[#allocation4 + $0x40] sm:$0xff] }
 0x414   :  { %1025 = vst.msk [vmem:[#allocation3 + $0x50] sm:$0xff] %vm75_vm0, %v993_v11 }
 0x417   :  { %3994 = vset.pattern.permute.xlu1 %v4455_v1  ;;  %3987 = vset.pattern.permute.xlu2 %v4380_v7 }
 0x419   :  { %1474 = vperm.xlu0 %4003, %v1448_v16   ;;  %v781_v24 = vpop.permute.xlu2 %780 }
 0x41a   :  { %v820_v18 = vpop.permute.xlu0 %819  ;;  %v988_v13 = vmul.f32 %v953_v61, %v781_v24  ;;  %v1447_v24 = vld [vmem:[#allocation4 + $0x50] sm:$0xff] }
 0x41b   :  { %v994_v57 = vmul.f32 %v956_v60, %v820_v18 }
 0x41c   :  { %1020 = vst.msk [vmem:[#allocation3 + $0x28] sm:$0xff] %vm75_vm0, %v988_v13 }
 0x41d   :  { %1026 = vst.msk [vmem:[#allocation3 + $0x58] sm:$0xff] %vm75_vm0, %v994_v57 }
 0x41f   :  { %884 = vperm.xlu1 %3994, %v873_v21   ;;  %1169 = vperm.xlu2 %3987, %v1164_v49  }
 0x421   :  { %1324 = vperm.xlu0 %4003, %v1302_v27   ;;  %v833_v32 = vpop.permute.xlu1 %832  ;;  %v794_v33 = vpop.permute.xlu2 %793 }
 0x422   :  { %v996_v31 = vmul.f32 %v957_v28, %v833_v32  ;;  %v990_v34 = vmul.f32 %v954_v30, %v794_v33  ;;  %v1517_v33 = vld [vmem:[#allocation4 + $0x60] sm:$0xff] }
 0x424   :  { %1028 = vst.msk [vmem:[#allocation3 + $0x68] sm:$0xff] %vm75_vm0, %v996_v31  ;;  %v1301_v31 = vld [vmem:[#allocation4 + $0x8] sm:$0xff] }
 0x425   :  { %1022 = vst.msk [vmem:[#allocation3 + $0x38] sm:$0xff] %vm75_vm0, %v990_v34 }
 0x427   :  { %897 = vperm.xlu1 %3994, %v886_v37   ;;  %1234 = vperm.xlu2 %3987, %v1229_v63   ;;  %v912_v63 = vperm.slane %v4809_v15, 5 }
 0x429   :  { %1536 = vperm.xlu0 %4003, %v1518_v40   ;;  %v846_v49 = vpop.permute.xlu1 %845  ;;  %v807_v44 = vpop.permute.xlu2 %806 }
 0x42a   :  { %v998_v42 = vmul.f32 %v958_v41, %v846_v49  ;;  %v1209_v43 = vpop.permute.xlu0 %1208  ;;  %v992_v25 = vmul.f32 %v955_v29, %v807_v44 }
 0x42b   :  { %1280 = vst.msk [vmem:[#allocation4 + $0xc0] sm:$0xff] %vm1255_vm2, %v1209_v43 }
 0x42c   :  { %1030 = vst.msk [vmem:[#allocation3 + $0x78] sm:$0xff] %vm75_vm0, %v998_v42 }
 0x42d   :  { %1024 = vst.msk [vmem:[#allocation3 + $0x48] sm:$0xff] %vm75_vm0, %v992_v25 }
 0x42f   :  { %3997 = vset.pattern.permute.xlu1 %v4380_v7  ;;  %3990 = vset.pattern.permute.xlu2 %v4455_v1 }
 0x431   :  { %v1189_v45 = vpop.permute.xlu1 %1188 }
 0x432   :  { %1277 = vst.msk [vmem:[#allocation4 + $0xa8] sm:$0xff] %vm1255_vm2, %v1189_v45 }
 0x437   :  { %917 = vperm.xlu1 %3997, %v912_v63   ;;  %1253 = vperm.xlu2 %3990, %v1242_v23  }
 0x439   :  { %v1202_v30 = vpop.permute.xlu1 %1201  ;;  %v827_v47 = vpop.permute.xlu2 %826 }
 0x43a   :  { %1279 = vst.msk [vmem:[#allocation4 + $0xb8] sm:$0xff] %vm1255_vm2, %v1202_v30  ;;  %v1163_v46 = vpop.permute.xlu0 %1162  ;;  %v995_v51 = vmul.f32 %v957_v28, %v827_v47 }
 0x43b   :  { %1273 = vst.msk [vmem:[#allocation4 + $0x88] sm:$0xff] %vm1255_vm2, %v1163_v46 }
 0x43c   :  { %1027 = vst.msk [vmem:[#allocation3 + $0x60] sm:$0xff] %vm75_vm0, %v995_v51 }
 0x43f   :  { %930 = vperm.xlu1 %3997, %v925_v54   ;;  %858 = vperm.xlu2 %3990, %v847_v52   ;;  %v938_v54 = vperm.slane %v4809_v15, 7  ;;  %v4899_v52 = vmul.f32 %v4690_v59, %v4598_v48  ;;  %v1520_v15 = vld [vmem:[#allocation4 + $0x78] sm:$0xff] }
 0x441   :  { %v840_v53 = vpop.permute.xlu2 %839  ;;  %v736_v4 = vrot.slane %v4899_v52, 1  ;;  %v1664_v60 = vld [vmem:[#allocation4 + $0xb8] sm:$0xff]  ;;  %v739_v57 = vrot.slane %v4899_v52, 4  ;;  %v959_v34 = vperm.slane %v4899_v52, 0  ;;  %v737_v46 = vrot.slane %v4899_v52, 2 }
 0x442   :  { %v997_v55 = vmul.f32 %v958_v41, %v840_v53  ;;  %v1590_v32 = vld [vmem:[#allocation4 + $0x88] sm:$0xff]  ;;  %v1376_v53 = vld [vmem:[#allocation4 + $0x38] sm:$0xff] }
 0x443   :  { %v960_v6 = vperm.slane %v736_v4, 0  ;;  %v4912_v26 = vperm.slane %v739_v57, 0  ;;  %v961_v51 = vperm.slane %v737_v46, 0 }
 0x444   :  { %1029 = vst.msk [vmem:[#allocation3 + $0x70] sm:$0xff] %vm75_vm0, %v997_v55 }
 0x447   :  { %4000 = vset.pattern.permute.xlu1 %v4455_v1  ;;  %3993 = vset.pattern.permute.xlu2 %v4380_v7 }
 0x449   :  { %v1222_v56 = vpop.permute.xlu1 %1221  ;;  %v1183_v29 = vpop.permute.xlu2 %1182 }
 0x44a   :  { %1282 = vst.msk [vmem:[#allocation4 + $0xd0] sm:$0xff] %vm1255_vm2, %v1222_v56  ;;  %v1248_v23 = vpop.permute.xlu0 %1247 }
 0x44b   :  { %1286 = vst.msk [vmem:[#allocation4 + $0xf0] sm:$0xff] %vm1255_vm2, %v1248_v23 }
 0x44c   :  { %1276 = vst.msk [vmem:[#allocation4 + $0xa0] sm:$0xff] %vm1255_vm2, %v1183_v29  ;;  %v738_v29 = vrot.slane %v4899_v52, 3 }
 0x44f   :  { %949 = vperm.xlu1 %4000, %v938_v54   ;;  %878 = vperm.xlu2 %3993, %v873_v21  }
 0x451   :  { %v1157_v0 = vpop.permute.xlu1 %1156  ;;  %v1196_v61 = vpop.permute.xlu2 %1195  ;;  %v1735_v18 = vld [vmem:[#allocation4 + $0xd0] sm:$0xff] }
 0x452   :  { %1272 = vst.msk [vmem:[#allocation4 + $0x80] sm:$0xff] %vm1255_vm2, %v1157_v0  ;;  %v962_v0 = vperm.slane %v738_v29, 0  ;;  %v1290_v29 = vld [vmem:[#allocation2] sm:$0xff] }
 0x453   :  { %v1661_v2 = vld [vmem:[#allocation4 + $0xa0] sm:$0xff]  ;;  %1278 = vst.msk [vmem:[#allocation4 + $0xb0] sm:$0xff] %vm1255_vm2, %v1196_v61  ;;  %v1446_v61 = vld [vmem:[#allocation4 + $0x48] sm:$0xff] }
 0x454   :  { %1675 = vperm.xlu0 %4003, %v1661_v2  }
 0x457   :  { %4002 = vset.pattern.permute.xlu1 %v4278_v3  ;;  %891 = vperm.xlu2 %3993, %v886_v37  }
 0x458   :  { %1392 = vperm.xlu1 %4002, %v1374_v5  }
 0x45a   :  { %v872_v10 = vpop.permute.xlu0 %871  ;;  %v1663_v45 = vld [vmem:[#allocation4 + $0xb0] sm:$0xff] }
 0x45b   :  { %v1002_v59 = vmul.f32 %v960_v6, %v872_v10 }
 0x45c   :  { %1690 = vperm.xlu0 %4003, %v1664_v60   ;;  %v1300_v60 = vld [vmem:[#allocation4] sm:$0xff] }
 0x45d   :  { %1034 = vst.msk [vmem:[#allocation3 + $0x98] sm:$0xff] %vm75_vm0, %v1002_v59 }
 0x45f   :  { %3996 = vset.pattern.permute.xlu2 %v4455_v1 }
 0x460   :  { %1459 = vperm.xlu1 %4002, %v1445_v62   ;;  %v740_v62 = vrot.slane %v4899_v52, 5 }
 0x461   :  { %v1176_v11 = vpop.permute.xlu1 %1175  ;;  %v1215_v16 = vpop.permute.xlu2 %1214 }
 0x462   :  { %1275 = vst.msk [vmem:[#allocation4 + $0x98] sm:$0xff] %vm1255_vm2, %v1176_v11  ;;  %v1807_v11 = vld [vmem:[#allocation4 + $0xf0] sm:$0xff] }
 0x463   :  { %1281 = vst.msk [vmem:[#allocation4 + $0xc8] sm:$0xff] %vm1255_vm2, %v1215_v16  ;;  %v964_v16 = vperm.slane %v740_v62, 0  ;;  %v1295_v62 = vld [vmem:[#allocation3] sm:$0xff] }
 0x464   :  { %1757 = vperm.xlu0 %4003, %v1735_v18   ;;  %v1303_v18 = vld [vmem:[#allocation4 + $0x18] sm:$0xff] }
 0x467   :  { %910 = vperm.xlu2 %3996, %v899_v36   ;;  %v741_v36 = vrot.slane %v4899_v52, 6 }
 0x468   :  { %1469 = vperm.xlu1 %4002, %v1447_v24  }
 0x469   :  { %v1241_v13 = vpop.permute.xlu1 %1240  ;;  %v1228_v27 = vpop.permute.xlu2 %1227  ;;  %v4923_v35 = vperm.slane %v741_v36, 0  ;;  %v1592_v59 = vld [vmem:[#allocation4 + $0x98] sm:$0xff] }
 0x46a   :  { %1285 = vst.msk [vmem:[#allocation4 + $0xe8] sm:$0xff] %vm1255_vm2, %v1241_v13  ;;  %v905_v21 = vpop.permute.xlu0 %904  ;;  %v1734_v47 = vld [vmem:[#allocation4 + $0xc8] sm:$0xff] }
 0x46b   :  { %v1007_v28 = vmul.f32 %v4912_v26, %v905_v21  ;;  %1283 = vst.msk [vmem:[#allocation4 + $0xd8] sm:$0xff] %vm1255_vm2, %v1228_v27  ;;  %v1519_v27 = vld [vmem:[#allocation4 + $0x70] sm:$0xff] }
 0x46c   :  { %1608 = vperm.xlu0 %4003, %v1590_v32  }
 0x46d   :  { %1039 = vst.msk [vmem:[#allocation3 + $0xc0] sm:$0xff] %vm75_vm0, %v1007_v28 }
 0x46f   :  { %923 = vperm.xlu2 %3996, %v912_v63   ;;  %v1373_v63 = vld [vmem:[#allocation4 + $0x20] sm:$0xff] }
 0x470   :  { %1319 = vperm.xlu1 %4002, %v1301_v31  }
 0x477   :  { %3999 = vset.pattern.permute.xlu2 %v4380_v7 }
 0x478   :  { %1531 = vperm.xlu1 %4002, %v1517_v33   ;;  %v1662_v33 = vld [vmem:[#allocation4 + $0xa8] sm:$0xff] }
 0x479   :  { %v853_v37 = vpop.permute.xlu1 %852  ;;  %v1170_v49 = vpop.permute.xlu2 %1169 }
 0x47a   :  { %v937_v40 = vpop.permute.xlu0 %936  ;;  %v999_v41 = vmul.f32 %v959_v34, %v853_v37  ;;  %1274 = vst.msk [vmem:[#allocation4 + $0x90] sm:$0xff] %vm1255_vm2, %v1170_v49 }
 0x47b   :  { %v1012_v42 = vmul.f32 %v4923_v35, %v937_v40  ;;  %v1733_v40 = vld [vmem:[#allocation4 + $0xc0] sm:$0xff] }
 0x47c   :  { %1031 = vst.msk [vmem:[#allocation3 + $0x80] sm:$0xff] %vm75_vm0, %v999_v41 }
 0x47d   :  { %1044 = vst.msk [vmem:[#allocation3 + $0xe8] sm:$0xff] %vm75_vm0, %v1012_v42 }
 0x47f   :  { %943 = vperm.xlu2 %3999, %v938_v54   ;;  %v1589_v54 = vld [vmem:[#allocation4 + $0x80] sm:$0xff] }
 0x480   :  { %1546 = vperm.xlu1 %4002, %v1520_v15  }
 0x481   :  { %v866_v43 = vpop.permute.xlu1 %865  ;;  %v1235_v25 = vpop.permute.xlu2 %1234 }
 0x482   :  { %v1001_v44 = vmul.f32 %v960_v6, %v866_v43  ;;  %1284 = vst.msk [vmem:[#allocation4 + $0xe0] sm:$0xff] %vm1255_vm2, %v1235_v25 }
 0x484   :  { %1033 = vst.msk [vmem:[#allocation3 + $0x90] sm:$0xff] %vm75_vm0, %v1001_v44 }
 0x487   :  { %4001 = vset.pattern.permute.xlu2 %v4278_v3 }
 0x488   :  { %1685 = vperm.xlu1 %4002, %v1663_v45   ;;  %1387 = vperm.xlu2 %4001, %v1373_v63   ;;  %v1292_v45 = vld [vmem:[#allocation2 + $0x10] sm:$0xff]  ;;  %v1293_v63 = vld [vmem:[#allocation2 + $0x18] sm:$0xff] }
 0x489   :  { %v1805_v30 = vld [vmem:[#allocation4 + $0xe0] sm:$0xff] }
 0x48a   :  { %1819 = vperm.xlu0 %4003, %v1805_v30   ;;  %v1591_v30 = vld [vmem:[#allocation4 + $0x90] sm:$0xff] }
 0x490   :  { %1752 = vperm.xlu1 %4002, %v1734_v47   ;;  %1402 = vperm.xlu2 %4001, %v1376_v53   ;;  %v1298_v47 = vld [vmem:[#allocation3 + $0x18] sm:$0xff]  ;;  %v1307_v53 = vmul.f32 0.0, %v1293_v63 }
 0x491   :  { %v885_v55 = vpop.permute.xlu1 %884  ;;  %v1254_v23 = vpop.permute.xlu2 %1253 }
 0x492   :  { %v1004_v56 = vmul.f32 %v961_v51, %v885_v55  ;;  %1287 = vst.msk [vmem:[#allocation4 + $0xf8] sm:$0xff] %vm1255_vm2, %v1254_v23  ;;  %v1291_v23 = vld [vmem:[#allocation2 + $0x8] sm:$0xff] }
 0x494   :  { %1036 = vst.msk [vmem:[#allocation3 + $0xa8] sm:$0xff] %vm75_vm0, %v1004_v56  ;;  %v4957_v56 = vadd.f32 %v1307_v53, %v1298_v47 }
 0x498   :  { %1603 = vperm.xlu1 %4002, %v1589_v54   ;;  %1464 = vperm.xlu2 %4001, %v1446_v61   ;;  %v1365_v54 = vld [vmem:[#allocation2 + $0x30] sm:$0xff]  ;;  %v1296_v61 = vld [vmem:[#allocation3 + $0x8] sm:$0xff] }
 0x499   :  { %v898_v2 = vpop.permute.xlu1 %897  ;;  %v859_v5 = vpop.permute.xlu2 %858  ;;  %v1808_v6 = vld [vmem:[#allocation4 + $0xf8] sm:$0xff] }
 0x49a   :  { %v1006_v4 = vmul.f32 %v962_v0, %v898_v2  ;;  %v1000_v10 = vmul.f32 %v959_v34, %v859_v5  ;;  %1834 = vperm.xlu0 %4003, %v1808_v6   ;;  %v742_v34 = vrot.slane %v4899_v52, 7  ;;  %v4951_v52 = vpop.permute.xlu0 %1397  ;;  %v1370_v2 = vld [vmem:[#allocation3 + $0x30] sm:$0xff]  ;;  %v1305_v5 = vmul.f32 0.0, %v1291_v23  ;;  %v1806_v6 = vld [vmem:[#allocation4 + $0xe8] sm:$0xff] }
 0x49c   :  { %1038 = vst.msk [vmem:[#allocation3 + $0xb8] sm:$0xff] %vm75_vm0, %v1006_v4  ;;  %v966_v37 = vperm.slane %v742_v34, 0  ;;  %v1371_v4 = vld [vmem:[#allocation3 + $0x38] sm:$0xff] }
 0x49d   :  { %1032 = vst.msk [vmem:[#allocation3 + $0x88] sm:$0xff] %vm75_vm0, %v1000_v10 }
 0x4a0   :  { %1618 = vperm.xlu1 %4002, %v1592_v59   ;;  %1314 = vperm.xlu2 %4001, %v1300_v60  }
 0x4a2   :  { %4004 = vset.pattern.permute.xlu0 %v4380_v7  ;;  %v1475_v60 = vpop.permute.xlu0 %1474 }
 0x4a8   :  { %1829 = vperm.xlu1 %4002, %v1807_v11   ;;  %1329 = vperm.xlu2 %4001, %v1303_v18   ;;  %v1304_v18 = vmul.f32 0.0, %v1290_v29 }
 0x4a9   :  { %v918_v57 = vpop.permute.xlu1 %917  ;;  %v879_v13 = vpop.permute.xlu2 %878 }
 0x4aa   :  { %v1009_v24 = vmul.f32 %v964_v16, %v918_v57  ;;  %v1003_v21 = vmul.f32 %v961_v51, %v879_v13  ;;  %v1306_v51 = vmul.f32 0.0, %v1292_v45 }
 0x4ac   :  { %1041 = vst.msk [vmem:[#allocation3 + $0xd0] sm:$0xff] %vm75_vm0, %v1009_v24 }
 0x4ad   :  { %1035 = vst.msk [vmem:[#allocation3 + $0xa0] sm:$0xff] %vm75_vm0, %v1003_v21 }
 0x4b0   :  { %4008 = vset.pattern.permute.xlu1 %v4380_v7  ;;  %1541 = vperm.xlu2 %4001, %v1519_v27   ;;  %v4963_v27 = vadd.f32 %v1304_v18, %v1295_v62  ;;  %v1436_v18 = vld [vmem:[#allocation2 + $0x48] sm:$0xff] }
 0x4b1   :  { %v931_v28 = vpop.permute.xlu1 %930  ;;  %v892_v31 = vpop.permute.xlu2 %891 }
 0x4b2   :  { %v1011_v32 = vmul.f32 %v4923_v35, %v931_v28  ;;  %v1005_v36 = vmul.f32 %v962_v0, %v892_v31  ;;  %v1736_v35 = vld [vmem:[#allocation4 + $0xd8] sm:$0xff]  ;;  %v1364_v28 = vld [vmem:[#allocation2 + $0x28] sm:$0xff]  ;;  %v1437_v31 = vld [vmem:[#allocation2 + $0x50] sm:$0xff] }
 0x4b3   :  { %v1366_v0 = vld [vmem:[#allocation2 + $0x38] sm:$0xff] }
 0x4b4   :  { %1043 = vst.msk [vmem:[#allocation3 + $0xe0] sm:$0xff] %vm75_vm0, %v1011_v32  ;;  %v1380_v59 = vmul.f32 %v1366_v0, %v4957_v56  ;;  %v1369_v32 = vld [vmem:[#allocation3 + $0x28] sm:$0xff] }
 0x4b5   :  { %1037 = vst.msk [vmem:[#allocation3 + $0xb0] sm:$0xff] %vm75_vm0, %v1005_v36  ;;  %v1442_v36 = vld [vmem:[#allocation3 + $0x50] sm:$0xff] }
 0x4b6   :  { %v1384_v13 = vadd.f32 %v1380_v59, %v1371_v4 }
 0x4b8   :  { %1680 = vperm.xlu2 %4001, %v1662_v33   ;;  %v1438_v33 = vld [vmem:[#allocation2 + $0x58] sm:$0xff] }
 0x4c0   :  { %1747 = vperm.xlu2 %4001, %v1733_v40  }
 0x4c1   :  { %v950_v41 = vpop.permute.xlu1 %949  ;;  %v911_v42 = vpop.permute.xlu2 %910 }
 0x4c2   :  { %v1014_v49 = vmul.f32 %v966_v37, %v950_v41  ;;  %v1008_v15 = vmul.f32 %v4912_v26, %v911_v42  ;;  %v1297_v26 = vld [vmem:[#allocation3 + $0x10] sm:$0xff]  ;;  %v1452_v41 = vmul.f32 %v1438_v33, %v1384_v13  ;;  %v1368_v42 = vld [vmem:[#allocation3 + $0x20] sm:$0xff] }
 0x4c3   :  { %v4955_v55 = vadd.f32 %v1306_v51, %v1297_v26  ;;  %v4971_v26 = vpop.permute.xlu0 %1324  ;;  %v1440_v33 = vld [vmem:[#allocation3 + $0x40] sm:$0xff] }
 0x4c4   :  { %1046 = vst.msk [vmem:[#allocation3 + $0xf8] sm:$0xff] %vm75_vm0, %v1014_v49  ;;  %v1363_v49 = vld [vmem:[#allocation2 + $0x20] sm:$0xff] }
 0x4c5   :  { %1040 = vst.msk [vmem:[#allocation3 + $0xc8] sm:$0xff] %vm75_vm0, %v1008_v15  ;;  %v1379_v10 = vmul.f32 %v1365_v54, %v4955_v55 }
 0x4c7   :  { %v1383_v24 = vadd.f32 %v1379_v10, %v1370_v2  ;;  %v1435_v10 = vld [vmem:[#allocation2 + $0x40] sm:$0xff] }
 0x4c8   :  { %1762 = vperm.xlu2 %4001, %v1736_v35   ;;  %v1377_v35 = vmul.f32 %v1363_v49, %v4963_v27 }
 0x4c9   :  { %v924_v44 = vpop.permute.xlu2 %923  ;;  %v1451_v40 = vmul.f32 %v1437_v31, %v1383_v24 }
 0x4ca   :  { %v1393_v43 = vpop.permute.xlu1 %1392  ;;  %v1010_v25 = vmul.f32 %v964_v16, %v924_v44  ;;  %v4961_v16 = vadd.f32 %v1305_v5, %v1296_v61  ;;  %v1381_v45 = vadd.f32 %v1377_v35, %v1368_v42  ;;  %v1509_v42 = vld [vmem:[#allocation2 + $0x70] sm:$0xff] }
 0x4cb   :  { %v1455_v44 = vadd.f32 %v1451_v40, %v1442_v36  ;;  %v1514_v35 = vld [vmem:[#allocation3 + $0x70] sm:$0xff] }
 0x4cc   :  { %1042 = vst.msk [vmem:[#allocation3 + $0xd8] sm:$0xff] %vm75_vm0, %v1010_v25  ;;  %v1378_v34 = vmul.f32 %v1364_v28, %v4961_v16  ;;  %v1443_v25 = vld [vmem:[#allocation3 + $0x58] sm:$0xff] }
 0x4ce   :  { %v1382_v15 = vadd.f32 %v1378_v34, %v1369_v32 }
 0x4d0   :  { %1613 = vperm.xlu2 %4001, %v1591_v30   ;;  %v1406_v63 = vmul.f32 %v1393_v43, %v1382_v15  ;;  %v1456_v30 = vadd.f32 %v1452_v41, %v1443_v25  ;;  %v1407_v43 = vmul.f32 %v4951_v52, %v1383_v24  ;;  %v1450_v32 = vmul.f32 %v1436_v18, %v1382_v15  ;;  %v1510_v15 = vld [vmem:[#allocation2 + $0x78] sm:$0xff] }
 0x4d2   :  { %v4953_v46 = vpop.permute.xlu1 %1459  ;;  %v1480_v23 = vmul.f32 %v1475_v60, %v1456_v30  ;;  %v1410_v29 = vsel %vm75_vm0, %v1406_v63, 0.0  ;;  %v1418_v28 = vsel %vm75_vm0, %v1407_v43, 0.0  ;;  %v1523_v63 = vmul.f32 %v1509_v42, %v1455_v44  ;;  %v1587_v42 = vld [vmem:[#allocation3 + $0x98] sm:$0xff] }
 0x4d4   :  { %v1491_v2 = vsel %vm75_vm0, %v1480_v23, 0.0 }
 0x4d8   :  { %1824 = vperm.xlu2 %4001, %v1806_v6  }
 0x4d9   :  { %v944_v57 = vpop.permute.xlu2 %943 }
 0x4da   :  { %v1470_v11 = vpop.permute.xlu1 %1469  ;;  %v1013_v21 = vmul.f32 %v966_v37, %v944_v57  ;;  %v1441_v57 = vld [vmem:[#allocation3 + $0x48] sm:$0xff] }
 0x4db   :  { %v1479_v47 = vmul.f32 %v1470_v11, %v1455_v44  ;;  %v1449_v11 = vmul.f32 %v1435_v10, %v1381_v45  ;;  %v1454_v52 = vadd.f32 %v1450_v32, %v1441_v57  ;;  %v1507_v10 = vld [vmem:[#allocation2 + $0x60] sm:$0xff]  ;;  %v1581_v32 = vld [vmem:[#allocation2 + $0x90] sm:$0xff] }
 0x4dc   :  { %1045 = vst.msk [vmem:[#allocation3 + $0xf0] sm:$0xff] %vm75_vm0, %v1013_v21  ;;  %v4980_v21 = vpop.permute.xlu0 %1536 }
 0x4dd   :  { %v1490_v0 = vsel %vm75_vm0, %v1479_v47, 0.0  ;;  %v1453_v24 = vadd.f32 %v1449_v11, %v1440_v33  ;;  %v1508_v47 = vld [vmem:[#allocation2 + $0x68] sm:$0xff]  ;;  %v1586_v33 = vld [vmem:[#allocation3 + $0x90] sm:$0xff] }
 0x4de   :  { %v1492_v6 = vadd.f32 %v1491_v2, %v1490_v0  ;;  %v1515_v2 = vld [vmem:[#allocation3 + $0x78] sm:$0xff] }
 0x4df   :  { %v1477_v25 = vmul.f32 %v4953_v46, %v1453_v24  ;;  %v1521_v11 = vmul.f32 %v1507_v10, %v1453_v24  ;;  %v1582_v24 = vld [vmem:[#allocation2 + $0x98] sm:$0xff]  ;;  %v1658_v10 = vld [vmem:[#allocation3 + $0xb0] sm:$0xff] }
 0x4e0   :  { %4007 = vset.pattern.permute.xlu2 %v4455_v1  ;;  %v1493_v31 = vrot.slane %v1492_v6, 4 }
 0x4e1   :  { %v1481_v46 = vsel %vm75_vm0, %v1477_v25, 0.0 }
 0x4e2   :  { %v4968_v37 = vpop.permute.xlu1 %1319  ;;  %v1388_v51 = vpop.permute.xlu2 %1387 }
 0x4e3   :  { %v1405_v53 = vmul.f32 %v1388_v51, %v1381_v45  ;;  %v1494_v45 = vadd.f32 %v1493_v31, %v1492_v6 }
 0x4e5   :  { %v1409_v54 = vsel %vm75_vm0, %v1405_v53, 0.0  ;;  %v1495_v44 = vrot.slane %v1494_v45, 2 }
 0x4e6   :  { %v1411_v61 = vadd.f32 %v1410_v29, %v1409_v54  ;;  %v1524_v29 = vmul.f32 %v1510_v15, %v1456_v30  ;;  %v1522_v54 = vmul.f32 %v1508_v47, %v1454_v52 }
 0x4e8   :  { %v1412_v4 = vrot.slane %v1411_v61, 4  ;;  %v4994_v57 = vadd.f32 %v1524_v29, %v1515_v2 }
 0x4ea   :  { %v4977_v5 = vpop.permute.xlu1 %1531  ;;  %v1413_v59 = vadd.f32 %v1412_v4, %v1411_v61  ;;  %v1403_v62 = vpop.permute.xlu2 %1402  ;;  %v4988_v61 = vadd.f32 %v1523_v63, %v1514_v35 }
 0x4eb   :  { %v1408_v60 = vmul.f32 %v1403_v62, %v1384_v13  ;;  %v3883_v13 = vmul.f32 -1.442695, %v4656_v58  ;;  %v4990_v4 = vpop.permute.xlu0 %1675  ;;  %v1512_v62 = vld [vmem:[#allocation3 + $0x60] sm:$0xff] }
 0x4ec   :  { %v1414_v34 = vrot.slane %v1413_v59, 2  ;;  %v1525_v31 = vadd.f32 %v1521_v11, %v1512_v62  ;;  %v1654_v11 = vld [vmem:[#allocation2 + $0xb8] sm:$0xff] }
 0x4ed   :  { %v1419_v36 = vsel %vm75_vm0, %v1408_v60, 0.0  ;;  %4144 = vpow2.f32 %v3883_v13  ;;  %v1333_v13 = vmul.f32 %v4968_v37, %v4961_v16 }
 0x4ee   :  { %v1420_v40 = vadd.f32 %v1419_v36, %v1418_v28  ;;  %v1415_v51 = vadd.f32 %v1414_v34, %v1413_v59  ;;  %v1513_v59 = vld [vmem:[#allocation3 + $0x68] sm:$0xff]  ;;  %v1595_v36 = vmul.f32 %v1581_v32, %v4988_v61  ;;  %v1549_v63 = vmul.f32 %v4977_v5, %v1525_v31 }
 0x4ef   :  { %v4996_v28 = vadd.f32 %v1522_v54, %v1513_v59  ;;  %v1334_v32 = vmul.f32 %v4971_v26, %v4955_v55 }
 0x4f0   :  { %v1421_v41 = vrot.slane %v1420_v40, 4  ;;  %v1416_v60 = vrot.slane %v1415_v51, 1  ;;  %v5003_v29 = vadd.f32 %v1595_v36, %v1586_v33 }
 0x4f1   :  { %v1550_v16 = vmul.f32 %v4980_v21, %v4996_v28 }
 0x4f2   :  { %v4984_v49 = vpop.permute.xlu1 %1546  ;;  %v1422_v53 = vadd.f32 %v1421_v41, %v1420_v40  ;;  %v1465_v23 = vpop.permute.xlu2 %1464  ;;  %v1496_v41 = vadd.f32 %v1495_v44, %v1494_v45  ;;  %v1417_v35 = vadd.f32 %v1416_v60, %v1415_v51  ;;  %v1337_v51 = vsel %vm75_vm0, %v1333_v13, 0.0  ;;  %v1659_v60 = vld [vmem:[#allocation3 + $0xb8] sm:$0xff] }
 0x4f3   :  { %v1478_v0 = vmul.f32 %v1465_v23, %v1454_v52  ;;  %v1596_v23 = vmul.f32 %v1582_v24, %v4994_v57  ;;  %v1691_v2 = vpop.permute.xlu0 %1690  ;;  %v1554_v59 = vsel %vm75_vm0, %v1550_v16, 0.0  ;;  %v1585_v16 = vld [vmem:[#allocation3 + $0x88] sm:$0xff] }
 0x4f4   :  { %v1423_v43 = vrot.slane %v1422_v53, 2  ;;  %v1497_v62 = vrot.slane %v1496_v41, 1 }
 0x4f5   :  { %v1482_v6 = vsel %vm75_vm0, %v1478_v0, 0.0  ;;  %v5009_v0 = vadd.f32 %v1596_v23, %v1587_v42 }
 0x4f6   :  { %v1424_v30 = vadd.f32 %v1423_v43, %v1422_v53  ;;  %v1483_v18 = vadd.f32 %v1482_v6, %v1481_v46  ;;  %v4145_v53 = vpop.eup %4144  ;;  %v1653_v43 = vld [vmem:[#allocation2 + $0xb0] sm:$0xff] }
 0x4f7   :  { %v5015_v21 = vadd.f32 1.0, %v4145_v53  ;;  %v1667_v6 = vmul.f32 %v1653_v43, %v5003_v29  ;;  %v1668_v36 = vmul.f32 %v1654_v11, %v5009_v0  ;;  %v1580_v53 = vld [vmem:[#allocation2 + $0x88] sm:$0xff] }
 0x4f8   :  { %v1425_v34 = vrot.slane %v1424_v30, 1  ;;  %v1484_v40 = vrot.slane %v1483_v18, 4 }
 0x4f9   :  { %v5022_v33 = vadd.f32 %v1667_v6, %v1658_v10  ;;  %4146 = vrcp.f32 %v5015_v21  ;;  %v1656_v6 = vld [vmem:[#allocation3 + $0xa0] sm:$0xff]  ;;  %vm1920_vm6 = vweird.f32 %v5015_v21 }
 0x4fa   :  { %v1686_v52 = vpop.permute.xlu1 %1685  ;;  %v1426_v25 = vadd.f32 %v1425_v34, %v1424_v30  ;;  %v1485_v15 = vadd.f32 %v1484_v40, %v1483_v18  ;;  %v1315_v47 = vpop.permute.xlu2 %1314  ;;  %v1498_v40 = vadd.f32 %v1497_v62, %v1496_v41  ;;  %v1345_v41 = vsel %vm75_vm0, %v1334_v32, 0.0  ;;  %v159_v32 = vld [vmem:[%s5882_s13 + $0x30] sm:$0xff] }
 0x4fb   :  { %v1332_v45 = vmul.f32 %v1315_v47, %v4963_v27  ;;  %v1553_v27 = vsel %vm75_vm0, %v1549_v63, 0.0  ;;  %v5027_v63 = vadd.f32 %v1668_v36, %v1659_v60  ;;  %v1584_v47 = vld [vmem:[#allocation3 + $0x80] sm:$0xff]  ;;  %v5040_v43 = vpop.permute.xlu0 %1757 }
 0x4fc   :  { %v1429_v37 = vsel %vm1356_vm4, %v1426_v25, %v1417_v35  ;;  %v1486_v54 = vrot.slane %v1485_v15, 2  ;;  %v1555_v34 = vadd.f32 %v1554_v59, %v1553_v27  ;;  %v1579_v25 = vld [vmem:[#allocation2 + $0x80] sm:$0xff] }
 0x4fd   :  { %1432 = vst.msk [vmem:[#allocation5 + $0x2] sm:$0x3] %vm1359_vm5, %v1429_v37  ;;  %v1336_v5 = vsel %vm75_vm0, %v1332_v45, 0.0  ;;  %v1593_v26 = vmul.f32 %v1579_v25, %v1525_v31  ;;  %v1696_v45 = vmul.f32 %v1691_v2, %v5027_v63  ;;  %v1651_v27 = vld [vmem:[#allocation2 + $0xa0] sm:$0xff] }
 0x4fe   :  { %v1487_v46 = vadd.f32 %v1486_v54, %v1485_v15  ;;  %v1338_v44 = vadd.f32 %v1337_v51, %v1336_v5  ;;  %v1695_v15 = vmul.f32 %v1686_v52, %v5022_v33  ;;  %v1556_v37 = vrot.slane %v1555_v34, 4 }
 0x4ff   :  { %v1594_v51 = vmul.f32 %v1580_v53, %v4996_v28  ;;  %v5044_v2 = vpop.eup %4146  ;;  %v1552_v28 = vmul.f32 %v4984_v49, %v4994_v57 }
 0x500   :  { %v1488_v30 = vrot.slane %v1487_v46, 1  ;;  %v1339_v18 = vrot.slane %v1338_v44, 4  ;;  %v1706_v31 = vsel %vm75_vm0, %v1695_v15, 0.0  ;;  %v1916_v49 = vmul.f32 %v5044_v2, %v5015_v21 }
 0x501   :  { %v5042_v10 = vadd.f32 %v1594_v51, %v1585_v16  ;;  %vm1921_vm7 = vweird.f32 %v5044_v2 }
 0x502   :  { %v1489_v13 = vadd.f32 %v1488_v30, %v1487_v46  ;;  %v1340_v24 = vadd.f32 %v1339_v18, %v1338_v44  ;;  %v1330_v42 = vpop.permute.xlu2 %1329  ;;  %v5024_v35 = vpop.permute.xlu1 %1752  ;;  %v1707_v46 = vsel %vm75_vm0, %v1696_v45, 0.0  ;;  %v1557_v44 = vadd.f32 %v1556_v37, %v1555_v34  ;;  %v160_v18 = vld [vmem:[%s5882_s13 + $0x38] sm:$0xff]  ;;  %v1657_v37 = vld [vmem:[#allocation3 + $0xa8] sm:$0xff]  ;;  %vm5110_vm8 = vmor %vm1920_vm6, %vm1921_vm7 }
 0x503   :  { %v1335_v55 = vmul.f32 %v1330_v42, %v4957_v56  ;;  %v5037_v56 = vadd.f32 %v1593_v26, %v1584_v47  ;;  %v1708_v11 = vadd.f32 %v1707_v46, %v1706_v31  ;;  %1963 = vmatpush.msra.mxu1 %v160_v18  ;;  %v158_v42 = vld [vmem:[%s5882_s13 + $0x28] sm:$0xff] }
 0x504   :  { %v1501_v23 = vsel %vm1356_vm4, %v1498_v40, %v1489_v13  ;;  %v1341_v52 = vrot.slane %v1340_v24, 2  ;;  %v1652_v40 = vld [vmem:[#allocation2 + $0xa8] sm:$0xff]  ;;  %v1558_v15 = vrot.slane %v1557_v44, 2 }
 0x505   :  { %1504 = vst.msk [vmem:[#allocation5 + $0x4] sm:$0x3] %vm1359_vm5, %v1501_v23  ;;  %v1346_v54 = vsel %vm75_vm0, %v1335_v55, 0.0  ;;  %v1665_v36 = vmul.f32 %v1651_v27, %v5037_v56  ;;  %v1666_v57 = vmul.f32 %v1652_v40, %v5042_v10  ;;  %v1563_v55 = vsel %vm75_vm0, %v1552_v28, 0.0  ;;  %1964 = vmatpush.msra.mxu1 %v159_v32 }
 0x506   :  { %v1347_v5 = vadd.f32 %v1346_v54, %v1345_v41  ;;  %v1342_v59 = vadd.f32 %v1341_v52, %v1340_v24  ;;  %v1709_v47 = vrot.slane %v1708_v11, 4  ;;  %v1917_v41 = vsub.f32 1.0, %v1916_v49  ;;  %v157_v49 = vld [vmem:[%s5882_s13 + $0x20] sm:$0xff] }
 0x507   :  { %v1669_v25 = vadd.f32 %v1665_v36, %v1656_v6  ;;  %1965 = vmatpush.msra.mxu1 %v158_v42  ;;  %v1559_v51 = vadd.f32 %v1558_v15, %v1557_v44  ;;  %v1670_v52 = vadd.f32 %v1666_v57, %v1657_v37  ;;  %v1729_v36 = vld [vmem:[#allocation3 + $0xc8] sm:$0xff]  ;;  %v156_v57 = vld [vmem:[%s5882_s13 + $0x18] sm:$0xff]  ;;  %v1725_v15 = vld [vmem:[#allocation2 + $0xd0] sm:$0xff] }
 0x508   :  { %v1348_v62 = vrot.slane %v1347_v5, 4  ;;  %v1726_v42 = vld [vmem:[#allocation2 + $0xd8] sm:$0xff]  ;;  %v1728_v37 = vld [vmem:[#allocation3 + $0xc0] sm:$0xff] }
 0x509   :  { %v1693_v45 = vmul.f32 %v4990_v4, %v1669_v25  ;;  %v1724_v4 = vld [vmem:[#allocation2 + $0xc8] sm:$0xff]  ;;  %v1560_v44 = vrot.slane %v1559_v51, 1  ;;  %1966 = vmatpush.msra.mxu1 %v157_v49 }
 0x50a   :  { %v1349_v60 = vadd.f32 %v1348_v62, %v1347_v5  ;;  %v1542_v30 = vpop.permute.xlu2 %1541  ;;  %v5060_v24 = vpop.permute.xlu1 %1603  ;;  %v1710_v62 = vadd.f32 %v1709_v47, %v1708_v11 }
 0x50b   :  { %v1551_v34 = vmul.f32 %v1542_v30, %v4988_v61  ;;  %v1343_v61 = vrot.slane %v1342_v59, 1  ;;  %v1609_v5 = vpop.permute.xlu0 %1608  ;;  %v1918_v30 = vmul.f32 %v5044_v2, %v1917_v41  ;;  %v1697_v18 = vsel %vm75_vm0, %v1693_v45, 0.0  ;;  %v155_v45 = vld [vmem:[%s5882_s13 + $0x10] sm:$0xff]  ;;  %1967 = vmatpush.msra.mxu1 %v156_v57 }
 0x50c   :  { %v1350_v13 = vrot.slane %v1349_v60, 2 }
 0x50d   :  { %v1562_v26 = vsel %vm75_vm0, %v1551_v34, 0.0  ;;  %v1344_v31 = vadd.f32 %v1343_v61, %v1342_v59  ;;  %v1738_v59 = vmul.f32 %v1724_v4, %v1670_v52  ;;  %1968 = vmatpush.msra.mxu1 %v155_v45  ;;  %v1924_v4 = vand.u32 2147483647, %v5015_v21 }
 0x50e   :  { %v1351_v53 = vadd.f32 %v1350_v13, %v1349_v60  ;;  %v1564_v23 = vadd.f32 %v1563_v55, %v1562_v26  ;;  %v1723_v60 = vld [vmem:[#allocation2 + $0xc0] sm:$0xff]  ;;  %v3884_v13 = vmul.f32 -1.442695, %v4681_v50  ;;  %v1711_v55 = vrot.slane %v1710_v62, 2  ;;  %v1731_v26 = vld [vmem:[#allocation3 + $0xd8] sm:$0xff] }
 0x50f   :  { %v1737_v34 = vmul.f32 %v1723_v60, %v1669_v25  ;;  %v5085_v41 = vadd.f32 %v1738_v59, %v1729_v36  ;;  %vm1925_vm9 = vcmp.eq.f32.partialorder %v1924_v4, 8.507059e+37 }
 0x510   :  { %v1352_v16 = vrot.slane %v1351_v53, 1  ;;  %v1565_v54 = vrot.slane %v1564_v23, 4  ;;  %4148 = vpow2.f32 %v3884_v13 }
 0x512   :  { %v1353_v27 = vadd.f32 %v1352_v16, %v1351_v53  ;;  %v1566_v46 = vadd.f32 %v1565_v54, %v1564_v23  ;;  %v1681_v28 = vpop.permute.xlu2 %1680  ;;  %v5080_v47 = vpop.permute.xlu1 %1618  ;;  %v1740_v53 = vmul.f32 %v1726_v42, %v5027_v63  ;;  %v1739_v23 = vmul.f32 %v1725_v15, %v5022_v33  ;;  %v1797_v15 = vld [vmem:[#allocation2 + $0xf0] sm:$0xff] }
 0x513   :  { %v1694_v6 = vmul.f32 %v1681_v28, %v1670_v52  ;;  %v1919_v16 = vadd.f32 %v5044_v2, %v1918_v30  ;;  %v1766_v33 = vmul.f32 %v5024_v35, %v5085_v41  ;;  %v1730_v28 = vld [vmem:[#allocation3 + $0xd0] sm:$0xff]  ;;  %v5099_v30 = vpop.permute.xlu0 %1819  ;;  %v1926_v35 = vand.u32 2147483648, %v5015_v21 }
 0x514   :  { %v1357_v32 = vsel %vm1356_vm4, %v1353_v27, %v1344_v31  ;;  %v1567_v40 = vrot.slane %v1566_v46, 2  ;;  %v1561_v31 = vadd.f32 %v1560_v44, %v1559_v51  ;;  %v5092_v27 = vadd.f32 %v1737_v34, %v1728_v37  ;;  %v1798_v34 = vld [vmem:[#allocation2 + $0xf8] sm:$0xff] }
 0x515   :  { %1360 = vst.msk [vmem:[#allocation5] sm:$0x3] %vm1359_vm5, %v1357_v32  ;;  %v1698_v11 = vsel %vm75_vm0, %v1694_v6, 0.0  ;;  %v1744_v63 = vadd.f32 %v1740_v53, %v1731_v26  ;;  %v1712_v6 = vadd.f32 %v1711_v55, %v1710_v62  ;;  %v1743_v36 = vadd.f32 %v1739_v23, %v1730_v28  ;;  %v1802_v55 = vld [vmem:[#allocation3 + $0xf0] sm:$0xff] }
 0x516   :  { %v1568_v25 = vadd.f32 %v1567_v40, %v1566_v46  ;;  %v1699_v61 = vadd.f32 %v1698_v11, %v1697_v18  ;;  %v154_v46 = vld [vmem:[%s5882_s13 + $0x8] sm:$0xff]  ;;  %v1621_v18 = vmul.f32 %v5060_v24, %v5037_v56  ;;  %v1622_v56 = vmul.f32 %v1609_v5, %v5042_v10  ;;  %v153_v10 = vld [vmem:[%s5882_s13] sm:$0xff] }
 0x517   :  { %1969 = vmatpush.msra.mxu1 %v154_v46  ;;  %v1923_v59 = vsel %vm5110_vm8, %v5044_v2, %v1919_v16  ;;  %v1770_v11 = vsel %vm75_vm0, %v1766_v33, 0.0  ;;  %v1812_v21 = vmul.f32 %v1798_v34, %v1744_v63  ;;  %v1713_v5 = vrot.slane %v1712_v6, 1  ;;  %v1866_v2 = vld [vmem:[#allocation5 + $0x2] sm:$0x3]  ;;  %v1867_v46 = vld [vmem:[#allocation5 + $0x4] sm:$0x3] }
 0x518   :  { %v1569_v54 = vrot.slane %v1568_v25, 1  ;;  %v1700_v52 = vrot.slane %v1699_v61, 4  ;;  %v1625_v57 = vsel %vm75_vm0, %v1621_v18, 0.0  ;;  %v1767_v26 = vmul.f32 %v5040_v43, %v1743_v36 }
 0x519   :  { %1970 = vmatpush.msra.mxu1 %v153_v10  ;;  %v1626_v53 = vsel %vm75_vm0, %v1622_v56, 0.0  ;;  %v1874_v28 = vrot.slane %v1866_v2, 6  ;;  %v1714_v18 = vadd.f32 %v1713_v5, %v1712_v6 }
 0x51a   :  { %v1570_v60 = vadd.f32 %v1569_v54, %v1568_v25  ;;  %v1701_v32 = vadd.f32 %v1700_v52, %v1699_v61  ;;  %v1748_v51 = vpop.permute.xlu2 %1747  ;;  %v1927_v25 = vor.u32 1.1754944e-38, %v1926_v35  ;;  %v1811_v61 = vmul.f32 %v1797_v15, %v1743_v36  ;;  %v1830_v16 = vpop.permute.xlu1 %1829  ;;  %v5131_v36 = vld [vmem:[%s5881_s12] ss:$0 sm:$0xff] }
 0x51b   :  { %v1765_v40 = vmul.f32 %v1748_v51, %v5092_v27  ;;  %v1627_v52 = vadd.f32 %v1626_v53, %v1625_v57  ;;  %v1903_v57 = vmul.f32 %v5131_v36, %v4590_v38  ;;  %v1795_v53 = vld [vmem:[#allocation2 + $0xe0] sm:$0xff] }
 0x51c   :  { %v1573_v24 = vsel %vm1356_vm4, %v1570_v60, %v1561_v31  ;;  %v1702_v44 = vrot.slane %v1701_v32, 2  ;;  %v1865_v37 = vld [vmem:[#allocation5] sm:$0x3]  ;;  %v1928_v54 = vsel %vm1925_vm9, %v1927_v25, %v1923_v59  ;;  %v1803_v31 = vld [vmem:[#allocation3 + $0xf8] sm:$0xff]  ;;  %v1815_v33 = vadd.f32 %v1811_v61, %v1802_v55  ;;  %v4149_v60 = vpop.eup %4148 }
 0x51d   :  { %1576 = vst.msk [vmem:[#allocation5 + $0x6] sm:$0x3] %vm1359_vm5, %v1573_v24  ;;  %v1769_v49 = vsel %vm75_vm0, %v1765_v40, 0.0  ;;  %v1816_v51 = vadd.f32 %v1812_v21, %v1803_v31  ;;  %v1892_v56 = vsel %vm1891_vm10, %v1865_v37, %v1874_v28  ;;  %v1778_v24 = vsel %vm75_vm0, %v1767_v26, 0.0 }
 0x51e   :  { %v1703_v13 = vadd.f32 %v1702_v44, %v1701_v32  ;;  %v1771_v42 = vadd.f32 %v1770_v11, %v1769_v49  ;;  %v1835_v32 = vpop.permute.xlu0 %1834  ;;  %v1839_v40 = vmul.f32 %v1830_v16, %v1815_v33  ;;  %v1877_v44 = vrot.slane %v1867_v46, 4 }
 0x51f   :  { %v1628_v59 = vrot.slane %v1627_v52, 4  ;;  %v1840_v11 = vmul.f32 %v1835_v32, %v1816_v51  ;;  %v1945_v15 = vmul.f32 %v1928_v54, %v4656_v58  ;;  %v1624_v61 = vmul.f32 %v5080_v47, %v5009_v0  ;;  %v1800_v58 = vld [vmem:[#allocation3 + $0xe0] sm:$0xff] }
 0x520   :  { %v1704_v23 = vrot.slane %v1703_v13, 1  ;;  %v1772_v45 = vrot.slane %v1771_v42, 4  ;;  %v1809_v31 = vmul.f32 %v1795_v53, %v5092_v27  ;;  %v5149_v46 = vadd.f32 1.0, %v4149_v60 }
 0x521   :  { %v1629_v25 = vadd.f32 %v1628_v59, %v1627_v52  ;;  %v1851_v26 = vsel %vm75_vm0, %v1840_v11, 0.0  ;;  %v1796_v52 = vld [vmem:[#allocation2 + $0xe8] sm:$0xff]  ;;  %v1635_v0 = vsel %vm75_vm0, %v1624_v61, 0.0 }
 0x522   :  { %v1705_v4 = vadd.f32 %v1704_v23, %v1703_v13  ;;  %v1773_v43 = vadd.f32 %v1772_v45, %v1771_v42  ;;  %v1763_v35 = vpop.permute.xlu2 %1762  ;;  %v1850_v13 = vsel %vm75_vm0, %v1839_v40, 0.0  ;;  %4150 = vrcp.f32 %v5149_v46 }
 0x523   :  { %v1768_v62 = vmul.f32 %v1763_v35, %v1744_v63  ;;  %v1894_v63 = vsel %vm1893_vm11, %v1892_v56, %v1877_v44  ;;  %v1852_v45 = vadd.f32 %v1851_v26, %v1850_v13  ;;  %v1630_v28 = vrot.slane %v1629_v25, 2  ;;  %v1801_v35 = vld [vmem:[#allocation3 + $0xe8] sm:$0xff] }
 0x524   :  { %v1717_v34 = vsel %vm1356_vm4, %v1714_v18, %v1705_v4  ;;  %v1868_v6 = vld [vmem:[#allocation5 + $0x6] sm:$0x3]  ;;  %v1774_v10 = vrot.slane %v1773_v43, 2  ;;  %v1810_v18 = vmul.f32 %v1796_v52, %v5085_v41  ;;  %vm1935_vm15 = vweird.f32 %v5149_v46 }
 0x525   :  { %1720 = vst.msk [vmem:[#allocation5 + $0xa] sm:$0x3] %vm1359_vm5, %v1717_v34  ;;  %v1779_v21 = vsel %vm75_vm0, %v1768_v62, 0.0  ;;  %v1880_v49 = vrot.slane %v1868_v6, 2  ;;  %v1853_v51 = vrot.slane %v1852_v45, 4  ;;  %v1631_v62 = vadd.f32 %v1630_v28, %v1629_v25 }
 0x526   :  { %v1780_v5 = vadd.f32 %v1779_v21, %v1778_v24  ;;  %v1775_v23 = vadd.f32 %v1774_v10, %v1773_v43  ;;  %v1813_v43 = vadd.f32 %v1809_v31, %v1800_v58  ;;  %v1814_v56 = vadd.f32 %v1810_v18, %v1801_v35 }
 0x527   :  { %v1896_v42 = vsel %vm1895_vm12, %v1894_v63, %v1880_v49  ;;  %v1854_v34 = vadd.f32 %v1853_v51, %v1852_v45  ;;  %v1632_v63 = vrot.slane %v1631_v62, 1 }
 0x528   :  { %v1781_v55 = vrot.slane %v1780_v5, 4  ;;  %v1905_v2 = vadd.f32 %v1903_v57, %v1896_v42  ;;  %v1776_v32 = vrot.slane %v1775_v23, 1  ;;  %v1837_v40 = vmul.f32 %v5099_v30, %v1813_v43 }
 0x529   :  { %v1855_v30 = vrot.slane %v1854_v34, 2 }
 0x52a   :  { %v1782_v16 = vadd.f32 %v1781_v55, %v1780_v5  ;;  %v1614_v37 = vpop.permute.xlu2 %1613  ;;  %v1947_v38 = vmul.f32 %v1945_v15, %v1905_v2  ;;  %v1777_v24 = vadd.f32 %v1776_v32, %v1775_v23  ;;  %v1841_v49 = vsel %vm75_vm0, %v1837_v40, 0.0  ;;  %v4151_v5 = vpop.eup %4150 }
 0x52b   :  { %v1623_v33 = vmul.f32 %v1614_v37, %v5003_v29  ;;  %v1931_v55 = vmul.f32 %v4151_v5, %v5149_v46  ;;  %v1633_v2 = vadd.f32 %v1632_v63, %v1631_v62  ;;  %v1856_v25 = vadd.f32 %v1855_v30, %v1854_v34  ;;  %v3893_v63 = vld [vmem:[%s5873_s4 + $0x28] sm:$0xff]  ;;  %v3888_v30 = vld [vmem:[%s5872_s3 + $0x20] sm:$0xff] }
 0x52c   :  { %v1783_v54 = vrot.slane %v1782_v16, 2  ;;  %3885 = vmatmul.msk.f32.vlgmr.msra.gmra.mxu1 %vm75_vm0, %v1947_v38  ;;  %vm1936_vm14 = vweird.f32 %v4151_v5  ;;  %v1870_v28 = vld [vmem:[#allocation5 + $0xa] sm:$0x3] }
 0x52d   :  { %v1634_v47 = vsel %vm75_vm0, %v1623_v33, 0.0  ;;  %v1932_v45 = vsub.f32 1.0, %v1931_v55  ;;  %vm1937_vm1 = vmor %vm1935_vm15, %vm1936_vm14  ;;  %v1883_v51 = vrot.slane %v1870_v28, 6 }
 0x52e   :  { %v1784_v4 = vadd.f32 %v1783_v54, %v1782_v16  ;;  %v1636_v27 = vadd.f32 %v1635_v0, %v1634_v47  ;;  %v1857_v16 = vrot.slane %v1856_v25, 1  ;;  %v1941_v0 = vand.u32 2147483648, %v5149_v46 }
 0x52f   :  { %v1933_v31 = vmul.f32 %v4151_v5, %v1932_v45  ;;  %v1939_v47 = vand.u32 2147483647, %v5149_v46 }
 0x530   :  { %v1785_v29 = vrot.slane %v1784_v4, 1  ;;  %v1637_v60 = vrot.slane %v1636_v27, 4  ;;  %v1858_v33 = vadd.f32 %v1857_v16, %v1856_v25 }
 0x531   :  { %v1934_v52 = vadd.f32 %v4151_v5, %v1933_v31  ;;  %vm1940_vm6 = vcmp.eq.f32.partialorder %v1939_v47, 8.507059e+37 }
 0x532   :  { %v1786_v6 = vadd.f32 %v1785_v29, %v1784_v4  ;;  %v1638_v44 = vadd.f32 %v1637_v60, %v1636_v27  ;;  %v1825_v59 = vpop.permute.xlu2 %1824  ;;  %v1942_v27 = vor.u32 1.1754944e-38, %v1941_v0 }
 0x533   :  { %v1838_v41 = vmul.f32 %v1825_v59, %v1814_v56  ;;  %v1938_v4 = vsel %vm1937_vm1, %v4151_v5, %v1934_v52  ;;  %v1904_v56 = vmul.f32 %v5131_v36, %v4598_v48  ;;  %v3889_v5 = vld [vmem:[%s5872_s3 + $0x28] sm:$0xff] }
 0x534   :  { %v1789_v11 = vsel %vm1356_vm4, %v1786_v6, %v1777_v24  ;;  %v1639_v21 = vrot.slane %v1638_v44, 2  ;;  %v1943_v35 = vsel %vm1940_vm6, %v1942_v27, %v1938_v4 }
 0x535   :  { %1792 = vst.msk [vmem:[#allocation5 + $0xc] sm:$0x3] %vm1359_vm5, %v1789_v11  ;;  %v1842_v10 = vsel %vm75_vm0, %v1838_v41, 0.0  ;;  %v1946_v24 = vmul.f32 %v1943_v35, %v4681_v50 }
 0x536   :  { %v1640_v57 = vadd.f32 %v1639_v21, %v1638_v44  ;;  %v1843_v13 = vadd.f32 %v1842_v10, %v1841_v49  ;;  %v3895_v49 = vld [vmem:[%s5873_s4 + $0x38] sm:$0xff]  ;;  %v3890_v10 = vld [vmem:[%s5872_s3 + $0x30] sm:$0xff] }
 0x537   :  { %2125 = vmatpush.msra.mxu0 %v3895_v49 }
 0x538   :  { %v1641_v42 = vrot.slane %v1640_v57, 1  ;;  %v1844_v15 = vrot.slane %v1843_v13, 4 }
 0x53a   :  { %v1642_v26 = vadd.f32 %v1641_v42, %v1640_v57  ;;  %v1845_v61 = vadd.f32 %v1844_v15, %v1843_v13  ;;  %v3892_v57 = vld [vmem:[%s5873_s4 + $0x20] sm:$0xff] }
 0x53c   :  { %v1645_v53 = vsel %vm1356_vm4, %v1642_v26, %v1633_v2  ;;  %v1846_v23 = vrot.slane %v1845_v61, 2  ;;  %v1871_v32 = vld [vmem:[#allocation5 + $0xc] sm:$0x3] }
 0x53d   :  { %1648 = vst.msk [vmem:[#allocation5 + $0x8] sm:$0x3] %vm1359_vm5, %v1645_v53  ;;  %v1886_v60 = vrot.slane %v1871_v32, 4 }
 0x53e   :  { %v1847_v37 = vadd.f32 %v1846_v23, %v1845_v61  ;;  %v4049_v23 = vld [vmem:[%s5871_s2 + $0x1] ss:$0 sm:$0xff] }
 0x540   :  { %v1848_v38 = vrot.slane %v1847_v37, 1 }
 0x542   :  { %v1849_v58 = vadd.f32 %v1848_v38, %v1847_v37 }
 0x544   :  { %v1861_v54 = vsel %vm1356_vm4, %v1858_v33, %v1849_v58  ;;  %v1869_v18 = vld [vmem:[#allocation5 + $0x8] sm:$0x3] }
 0x545   :  { %1864 = vst.msk [vmem:[#allocation5 + $0xe] sm:$0x3] %vm1359_vm5, %v1861_v54  ;;  %v1897_v43 = vsel %vm1891_vm10, %v1869_v18, %v1883_v51 }
 0x546   :  { %v1898_v62 = vsel %vm1893_vm11, %v1897_v43, %v1886_v60  ;;  %v3896_v43 = vld [vmem:[%s5874_s5 + $0x4] sm:$0xf] }
 0x547   :  { %v2195_v35 = vperm.slane %v3896_v43, 1 }
 0x54c   :  { %v1872_v29 = vld [vmem:[#allocation5 + $0xe] sm:$0x3] }
 0x54d   :  { %v1889_v40 = vrot.slane %v1872_v29, 2 }
 0x54f   :  { %v1899_v46 = vsel %vm1895_vm12, %v1898_v62, %v1889_v40 }
 0x550   :  { %v1906_v34 = vadd.f32 %v1904_v56, %v1899_v46 }
 0x552   :  { %v1948_v6 = vmul.f32 %v1946_v24, %v1906_v34 }
 0x554   :  { %3886 = vmatmul.msk.f32.gmra.mxu1 %vm75_vm0, %v1948_v6 }
 0x5a9   :  { %v1972_v44 = vpop.f32.mrf.mxu1 }
 0x5aa   :  { %v5177_v59 = vadd.f32 %v1972_v44, %v4407_v19  ;;  %v3891_v19 = vld [vmem:[%s5872_s3 + $0x38] sm:$0xff] }
 0x5ab   :  { %2102 = vmatpush.msra.mxu2 %v3891_v19 }
 0x5ac   :  { %v2045_v41 = vmul.f32 %v5177_v59, %v5177_v59 }
 0x5ad   :  { %2103 = vmatpush.msra.mxu2 %v3890_v10 }
 0x5ae   :  { %v2047_v11 = vsel %vm163_vm3, %v2045_v41, 0.0 }
 0x5af   :  { %2048 = vadd.xlane.f32.xlu2 %v2047_v11  ;;  %2104 = vmatpush.msra.mxu2 %v3889_v5 }
 0x5b1   :  { %2105 = vmatpush.msra.mxu2 %v3888_v30  ;;  %v3913_v30 = vld [vmem:[%s5877_s8 + $0x78] sm:$0xff] }
 0x5d1   :  { %v1975_v21 = vpop.f32.mrf.mxu1 }
 0x5d2   :  { %v5183_v48 = vadd.f32 %v1975_v21, %v4412_v22  ;;  %v3894_v22 = vld [vmem:[%s5873_s4 + $0x30] sm:$0xff] }
 0x5d3   :  { %2126 = vmatpush.msra.mxu0 %v3894_v22 }
 0x5d4   :  { %v2046_v50 = vmul.f32 %v5183_v48, %v5183_v48 }
 0x5d5   :  { %2127 = vmatpush.msra.mxu0 %v3893_v63  ;;  %v3905_v63 = vld [vmem:[%s5876_s7 + $0x78] sm:$0xff] }
 0x5d6   :  { %v2050_v36 = vsel %vm163_vm3, %v2046_v50, 0.0 }
 0x5d7   :  { %2051 = vadd.xlane.f32.xlu1 %v2050_v36  ;;  %2128 = vmatpush.msra.mxu0 %v3892_v57  ;;  %v3921_v57 = vld [vmem:[%s5878_s9 + $0x78] sm:$0xff] }
 0x5d9   :  { %2282 = vmatpush.msrb.mxu0 %v3905_v63 }
 0x622   :  { %v2049_v13 = vpop.xlane.xlu2 %2048 }
 0x623   :  { %v2053_v42 = vmul.f32 %v2049_v13, %v4441_v39  ;;  %v3904_v13 = vld [vmem:[%s5876_s7 + $0x70] sm:$0xff] }
 0x624   :  { %2283 = vmatpush.msrb.mxu0 %v3904_v13 }
 0x625   :  { %v2055_v15 = vadd.f32 1e-05, %v2053_v42  ;;  %v3912_v42 = vld [vmem:[%s5877_s8 + $0x70] sm:$0xff] }
 0x627   :  { %4152 = vrsqrt.f32 %v2055_v15  ;;  %vm2063_vm8 = vweird.f32 %v2055_v15 }
 0x62d   :  { %v4153_v55 = vpop.eup %4152 }
 0x62e   :  { %v2058_v2 = vmul.f32 %v4153_v55, %v2055_v15  ;;  %vm2064_vm7 = vweird.f32 %v4153_v55  ;;  %v3920_v15 = vld [vmem:[%s5878_s9 + $0x70] sm:$0xff] }
 0x62f   :  { %vm2065_vm9 = vmor %vm2063_vm8, %vm2064_vm7 }
 0x630   :  { %v2059_v25 = vmul.f32 %v4153_v55, %v2058_v2  ;;  %v3903_v2 = vld [vmem:[%s5876_s7 + $0x68] sm:$0xff] }
 0x631   :  { %2284 = vmatpush.msrb.mxu0 %v3903_v2 }
 0x632   :  { %v2060_v26 = vmul.f32 0.5, %v2059_v25  ;;  %v3911_v25 = vld [vmem:[%s5877_s8 + $0x68] sm:$0xff] }
 0x634   :  { %v2061_v61 = vsub.f32 1.5, %v2060_v26  ;;  %v3919_v26 = vld [vmem:[%s5878_s9 + $0x68] sm:$0xff] }
 0x636   :  { %v2062_v53 = vmul.f32 %v4153_v55, %v2061_v61 }
 0x638   :  { %v2066_v45 = vsel %vm2065_vm9, %v4153_v55, %v2062_v53 }
 0x639   :  { %v2077_v16 = vmul.f32 %v2066_v45, %v5177_v59  ;;  %v3910_v45 = vld [vmem:[%s5877_s8 + $0x60] sm:$0xff] }
 0x63b   :  { %v2082_v37 = vmul.f32 %v4049_v23, %v2077_v16 }
 0x63d   :  { %3934 = vmatmul.msk.f32.vlgmr.msra.gmra.mxu2 %vm163_vm3, %v2082_v37  ;;  %3936 = vmatmul.msk.f32.vlgmr.msra.gmra.mxu0 %vm163_vm3, %v2082_v37  ;;  %v3918_v37 = vld [vmem:[%s5878_s9 + $0x60] sm:$0xff] }
 0x64a   :  { %v2052_v38 = vpop.xlane.xlu1 %2051 }
 0x64b   :  { %v2054_v31 = vmul.f32 %v2052_v38, %v4441_v39  ;;  %v3901_v38 = vld [vmem:[%s5876_s7 + $0x58] sm:$0xff] }
 0x64d   :  { %v2056_v33 = vadd.f32 1e-05, %v2054_v31  ;;  %v3909_v31 = vld [vmem:[%s5877_s8 + $0x58] sm:$0xff] }
 0x64f   :  { %4154 = vrsqrt.f32 %v2056_v33  ;;  %vm2073_vm15 = vweird.f32 %v2056_v33 }
 0x655   :  { %v4155_v58 = vpop.eup %4154 }
 0x656   :  { %v2068_v54 = vmul.f32 %v4155_v58, %v2056_v33  ;;  %vm2074_vm14 = vweird.f32 %v4155_v58  ;;  %v3917_v33 = vld [vmem:[%s5878_s9 + $0x58] sm:$0xff] }
 0x657   :  { %vm2075_vm1 = vmor %vm2073_vm15, %vm2074_vm14 }
 0x658   :  { %v2069_v52 = vmul.f32 %v4155_v58, %v2068_v54  ;;  %v3908_v54 = vld [vmem:[%s5877_s8 + $0x50] sm:$0xff] }
 0x65a   :  { %v2070_v28 = vmul.f32 0.5, %v2069_v52  ;;  %v3916_v52 = vld [vmem:[%s5878_s9 + $0x50] sm:$0xff] }
 0x65c   :  { %v2071_v0 = vsub.f32 1.5, %v2070_v28  ;;  %v3899_v28 = vld [vmem:[%s5876_s7 + $0x48] sm:$0xff] }
 0x65e   :  { %v2072_v47 = vmul.f32 %v4155_v58, %v2071_v0  ;;  %v3907_v0 = vld [vmem:[%s5877_s8 + $0x48] sm:$0xff] }
 0x660   :  { %v2076_v18 = vsel %vm2075_vm1, %v4155_v58, %v2072_v47  ;;  %v3900_v58 = vld [vmem:[%s5876_s7 + $0x50] sm:$0xff]  ;;  %v3915_v47 = vld [vmem:[%s5878_s9 + $0x48] sm:$0xff] }
 0x661   :  { %v2078_v32 = vmul.f32 %v2076_v18, %v5183_v48 }
 0x663   :  { %v2083_v51 = vmul.f32 %v4049_v23, %v2078_v32  ;;  %v3902_v23 = vld [vmem:[%s5876_s7 + $0x60] sm:$0xff] }
 0x664   :  { %2285 = vmatpush.msrb.mxu0 %v3902_v23  ;;  %v3898_v32 = vld [vmem:[%s5876_s7 + $0x40] sm:$0xff]  ;;  %s3816_s7 = sshll.u32 %s5884_s15, 4  ;;  %s3817_s7 = int_to_ptr.hbm [resolvable:$true] %s3816_s7 }
 0x665   :  { %3935 = vmatmul.msk.f32.gmra.mxu2 %vm163_vm3, %v2083_v51  ;;  %3937 = vmatmul.msk.f32.gmra.mxu0 %vm163_vm3, %v2083_v51  ;;  %v3906_v51 = vld [vmem:[%s5877_s8 + $0x40] sm:$0xff]  ;;  %s4282_s8 = smov 128  }
 0x666   :  { %2286 = vmatpush.msrb.mxu0 %v3901_v38 }
 0x668   :  { %2287 = vmatpush.msrb.mxu0 %v3900_v58 }
 0x66a   :  { %2288 = vmatpush.msrb.mxu0 %v3899_v28 }
 0x66c   :  { %2289 = vmatpush.msrb.mxu0 %v3898_v32 }
 0x6c0   :  { %v2107_v4 = vpop.f32.mrf.mxu2 }
 0x6e8   :  { %v2110_v27 = vpop.f32.mrf.mxu2 }
 0x6e9   :  { %2158 = vmatpush.msrb.mxu3 %v2110_v27  ;;  %2186 = vmatpush.msrb.mxu1 %v2110_v27 }
 0x6ea   :  { %2214 = vmatpush.msrb.mxu2 %v2110_v27 }
 0x6eb   :  { %2159 = vmatpush.msrb.mxu3 %v2107_v4  ;;  %2187 = vmatpush.msrb.mxu1 %v2107_v4 }
 0x6ec   :  { %2215 = vmatpush.msrb.mxu2 %v2107_v4  ;;  %3938 = vmatmul.msk.f32.vlgmr.msrb.gmra.mxu3 %vm276_vm13, %v4467_v8  ;;  %v2136_v8 = vperm.slane %v3896_v43, 3 }
 0x6ed   :  { %3942 = vmatmul.msk.f32.vlgmr.msrb.gmra.mxu2 %vm276_vm13, %v4470_v9  ;;  %3940 = vmatmul.msk.f32.vlgmr.msrb.gmra.mxu1 %vm276_vm13, %v4494_v17  ;;  %v4050_v9 = vld [vmem:[%s5875_s6 + $0x1] ss:$0 sm:$0xff]  ;;  %v2167_v17 = vperm.slane %v3896_v43, 2 }
 0x6ee   :  { %v2137_v60 = vmul.f32 %v2136_v8, %v2107_v4  ;;  %v2138_v34 = vmul.f32 %v2136_v8, %v2110_v27  ;;  %2305 = vmatpush.msra.mxu3 %v3913_v30  ;;  %2331 = vmatpush.msra.mxu1 %v3921_v57 }
 0x6f0   :  { %v2142_v62 = vadd.f32 %v4050_v9, %v2137_v60  ;;  %v2143_v50 = vadd.f32 %v4050_v9, %v2138_v34  ;;  %2306 = vmatpush.msra.mxu3 %v3912_v42  ;;  %2332 = vmatpush.msra.mxu1 %v3920_v15 }
 0x6f2   :  { %2307 = vmatpush.msra.mxu3 %v3911_v25  ;;  %2333 = vmatpush.msra.mxu1 %v3919_v26  ;;  %v3923_v26 = vld [vmem:[%s5880_s11 + $0x10] sm:$0xff] }
 0x6f4   :  { %3939 = vmatmul.msk.f32.gmra.mxu3 %vm276_vm13, %v4482_v12  ;;  %v2223_v12 = vperm.slane %v3896_v43, 0  ;;  %2334 = vmatpush.msra.mxu1 %v3918_v37  ;;  %v3914_v43 = vld [vmem:[%s5878_s9 + $0x40] sm:$0xff]  ;;  %s4283_s9 = smov 8  }
 0x6f5   :  { %3943 = vmatmul.msk.f32.gmra.mxu2 %vm276_vm13, %v4485_v14  ;;  %3941 = vmatmul.msk.f32.gmra.mxu1 %vm276_vm13, %v4501_v20 }
 0x6f6   :  { %2308 = vmatpush.msra.mxu3 %v3910_v45  ;;  %2335 = vmatpush.msra.mxu1 %v3917_v33  ;;  %v2028_v45 = vmul.f32 1.442695, %v3923_v26 }
 0x6f8   :  { %2309 = vmatpush.msra.mxu3 %v3909_v31  ;;  %2336 = vmatpush.msra.mxu1 %v3916_v52 }
 0x6fa   :  { %2310 = vmatpush.msra.mxu3 %v3908_v54  ;;  %2337 = vmatpush.msra.mxu1 %v3915_v47 }
 0x6fc   :  { %2311 = vmatpush.msra.mxu3 %v3907_v0  ;;  %2338 = vmatpush.msra.mxu1 %v3914_v43 }
 0x6fe   :  { %2312 = vmatpush.msra.mxu3 %v3906_v51 }
 0x76a   :  { %v2189_v29 = vpop.f32.mrf.mxu1 }
 0x76b   :  { %v2196_v56 = vmul.f32 %v2195_v35, %v2189_v29 }
 0x76f   :  { %v2161_v40 = vpop.f32.mrf.mxu3 }
 0x770   :  { %v2168_v14 = vmul.f32 %v2167_v17, %v2161_v40  ;;  %v2217_v46 = vpop.f32.mrf.mxu2 }
 0x771   :  { %v2224_v24 = vmul.f32 %v2223_v12, %v2217_v46 }
 0x772   :  { %v2170_v20 = vadd.f32 %v2168_v14, %v2142_v62  ;;  %v2192_v44 = vpop.f32.mrf.mxu1 }
 0x773   :  { %v2197_v19 = vmul.f32 %v2195_v35, %v2192_v44 }
 0x774   :  { %v2198_v6 = vadd.f32 %v2196_v56, %v2170_v20 }
 0x776   :  { %v5241_v41 = vadd.f32 %v2224_v24, %v2198_v6 }
 0x777   :  { %v2164_v11 = vpop.f32.mrf.mxu3 }
 0x778   :  { %v3944_v21 = vmul.f32 -1.442695, %v5241_v41  ;;  %v2169_v36 = vmul.f32 %v2167_v17, %v2164_v11  ;;  %v2220_v49 = vpop.f32.mrf.mxu2 }
 0x779   :  { %v2225_v22 = vmul.f32 %v2223_v12, %v2220_v49  ;;  %v4051_v49 = vld [vmem:[%s5879_s10 + $0x1] ss:$0 sm:$0xff] }
 0x77a   :  { %4156 = vpow2.f32 %v3944_v21  ;;  %v2171_v10 = vadd.f32 %v2169_v36, %v2143_v50  ;;  %v5337_v36 = vpop.f32.mrf.mxu0 }
 0x77c   :  { %v2199_v5 = vadd.f32 %v2197_v19, %v2171_v10 }
 0x77e   :  { %v5262_v55 = vadd.f32 %v2225_v22, %v2199_v5 }
 0x780   :  { %v4157_v61 = vpop.eup %4156  ;;  %v3945_v53 = vmul.f32 -1.442695, %v5262_v55 }
 0x781   :  { %v2234_v16 = vadd.f32 1.0, %v4157_v61  ;;  %v3924_v61 = vld [vmem:[%s5880_s11 + $0x18] sm:$0xff] }
 0x782   :  { %4158 = vpow2.f32 %v3945_v53  ;;  %v5339_v19 = vpop.f32.mrf.mxu0  ;;  %v2030_v38 = vmul.f32 1.442695, %v3924_v61 }
 0x783   :  { %4160 = vrcp.f32 %v2234_v16  ;;  %v2247_v60 = vand.u32 2147483648, %v2234_v16  ;;  %v2245_v17 = vand.u32 2147483647, %v2234_v16  ;;  %vm2241_vm6 = vweird.f32 %v2234_v16 }
 0x785   :  { %v2248_v40 = vor.u32 1.1754944e-38, %v2247_v60  ;;  %vm2246_vm8 = vcmp.eq.f32.partialorder %v2245_v17, 8.507059e+37 }
 0x788   :  { %v4159_v18 = vpop.eup %4158 }
 0x789   :  { %v4161_v4 = vpop.eup %4160  ;;  %v2235_v27 = vadd.f32 1.0, %v4159_v18 }
 0x78a   :  { %v2237_v8 = vmul.f32 %v4161_v4, %v2234_v16  ;;  %vm2242_vm13 = vweird.f32 %v4161_v4 }
 0x78b   :  { %4162 = vrcp.f32 %v2235_v27  ;;  %vm2243_vm7 = vmor %vm2241_vm6, %vm2242_vm13  ;;  %v2262_v24 = vand.u32 2147483648, %v2235_v27  ;;  %v2260_v6 = vand.u32 2147483647, %v2235_v27  ;;  %vm2256_vm14 = vweird.f32 %v2235_v27 }
 0x78c   :  { %v2238_v29 = vsub.f32 1.0, %v2237_v8 }
 0x78d   :  { %v2263_v11 = vor.u32 1.1754944e-38, %v2262_v24  ;;  %vm2261_vm1 = vcmp.eq.f32.partialorder %v2260_v6, 8.507059e+37 }
 0x78e   :  { %v2239_v9 = vmul.f32 %v4161_v4, %v2238_v29 }
 0x790   :  { %v2240_v35 = vadd.f32 %v4161_v4, %v2239_v9 }
 0x791   :  { %v4163_v12 = vpop.eup %4162 }
 0x792   :  { %v2244_v62 = vsel %vm2243_vm7, %v4161_v4, %v2240_v35  ;;  %v2252_v14 = vmul.f32 %v4163_v12, %v2235_v27  ;;  %vm2257_vm9 = vweird.f32 %v4163_v12 }
 0x793   :  { %v2249_v56 = vsel %vm2246_vm8, %v2248_v40, %v2244_v62  ;;  %vm2258_vm15 = vmor %vm2256_vm14, %vm2257_vm9 }
 0x794   :  { %v5320_v46 = vmul.f32 %v2249_v56, %v5241_v41  ;;  %v2253_v20 = vsub.f32 1.0, %v2252_v14 }
 0x796   :  { %v2254_v34 = vmul.f32 %v4163_v12, %v2253_v20  ;;  %3946 = vmatmul.msk.f32.vlgmr.msrb.gmra.mxu0 %vm75_vm0, %v5320_v46  ;;  %3948 = vmatmul.msk.f32.vlgmr.msra.gmra.mxu3 %vm75_vm0, %v5320_v46 }
 0x797   :  { %3950 = vmatmul.msk.f32.vlgmr.msra.gmra.mxu1 %vm75_vm0, %v5320_v46 }
 0x798   :  { %v2255_v44 = vadd.f32 %v4163_v12, %v2254_v34 }
 0x79a   :  { %v2259_v41 = vsel %vm2258_vm15, %v4163_v12, %v2255_v44 }
 0x79b   :  { %v2264_v21 = vsel %vm2261_vm1, %v2263_v11, %v2259_v41 }
 0x79c   :  { %v5329_v50 = vmul.f32 %v2264_v21, %v5262_v55 }
 0x79e   :  { %3947 = vmatmul.msk.f32.gmra.mxu0 %vm75_vm0, %v5329_v50  ;;  %3949 = vmatmul.msk.f32.gmra.mxu3 %vm75_vm0, %v5329_v50 }
 0x79f   :  { %3951 = vmatmul.msk.f32.gmra.mxu1 %vm75_vm0, %v5329_v50 }
 0x813   :  { %v5344_v10 = vpop.f32.mrf.mxu0 }
 0x814   :  { %v2340_v22 = vpop.f32.mrf.mxu1  ;;  %v2602_v5 = vperm.slane %v5344_v10, 2  ;;  %v2589_v63 = vperm.slane %v5344_v10, 1  ;;  %v2576_v30 = vperm.slane %v5344_v10, 0  ;;  %v2615_v37 = vperm.slane %v5344_v10, 3 }
 0x815   :  { %v2341_v57 = vadd.f32 %v4051_v49, %v2340_v22  ;;  %v2641_v62 = vperm.slane %v5344_v10, 5  ;;  %v2628_v14 = vperm.slane %v5344_v10, 4 }
 0x816   :  { %2607 = vperm.xlu1 %4008, %v2602_v5   ;;  %2600 = vperm.xlu2 %4007, %v2589_v63  }
 0x817   :  { %v2352_v13 = vand.u32 2147483647, %v2341_v57  ;;  %2581 = vperm.xlu0 %4004, %v2576_v30   ;;  %v2346_v18 = vmax.f32 %v2341_v57, 0.0  ;;  %vm2348_vm6 = vcmp.ne.f32.partialorder %v2341_v57, %v2341_v57 }
 0x819   :  { %v2354_v42 = vsub.f32 0.0, %v2352_v13 }
 0x81b   :  { %v2356_v15 = vmul.f32 1.442695, %v2354_v42 }
 0x81c   :  { %v2343_v55 = vpop.f32.mrf.mxu1 }
 0x81d   :  { %4164 = vpow2.f32 %v2356_v15  ;;  %v5353_v2 = vadd.f32 %v4051_v49, %v2343_v55  ;;  %v2654_v15 = vperm.slane %v5344_v10, 6 }
 0x81e   :  { %4011 = vset.pattern.permute.xlu1 %v4455_v1  ;;  %4010 = vset.pattern.permute.xlu2 %v4380_v7 }
 0x81f   :  { %v2353_v25 = vand.u32 2147483647, %v5353_v2  ;;  %4005 = vset.pattern.permute.xlu0 %v4455_v1  ;;  %v2347_v13 = vmax.f32 %v5353_v2, 0.0  ;;  %vm2349_vm8 = vcmp.ne.f32.partialorder %v5353_v2, %v5353_v2 }
 0x821   :  { %v2355_v53 = vsub.f32 0.0, %v2353_v25 }
 0x823   :  { %v4165_v23 = vpop.eup %4164  ;;  %v2358_v33 = vmul.f32 1.442695, %v2355_v53 }
 0x824   :  { %v2360_v16 = vadd.f32 1.0, %v4165_v23  ;;  %v2363_v31 = vmul.f32 -0.5, %v4165_v23  ;;  %v2366_v54 = vand.u32 2147483647, %v4165_v23 }
 0x826   :  { %4166 = vlog2.f32 %v2360_v16  ;;  %2626 = vperm.xlu1 %4011, %v2615_v37   ;;  %2620 = vperm.xlu2 %4010, %v2615_v37   ;;  %v2364_v58 = vadd.f32 1.0, %v2363_v31  ;;  %vm2367_vm13 = vcmp.lt.f32.partialorder %v2366_v54, 0.0004427343 }
 0x827   :  { %2587 = vperm.xlu0 %4005, %v2576_v30   ;;  %4168 = vpow2.f32 %v2028_v45 }
 0x828   :  { %4170 = vpow2.f32 %v2030_v38  ;;  %v2365_v0 = vmul.f32 %v4165_v23, %v2364_v58 }
 0x829   :  { %4172 = vpow2.f32 %v2358_v33 }
 0x82c   :  { %v4167_v52 = vpop.eup %4166 }
 0x82d   :  { %v2362_v28 = vmul.f32 0.6931472, %v4167_v52  ;;  %v4169_v47 = vpop.eup %4168 }
 0x82e   :  { %4014 = vset.pattern.permute.xlu1 %v4380_v7  ;;  %4013 = vset.pattern.permute.xlu2 %v4455_v1  ;;  %v4171_v32 = vpop.eup %4170  ;;  %v5371_v43 = vsub.f32 0.0, %v4169_v47 }
 0x82f   :  { %v2368_v51 = vsel %vm2367_vm13, %v2365_v0, %v2362_v28  ;;  %4006 = vset.pattern.permute.xlu0 %v4380_v7  ;;  %v5369_v4 = vpop.eup %4172  ;;  %v5373_v8 = vsub.f32 0.0, %v4171_v32 }
 0x830   :  { %v2378_v27 = vadd.f32 %v2368_v51, %v2346_v18  ;;  %v2369_v35 = vadd.f32 1.0, %v5369_v4  ;;  %v2372_v24 = vmul.f32 -0.5, %v5369_v4  ;;  %v2375_v54 = vand.u32 2147483647, %v5369_v4 }
 0x832   :  { %v5375_v29 = vsel %vm2348_vm6, %v2341_v57, %v2378_v27  ;;  %4174 = vlog2.f32 %v2369_v35  ;;  %v2373_v42 = vadd.f32 1.0, %v2372_v24  ;;  %vm2376_vm7 = vcmp.lt.f32.partialorder %v2375_v54, 0.0004427343 }
 0x833   :  { %v2384_v60 = vrot.slane %v5375_v29, 1  ;;  %v2385_v9 = vrot.slane %v5375_v29, 2  ;;  %v2386_v17 = vrot.slane %v5375_v29, 3  ;;  %v2387_v12 = vrot.slane %v5375_v29, 4 }
 0x834   :  { %v2398_v40 = vperm.slane %v5375_v29, 0  ;;  %v2388_v34 = vrot.slane %v5375_v29, 5  ;;  %v2389_v49 = vrot.slane %v5375_v29, 6  ;;  %v2390_v55 = vrot.slane %v5375_v29, 7 }
 0x835   :  { %v2399_v56 = vperm.slane %v2384_v60, 0  ;;  %v2400_v20 = vperm.slane %v2385_v9, 0  ;;  %v2401_v6 = vperm.slane %v2386_v17, 0  ;;  %v2402_v22 = vperm.slane %v2387_v12, 0 }
 0x836   :  { %v2430_v44 = vmul.f32 %v2398_v40, %v5371_v43  ;;  %2646 = vperm.xlu1 %4014, %v2641_v62   ;;  %2639 = vperm.xlu2 %4013, %v2628_v14   ;;  %v2431_v11 = vmul.f32 %v2398_v40, %v5373_v8  ;;  %v2403_v25 = vperm.slane %v2388_v34, 0  ;;  %v2404_v16 = vperm.slane %v2389_v49, 0 }
 0x837   :  { %v2432_v41 = vmul.f32 %v2399_v56, %v5371_v43  ;;  %v2433_v21 = vmul.f32 %v2399_v56, %v5373_v8  ;;  %2594 = vperm.xlu0 %4006, %v2589_v63   ;;  %v2434_v30 = vmul.f32 %v2400_v20, %v5371_v43  ;;  %v2435_v57 = vmul.f32 %v2400_v20, %v5373_v8 }
 0x838   :  { %v2436_v26 = vmul.f32 %v2401_v6, %v5371_v43  ;;  %v2462_v61 = vmul.f32 1.442695, %v2430_v44  ;;  %v2437_v63 = vmul.f32 %v2401_v6, %v5373_v8  ;;  %v2464_v53 = vmul.f32 1.442695, %v2431_v11  ;;  %v4175_v31 = vpop.eup %4174 }
 0x839   :  { %v2466_v23 = vmul.f32 1.442695, %v2432_v41  ;;  %v2468_v45 = vmul.f32 1.442695, %v2433_v21  ;;  %v2438_v37 = vmul.f32 %v2402_v22, %v5371_v43  ;;  %v2470_v38 = vmul.f32 1.442695, %v2434_v30 }
 0x83a   :  { %4176 = vpow2.f32 %v2462_v61  ;;  %v2439_v33 = vmul.f32 %v2402_v22, %v5373_v8  ;;  %v2472_v58 = vmul.f32 1.442695, %v2435_v57  ;;  %v2405_v52 = vperm.slane %v2390_v55, 0 }
 0x83b   :  { %4178 = vpow2.f32 %v2464_v53  ;;  %v2440_v28 = vmul.f32 %v2403_v25, %v5371_v43  ;;  %v2474_v0 = vmul.f32 1.442695, %v2436_v26  ;;  %v2441_v47 = vmul.f32 %v2403_v25, %v5373_v8 }
 0x83c   :  { %4180 = vpow2.f32 %v2466_v23  ;;  %v2476_v18 = vmul.f32 1.442695, %v2437_v63  ;;  %v2374_v32 = vmul.f32 %v5369_v4, %v2373_v42  ;;  %v2442_v51 = vmul.f32 %v2404_v16, %v5371_v43 }
 0x83d   :  { %4182 = vpow2.f32 %v2468_v45  ;;  %v2478_v27 = vmul.f32 1.442695, %v2438_v37  ;;  %v2371_v60 = vmul.f32 0.6931472, %v4175_v31  ;;  %v2443_v9 = vmul.f32 %v2404_v16, %v5373_v8 }
 0x83e   :  { %2659 = vperm.xlu1 %4014, %v2654_v15   ;;  %2652 = vperm.xlu2 %4013, %v2641_v62   ;;  %4184 = vpow2.f32 %v2470_v38  ;;  %v2480_v17 = vmul.f32 1.442695, %v2439_v33  ;;  %v2444_v12 = vmul.f32 %v2405_v52, %v5371_v43  ;;  %v2482_v40 = vmul.f32 1.442695, %v2440_v28 }
 0x83f   :  { %4009 = vset.pattern.permute.xlu0 %v4455_v1  ;;  %4186 = vpow2.f32 %v2472_v58  ;;  %v2377_v62 = vsel %vm2376_vm7, %v2374_v32, %v2371_v60  ;;  %v2445_v4 = vmul.f32 %v2405_v52, %v5373_v8  ;;  %v2484_v20 = vmul.f32 1.442695, %v2441_v47 }
 0x840   :  { %v4177_v35 = vpop.eup %4176  ;;  %4188 = vpow2.f32 %v2474_v0  ;;  %v2379_v24 = vadd.f32 %v2377_v62, %v2347_v13  ;;  %v2486_v6 = vmul.f32 1.442695, %v2442_v51  ;;  %v2488_v11 = vmul.f32 1.442695, %v2443_v9 }
 0x841   :  { %v4179_v56 = vpop.eup %4178  ;;  %4190 = vpow2.f32 %v2476_v18  ;;  %2526 = vst.msk [vmem:[#allocation2] sm:$0xff] %vm75_vm0, %v4177_v35  ;;  %v2490_v49 = vmul.f32 1.442695, %v2444_v12  ;;  %v2492_v13 = vmul.f32 1.442695, %v2445_v4  ;;  %v2667_v0 = vperm.slane %v5344_v10, 7 }
 0x842   :  { %v4181_v34 = vpop.eup %4180  ;;  %4192 = vpow2.f32 %v2478_v27  ;;  %2527 = vst.msk [vmem:[#allocation2 + $0x8] sm:$0xff] %vm75_vm0, %v4179_v56  ;;  %v5422_v41 = vsel %vm2349_vm8, %v5353_v2, %v2379_v24 }
 0x843   :  { %v4183_v44 = vpop.eup %4182  ;;  %4194 = vpow2.f32 %v2480_v17  ;;  %2528 = vst.msk [vmem:[#allocation2 + $0x10] sm:$0xff] %vm75_vm0, %v4181_v34  ;;  %v2391_v22 = vrot.slane %v5422_v41, 1  ;;  %v2392_v30 = vrot.slane %v5422_v41, 2  ;;  %v2393_v2 = vrot.slane %v5422_v41, 3  ;;  %v5460_v34 = vpop.f32.mrf.mxu3 }
 0x844   :  { %v4185_v21 = vpop.eup %4184  ;;  %4196 = vpow2.f32 %v2482_v40  ;;  %2529 = vst.msk [vmem:[#allocation2 + $0x18] sm:$0xff] %vm75_vm0, %v4183_v44  ;;  %v2406_v55 = vperm.slane %v5422_v41, 0  ;;  %v2394_v61 = vrot.slane %v5422_v41, 4  ;;  %v2396_v54 = vrot.slane %v5422_v41, 6 }
 0x845   :  { %v4187_v57 = vpop.eup %4186  ;;  %4198 = vpow2.f32 %v2484_v20  ;;  %2530 = vst.msk [vmem:[#allocation2 + $0x20] sm:$0xff] %vm75_vm0, %v4185_v21  ;;  %v2407_v25 = vperm.slane %v2391_v22, 0  ;;  %v2408_v63 = vperm.slane %v2392_v30, 0  ;;  %v2409_v45 = vperm.slane %v2393_v2, 0 }
 0x846   :  { %4017 = vset.pattern.permute.xlu1 %v4455_v1  ;;  %4016 = vset.pattern.permute.xlu2 %v4380_v7  ;;  %v4189_v42 = vpop.eup %4188  ;;  %4200 = vpow2.f32 %v2486_v6  ;;  %2531 = vst.msk [vmem:[#allocation2 + $0x28] sm:$0xff] %vm75_vm0, %v4187_v57  ;;  %v2446_v16 = vmul.f32 %v2406_v55, %v5371_v43  ;;  %v2447_v37 = vmul.f32 %v2406_v55, %v5373_v8  ;;  %v2410_v52 = vperm.slane %v2394_v61, 0 }
 0x847   :  { %2613 = vperm.xlu0 %4009, %v2602_v5   ;;  %v4191_v26 = vpop.eup %4190  ;;  %4202 = vpow2.f32 %v2488_v11  ;;  %2532 = vst.msk [vmem:[#allocation2 + $0x30] sm:$0xff] %vm75_vm0, %v4189_v42  ;;  %v2395_v5 = vrot.slane %v5422_v41, 5  ;;  %v2448_v31 = vmul.f32 %v2407_v25, %v5371_v43  ;;  %v2449_v33 = vmul.f32 %v2407_v25, %v5373_v8 }
 0x848   :  { %v4193_v53 = vpop.eup %4192  ;;  %4204 = vpow2.f32 %v2490_v49  ;;  %2533 = vst.msk [vmem:[#allocation2 + $0x38] sm:$0xff] %vm75_vm0, %v4191_v26  ;;  %v2450_v28 = vmul.f32 %v2408_v63, %v5371_v43  ;;  %v2397_v18 = vrot.slane %v5422_v41, 7  ;;  %v2451_v32 = vmul.f32 %v2408_v63, %v5373_v8 }
 0x849   :  { %v4195_v23 = vpop.eup %4194  ;;  %4206 = vpow2.f32 %v2492_v13  ;;  %2534 = vst.msk [vmem:[#allocation2 + $0x40] sm:$0xff] %vm75_vm0, %v4193_v53  ;;  %v2411_v27 = vperm.slane %v2395_v5, 0  ;;  %v2452_v60 = vmul.f32 %v2409_v45, %v5371_v43  ;;  %v2494_v9 = vmul.f32 1.442695, %v2446_v16 }
 0x84a   :  { %v4197_v38 = vpop.eup %4196  ;;  %2535 = vst.msk [vmem:[#allocation2 + $0x48] sm:$0xff] %vm75_vm0, %v4195_v23  ;;  %v2496_v17 = vmul.f32 1.442695, %v2447_v37  ;;  %v2453_v12 = vmul.f32 %v2409_v45, %v5373_v8  ;;  %v2498_v40 = vmul.f32 1.442695, %v2448_v31  ;;  %v2412_v4 = vperm.slane %v2396_v54, 0 }
 0x84b   :  { %v4199_v58 = vpop.eup %4198  ;;  %2536 = vst.msk [vmem:[#allocation2 + $0x50] sm:$0xff] %vm75_vm0, %v4197_v38  ;;  %v2500_v62 = vmul.f32 1.442695, %v2449_v33  ;;  %v2454_v20 = vmul.f32 %v2410_v52, %v5371_v43  ;;  %4208 = vpow2.f32 %v2494_v9  ;;  %v2502_v24 = vmul.f32 1.442695, %v2450_v28 }
 0x84c   :  { %v4201_v47 = vpop.eup %4200  ;;  %2537 = vst.msk [vmem:[#allocation2 + $0x58] sm:$0xff] %vm75_vm0, %v4199_v58  ;;  %v2455_v6 = vmul.f32 %v2410_v52, %v5373_v8  ;;  %4210 = vpow2.f32 %v2496_v17  ;;  %v2504_v44 = vmul.f32 1.442695, %v2451_v32  ;;  %v2413_v11 = vperm.slane %v2397_v18, 0 }
 0x84d   :  { %v4203_v51 = vpop.eup %4202  ;;  %2538 = vst.msk [vmem:[#allocation2 + $0x60] sm:$0xff] %vm75_vm0, %v4201_v47  ;;  %v2456_v21 = vmul.f32 %v2411_v27, %v5371_v43  ;;  %4212 = vpow2.f32 %v2498_v40  ;;  %v2506_v49 = vmul.f32 1.442695, %v2452_v60  ;;  %v2457_v22 = vmul.f32 %v2411_v27, %v5373_v8 }
 0x84e   :  { %2678 = vperm.xlu1 %4017, %v2667_v0   ;;  %2672 = vperm.xlu2 %4016, %v2667_v0   ;;  %v4205_v35 = vpop.eup %4204  ;;  %2539 = vst.msk [vmem:[#allocation2 + $0x68] sm:$0xff] %vm75_vm0, %v4203_v51  ;;  %4214 = vpow2.f32 %v2500_v62  ;;  %v2508_v30 = vmul.f32 1.442695, %v2453_v12  ;;  %v2458_v57 = vmul.f32 %v2412_v4, %v5371_v43  ;;  %v2510_v13 = vmul.f32 1.442695, %v2454_v20 }
 0x84f   :  { %4012 = vset.pattern.permute.xlu0 %v4380_v7  ;;  %v4207_v56 = vpop.eup %4206  ;;  %2540 = vst.msk [vmem:[#allocation2 + $0x70] sm:$0xff] %vm75_vm0, %v4205_v35  ;;  %4216 = vpow2.f32 %v2502_v24  ;;  %v2893_v2 = vperm.slane %v5460_v34, 1  ;;  %v2459_v42 = vmul.f32 %v2412_v4, %v5373_v8  ;;  %v2512_v55 = vmul.f32 1.442695, %v2455_v6 }
 0x850   :  { %2541 = vst.msk [vmem:[#allocation2 + $0x78] sm:$0xff] %vm75_vm0, %v4207_v56  ;;  %4218 = vpow2.f32 %v2504_v44  ;;  %v2460_v26 = vmul.f32 %v2413_v11, %v5371_v43  ;;  %v2514_v61 = vmul.f32 1.442695, %v2456_v21  ;;  %v2461_v53 = vmul.f32 %v2413_v11, %v5373_v8 }
 0x851   :  { %v4209_v25 = vpop.eup %4208  ;;  %4220 = vpow2.f32 %v2506_v49  ;;  %v2516_v5 = vmul.f32 1.442695, %v2457_v22  ;;  %v2518_v43 = vmul.f32 1.442695, %v2458_v57  ;;  %v2520_v16 = vmul.f32 1.442695, %v2459_v42 }
 0x852   :  { %v4211_v63 = vpop.eup %4210  ;;  %4222 = vpow2.f32 %v2508_v30  ;;  %2542 = vst.msk [vmem:[#allocation2 + $0x80] sm:$0xff] %vm75_vm0, %v4209_v25  ;;  %v2522_v8 = vmul.f32 1.442695, %v2460_v26  ;;  %v2524_v31 = vmul.f32 1.442695, %v2461_v53  ;;  %v2906_v33 = vperm.slane %v5460_v34, 2 }
 0x853   :  { %v4213_v23 = vpop.eup %4212  ;;  %4224 = vpow2.f32 %v2510_v13  ;;  %2543 = vst.msk [vmem:[#allocation2 + $0x88] sm:$0xff] %vm75_vm0, %v4211_v63  ;;  %v2880_v58 = vperm.slane %v5460_v34, 0  ;;  %v5495_v60 = vmul.f32 %v5375_v29, %v5320_v46  ;;  %v2919_v17 = vperm.slane %v5460_v34, 3 }
 0x854   :  { %v4215_v45 = vpop.eup %4214  ;;  %4226 = vpow2.f32 %v2512_v55  ;;  %2544 = vst.msk [vmem:[#allocation2 + $0x90] sm:$0xff] %vm75_vm0, %v4213_v23  ;;  %v2932_v40 = vperm.slane %v5460_v34, 4  ;;  %v2958_v20 = vperm.slane %v5460_v34, 6  ;;  %v2971_v30 = vperm.slane %v5460_v34, 7  ;;  %v5531_v55 = vpop.f32.mrf.mxu0 }
 0x855   :  { %v4217_v37 = vpop.eup %4216  ;;  %4228 = vpow2.f32 %v2514_v61  ;;  %2545 = vst.msk [vmem:[#allocation2 + $0x98] sm:$0xff] %vm75_vm0, %v4215_v45  ;;  %v2562_v9 = vrot.slane %v5495_v60, 1  ;;  %v2564_v10 = vrot.slane %v5495_v60, 3  ;;  %v2563_v4 = vrot.slane %v5495_v60, 2 }
 0x856   :  { %4018 = vset.pattern.permute.xlu1 %v4380_v7  ;;  %2898 = vperm.xlu2 %4016, %v2893_v2   ;;  %v4219_v38 = vpop.eup %4218  ;;  %4230 = vpow2.f32 %v2516_v5  ;;  %2546 = vst.msk [vmem:[#allocation2 + $0xa0] sm:$0xff] %vm75_vm0, %v4217_v37  ;;  %v2784_v44 = vperm.slane %v5495_v60, 0  ;;  %v2565_v22 = vrot.slane %v5495_v60, 4  ;;  %v2945_v57 = vperm.slane %v5460_v34, 5 }
 0x857   :  { %2633 = vperm.xlu0 %4012, %v2628_v14   ;;  %v4221_v14 = vpop.eup %4220  ;;  %4232 = vpow2.f32 %v2518_v43  ;;  %2547 = vst.msk [vmem:[#allocation2 + $0xa8] sm:$0xff] %vm75_vm0, %v4219_v38  ;;  %v5506_v35 = vperm.slane %v2562_v9, 0  ;;  %v5518_v24 = vperm.slane %v2563_v4, 0  ;;  %v2566_v25 = vrot.slane %v5495_v60, 5 }
 0x858   :  { %v4223_v54 = vpop.eup %4222  ;;  %4234 = vpow2.f32 %v2520_v16  ;;  %2548 = vst.msk [vmem:[#allocation2 + $0xb0] sm:$0xff] %vm75_vm0, %v4221_v14  ;;  %v5528_v13 = vperm.slane %v2565_v22, 0  ;;  %v2680_v26 = vperm.slane %v5531_v55, 0  ;;  %v2693_v45 = vperm.slane %v5531_v55, 1 }
 0x859   :  { %v4225_v52 = vpop.eup %4224  ;;  %4236 = vpow2.f32 %v2522_v8  ;;  %2549 = vst.msk [vmem:[#allocation2 + $0xb8] sm:$0xff] %vm75_vm0, %v4223_v54  ;;  %v2789_v34 = vperm.slane %v2566_v25, 0  ;;  %v2568_v16 = vrot.slane %v5495_v60, 7  ;;  %v2567_v54 = vrot.slane %v5495_v60, 6 }
 0x85a   :  { %v4227_v28 = vpop.eup %4226  ;;  %4238 = vpow2.f32 %v2524_v31  ;;  %2550 = vst.msk [vmem:[#allocation2 + $0xc0] sm:$0xff] %vm75_vm0, %v4225_v52  ;;  %v2706_v52 = vperm.slane %v5531_v55, 2  ;;  %v2732_v9 = vperm.slane %v5531_v55, 4 }
 0x85b   :  { %v4229_v0 = vpop.eup %4228  ;;  %2551 = vst.msk [vmem:[#allocation2 + $0xc8] sm:$0xff] %vm75_vm0, %v4227_v28  ;;  %v2791_v8 = vperm.slane %v2568_v16, 0  ;;  %v2719_v28 = vperm.slane %v5531_v55, 3 }
 0x85c   :  { %v4231_v47 = vpop.eup %4230  ;;  %2552 = vst.msk [vmem:[#allocation2 + $0xd0] sm:$0xff] %vm75_vm0, %v4229_v0  ;;  %v2790_v0 = vperm.slane %v2567_v54, 0 }
 0x85d   :  { %v4233_v18 = vpop.eup %4232  ;;  %2553 = vst.msk [vmem:[#allocation2 + $0xd8] sm:$0xff] %vm75_vm0, %v4231_v47 }
 0x85e   :  { %2911 = vperm.xlu2 %4016, %v2906_v33   ;;  %2885 = vperm.xlu1 %4018, %v2880_v58   ;;  %v4235_v32 = vpop.eup %4234  ;;  %2554 = vst.msk [vmem:[#allocation2 + $0xe0] sm:$0xff] %vm75_vm0, %v4233_v18 }
 0x85f   :  { %4015 = vset.pattern.permute.xlu0 %v4455_v1  ;;  %v4237_v51 = vpop.eup %4236  ;;  %2555 = vst.msk [vmem:[#allocation2 + $0xe8] sm:$0xff] %vm75_vm0, %v4235_v32 }
 0x860   :  { %v4239_v27 = vpop.eup %4238  ;;  %2556 = vst.msk [vmem:[#allocation2 + $0xf0] sm:$0xff] %vm75_vm0, %v4237_v51 }
 0x861   :  { %2557 = vst.msk [vmem:[#allocation2 + $0xf8] sm:$0xff] %vm75_vm0, %v4239_v27 }
 0x866   :  { %4021 = vset.pattern.permute.xlu2 %v4455_v1  ;;  %4019 = vset.pattern.permute.xlu1 %v4455_v1 }
 0x867   :  { %2665 = vperm.xlu0 %4015, %v2654_v15   ;;  %v2787_v15 = vperm.slane %v2564_v10, 0 }
 0x86e   :  { %2930 = vperm.xlu2 %4021, %v2919_v17   ;;  %2904 = vperm.xlu1 %4019, %v2893_v2  }
 0x86f   :  { %2891 = vperm.xlu0 %4015, %v2880_v58  }
 0x870   :  { %v2601_v29 = vpop.permute.xlu2 %2600 }
 0x871   :  { %v2819_v12 = vmul.f32 %v5506_v35, %v2601_v29 }
 0x873   :  { %2851 = vst.msk [vmem:[#allocation3 + $0x18] sm:$0xff] %vm75_vm0, %v2819_v12  ;;  %v5562_v12 = vpop.f32.mrf.mxu3 }
 0x874   :  { %v3010_v10 = vperm.slane %v5562_v12, 2 }
 0x876   :  { %2943 = vperm.xlu2 %4021, %v2932_v40   ;;  %2917 = vperm.xlu1 %4019, %v2906_v33  }
 0x877   :  { %4020 = vset.pattern.permute.xlu0 %v4380_v7 }
 0x87e   :  { %4024 = vset.pattern.permute.xlu2 %v4380_v7  ;;  %4022 = vset.pattern.permute.xlu1 %v4380_v7 }
 0x87f   :  { %2924 = vperm.xlu0 %4020, %v2919_v17   ;;  %v2758_v17 = vperm.slane %v5531_v55, 6 }
 0x880   :  { %v2621_v62 = vpop.permute.xlu2 %2620 }
 0x881   :  { %v2822_v56 = vmul.f32 %v2787_v15, %v2621_v62 }
 0x883   :  { %2854 = vst.msk [vmem:[#allocation3 + $0x30] sm:$0xff] %vm75_vm0, %v2822_v56 }
 0x886   :  { %2963 = vperm.xlu2 %4024, %v2958_v20   ;;  %2937 = vperm.xlu1 %4022, %v2932_v40   ;;  %v2745_v40 = vperm.slane %v5531_v55, 5 }
 0x887   :  { %4023 = vset.pattern.permute.xlu0 %v4455_v1 }
 0x888   :  { %v2608_v6 = vpop.permute.xlu1 %2607 }
 0x889   :  { %v2820_v11 = vmul.f32 %v5518_v24, %v2608_v6  ;;  %v2582_v21 = vpop.permute.xlu0 %2581 }
 0x88a   :  { %v2816_v49 = vmul.f32 %v2784_v44, %v2582_v21 }
 0x88b   :  { %2852 = vst.msk [vmem:[#allocation3 + $0x20] sm:$0xff] %vm75_vm0, %v2820_v11  ;;  %v2771_v11 = vperm.slane %v5531_v55, 7 }
 0x88c   :  { %2848 = vst.msk [vmem:[#allocation3] sm:$0xff] %vm75_vm0, %v2816_v49 }
 0x88e   :  { %2976 = vperm.xlu2 %4024, %v2971_v30   ;;  %2950 = vperm.xlu1 %4022, %v2945_v57  }
 0x88f   :  { %2956 = vperm.xlu0 %4023, %v2945_v57  }
 0x890   :  { %v2640_v2 = vpop.permute.xlu2 %2639 }
 0x891   :  { %v2825_v42 = vmul.f32 %v5528_v13, %v2640_v2  ;;  %v5588_v2 = vmul.f32 %v5422_v41, %v5329_v50  ;;  %v3075_v41 = vperm.slane %v5562_v12, 7 }
 0x893   :  { %2857 = vst.msk [vmem:[#allocation3 + $0x48] sm:$0xff] %vm75_vm0, %v2825_v42  ;;  %v3023_v42 = vperm.slane %v5562_v12, 3  ;;  %v2792_v55 = vperm.slane %v5588_v2, 0 }
 0x896   :  { %4025 = vset.pattern.permute.xlu1 %v4455_v1  ;;  %2685 = vperm.xlu2 %4024, %v2680_v26  }
 0x897   :  { %4026 = vset.pattern.permute.xlu0 %v4380_v7 }
 0x898   :  { %v2627_v61 = vpop.permute.xlu1 %2626  ;;  %v2653_v63 = vpop.permute.xlu2 %2652 }
 0x899   :  { %v2823_v53 = vmul.f32 %v2787_v15, %v2627_v61  ;;  %v2827_v5 = vmul.f32 %v2789_v34, %v2653_v63  ;;  %v2588_v23 = vpop.permute.xlu0 %2587  ;;  %v2569_v63 = vrot.slane %v5588_v2, 1 }
 0x89a   :  { %v2817_v43 = vmul.f32 %v2784_v44, %v2588_v23 }
 0x89b   :  { %2855 = vst.msk [vmem:[#allocation3 + $0x38] sm:$0xff] %vm75_vm0, %v2823_v53  ;;  %v3049_v53 = vperm.slane %v5562_v12, 5 }
 0x89c   :  { %2859 = vst.msk [vmem:[#allocation3 + $0x58] sm:$0xff] %vm75_vm0, %v2827_v5  ;;  %v2793_v5 = vperm.slane %v2569_v63, 0 }
 0x89d   :  { %2849 = vst.msk [vmem:[#allocation3 + $0x8] sm:$0xff] %vm75_vm0, %v2817_v43 }
 0x89e   :  { %2969 = vperm.xlu1 %4025, %v2958_v20   ;;  %4027 = vset.pattern.permute.xlu2 %v4455_v1 }
 0x89f   :  { %2698 = vperm.xlu0 %4026, %v2693_v45  }
 0x8a6   :  { %2982 = vperm.xlu1 %4025, %v2971_v30   ;;  %2704 = vperm.xlu2 %4027, %v2693_v45   ;;  %v2997_v30 = vperm.slane %v5562_v12, 1 }
 0x8a7   :  { %4029 = vset.pattern.permute.xlu0 %v4455_v1 }
 0x8a8   :  { %v2647_v37 = vpop.permute.xlu1 %2646  ;;  %v2673_v31 = vpop.permute.xlu2 %2672 }
 0x8a9   :  { %v2826_v38 = vmul.f32 %v2789_v34, %v2647_v37  ;;  %v2595_v14 = vpop.permute.xlu0 %2594  ;;  %v2830_v33 = vmul.f32 %v2791_v8, %v2673_v31 }
 0x8aa   :  { %v2818_v58 = vmul.f32 %v5506_v35, %v2595_v14 }
 0x8ab   :  { %2858 = vst.msk [vmem:[#allocation3 + $0x50] sm:$0xff] %vm75_vm0, %v2826_v38  ;;  %v2984_v38 = vperm.slane %v5562_v12, 0 }
 0x8ac   :  { %2862 = vst.msk [vmem:[#allocation3 + $0x70] sm:$0xff] %vm75_vm0, %v2830_v33 }
 0x8ad   :  { %2850 = vst.msk [vmem:[#allocation3 + $0x10] sm:$0xff] %vm75_vm0, %v2818_v58 }
 0x8ae   :  { %2691 = vperm.xlu1 %4025, %v2680_v26   ;;  %2717 = vperm.xlu2 %4027, %v2706_v52  }
 0x8af   :  { %2730 = vperm.xlu0 %4029, %v2719_v28  }
 0x8b0   :  { %v2660_v47 = vpop.permute.xlu1 %2659  ;;  %v2899_v32 = vpop.permute.xlu2 %2898 }
 0x8b1   :  { %v2828_v18 = vmul.f32 %v2790_v0, %v2660_v47  ;;  %3090 = vst.msk [vmem:[#allocation4 + $0x10] sm:$0xff] %vm1255_vm2, %v2899_v32  ;;  %v2572_v47 = vrot.slane %v5588_v2, 4 }
 0x8b3   :  { %2860 = vst.msk [vmem:[#allocation3 + $0x60] sm:$0xff] %vm75_vm0, %v2828_v18  ;;  %v5616_v18 = vperm.slane %v2572_v47, 0 }
 0x8b6   :  { %4028 = vset.pattern.permute.xlu1 %v4380_v7  ;;  %4030 = vset.pattern.permute.xlu2 %v4380_v7 }
 0x8b7   :  { %4032 = vset.pattern.permute.xlu0 %v4380_v7 }
 0x8b8   :  { %v2912_v27 = vpop.permute.xlu2 %2911 }
 0x8b9   :  { %v2614_v51 = vpop.permute.xlu0 %2613  ;;  %3092 = vst.msk [vmem:[#allocation4 + $0x20] sm:$0xff] %vm1255_vm2, %v2912_v27  ;;  %v2573_v27 = vrot.slane %v5588_v2, 5 }
 0x8ba   :  { %v2821_v60 = vmul.f32 %v5518_v24, %v2614_v51  ;;  %v3036_v24 = vperm.slane %v5562_v12, 4 }
 0x8bc   :  { %2853 = vst.msk [vmem:[#allocation3 + $0x28] sm:$0xff] %vm75_vm0, %v2821_v60  ;;  %v3062_v60 = vperm.slane %v5562_v12, 6 }
 0x8be   :  { %2711 = vperm.xlu1 %4028, %v2706_v52   ;;  %2737 = vperm.xlu2 %4030, %v2732_v9  }
 0x8bf   :  { %2763 = vperm.xlu0 %4032, %v2758_v17  }
 0x8c0   :  { %v2679_v35 = vpop.permute.xlu1 %2678 }
 0x8c1   :  { %v2831_v29 = vmul.f32 %v2791_v8, %v2679_v35  ;;  %v2570_v8 = vrot.slane %v5588_v2, 2 }
 0x8c3   :  { %2863 = vst.msk [vmem:[#allocation3 + $0x78] sm:$0xff] %vm75_vm0, %v2831_v29  ;;  %v2794_v31 = vperm.slane %v2570_v8, 0 }
 0x8c6   :  { %2724 = vperm.xlu1 %4028, %v2719_v28   ;;  %2750 = vperm.xlu2 %4030, %v2745_v40  }
 0x8c7   :  { %3015 = vperm.xlu0 %4032, %v3010_v10  }
 0x8c8   :  { %v2931_v15 = vpop.permute.xlu2 %2930 }
 0x8c9   :  { %v2634_v62 = vpop.permute.xlu0 %2633  ;;  %3095 = vst.msk [vmem:[#allocation4 + $0x38] sm:$0xff] %vm1255_vm2, %v2931_v15 }
 0x8ca   :  { %v2824_v56 = vmul.f32 %v5528_v13, %v2634_v62 }
 0x8cc   :  { %2856 = vst.msk [vmem:[#allocation3 + $0x40] sm:$0xff] %vm75_vm0, %v2824_v56 }
 0x8ce   :  { %4031 = vset.pattern.permute.xlu1 %v4455_v1  ;;  %4033 = vset.pattern.permute.xlu2 %v4455_v1 }
 0x8cf   :  { %4035 = vset.pattern.permute.xlu0 %v4455_v1 }
 0x8d0   :  { %v2944_v4 = vpop.permute.xlu2 %2943  ;;  %v2886_v20 = vpop.permute.xlu1 %2885 }
 0x8d1   :  { %3097 = vst.msk [vmem:[#allocation4 + $0x48] sm:$0xff] %vm1255_vm2, %v2944_v4 }
 0x8d2   :  { %3088 = vst.msk [vmem:[#allocation4] sm:$0xff] %vm1255_vm2, %v2886_v20  ;;  %v2574_v20 = vrot.slane %v5588_v2, 6 }
 0x8d6   :  { %2743 = vperm.xlu1 %4031, %v2732_v9   ;;  %2769 = vperm.xlu2 %4033, %v2758_v17   ;;  %v2571_v9 = vrot.slane %v5588_v2, 3  ;;  %v5625_v17 = vperm.slane %v2573_v27, 0 }
 0x8d7   :  { %3047 = vperm.xlu0 %4035, %v3036_v24  }
 0x8d8   :  { %v2795_v35 = vperm.slane %v2571_v9, 0 }
 0x8d9   :  { %v2666_v6 = vpop.permute.xlu0 %2665 }
 0x8da   :  { %v2829_v44 = vmul.f32 %v2790_v0, %v2666_v6  ;;  %v2798_v6 = vperm.slane %v2574_v20, 0 }
 0x8dc   :  { %2861 = vst.msk [vmem:[#allocation3 + $0x68] sm:$0xff] %vm75_vm0, %v2829_v44 }
 0x8de   :  { %2756 = vperm.xlu1 %4031, %v2745_v40   ;;  %2782 = vperm.xlu2 %4033, %v2771_v11  }
 0x8df   :  { %4038 = vset.pattern.permute.xlu0 %v4380_v7 }
 0x8e0   :  { %v2964_v21 = vpop.permute.xlu2 %2963  ;;  %v2905_v49 = vpop.permute.xlu1 %2904 }
 0x8e1   :  { %3100 = vst.msk [vmem:[#allocation4 + $0x60] sm:$0xff] %vm1255_vm2, %v2964_v21  ;;  %v2892_v22 = vpop.permute.xlu0 %2891 }
 0x8e2   :  { %3089 = vst.msk [vmem:[#allocation4 + $0x8] sm:$0xff] %vm1255_vm2, %v2892_v22 }
 0x8e3   :  { %3091 = vst.msk [vmem:[#allocation4 + $0x18] sm:$0xff] %vm1255_vm2, %v2905_v49 }
 0x8e6   :  { %4034 = vset.pattern.permute.xlu1 %v4380_v7  ;;  %3021 = vperm.xlu2 %4033, %v3010_v10  }
 0x8e7   :  { %3002 = vperm.xlu0 %4038, %v2997_v30  }
 0x8e8   :  { %v2977_v57 = vpop.permute.xlu2 %2976  ;;  %v2918_v13 = vpop.permute.xlu1 %2917  ;;  %v3329_v52 = vld [vmem:[#allocation4 + $0x60] sm:$0xff] }
 0x8e9   :  { %3102 = vst.msk [vmem:[#allocation4 + $0x70] sm:$0xff] %vm1255_vm2, %v2977_v57  ;;  %v3129_v33 = vld [vmem:[#allocation4 + $0x8] sm:$0xff]  ;;  %v2575_v57 = vrot.slane %v5588_v2, 7  ;;  %v3198_v2 = vld [vmem:[#allocation4 + $0x38] sm:$0xff] }
 0x8ea   :  { %3093 = vst.msk [vmem:[#allocation4 + $0x28] sm:$0xff] %vm1255_vm2, %v2918_v13  ;;  %v3263_v13 = vld [vmem:[#allocation4 + $0x48] sm:$0xff] }
 0x8ee   :  { %2776 = vperm.xlu1 %4034, %v2771_v11   ;;  %3034 = vperm.xlu2 %4033, %v3023_v42  }
 0x8ef   :  { %4041 = vset.pattern.permute.xlu0 %v4455_v1 }
 0x8f0   :  { %v2686_v25 = vpop.permute.xlu2 %2685 }
 0x8f1   :  { %v2925_v26 = vpop.permute.xlu0 %2924  ;;  %v2832_v34 = vmul.f32 %v2792_v55, %v2686_v25  ;;  %v3196_v12 = vld [vmem:[#allocation4 + $0x28] sm:$0xff] }
 0x8f2   :  { %3094 = vst.msk [vmem:[#allocation4 + $0x30] sm:$0xff] %vm1255_vm2, %v2925_v26 }
 0x8f3   :  { %2864 = vst.msk [vmem:[#allocation3 + $0x80] sm:$0xff] %vm75_vm0, %v2832_v34 }
 0x8f6   :  { %3028 = vperm.xlu1 %4034, %v3023_v42   ;;  %4036 = vset.pattern.permute.xlu2 %v4380_v7  ;;  %v2799_v42 = vperm.slane %v2575_v57, 0 }
 0x8f7   :  { %3086 = vperm.xlu0 %4041, %v3075_v41  }
 0x8f8   :  { %v2938_v61 = vpop.permute.xlu1 %2937 }
 0x8f9   :  { %3096 = vst.msk [vmem:[#allocation4 + $0x40] sm:$0xff] %vm1255_vm2, %v2938_v61 }
 0x8fe   :  { %3041 = vperm.xlu1 %4034, %v3036_v24   ;;  %3054 = vperm.xlu2 %4036, %v3049_v53   ;;  %v3197_v24 = vld [vmem:[#allocation4 + $0x30] sm:$0xff] }
 0x8ff   :  { %4044 = vset.pattern.permute.xlu0 %v4278_v3 }
 0x900   :  { %v2951_v23 = vpop.permute.xlu1 %2950  ;;  %v2705_v43 = vpop.permute.xlu2 %2704  ;;  %v3262_v45 = vld [vmem:[#allocation4 + $0x40] sm:$0xff] }
 0x901   :  { %v2957_v16 = vpop.permute.xlu0 %2956  ;;  %3098 = vst.msk [vmem:[#allocation4 + $0x50] sm:$0xff] %vm1255_vm2, %v2951_v23  ;;  %v2835_v37 = vmul.f32 %v2793_v5, %v2705_v43  ;;  %3276 = vperm.xlu0 %4044, %v3262_v45  }
 0x902   :  { %3099 = vst.msk [vmem:[#allocation4 + $0x58] sm:$0xff] %vm1255_vm2, %v2957_v16  ;;  %v3128_v16 = vld [vmem:[#allocation4] sm:$0xff] }
 0x903   :  { %2867 = vst.msk [vmem:[#allocation3 + $0x98] sm:$0xff] %vm75_vm0, %v2835_v37 }
 0x906   :  { %4037 = vset.pattern.permute.xlu1 %v4455_v1  ;;  %2989 = vperm.xlu2 %4036, %v2984_v38  }
 0x908   :  { %v2718_v14 = vpop.permute.xlu2 %2717  ;;  %v3264_v63 = vld [vmem:[#allocation4 + $0x50] sm:$0xff] }
 0x909   :  { %v2837_v58 = vmul.f32 %v2794_v31, %v2718_v14  ;;  %3147 = vperm.xlu0 %4044, %v3129_v33   ;;  %v3265_v61 = vld [vmem:[#allocation4 + $0x58] sm:$0xff] }
 0x90b   :  { %2869 = vst.msk [vmem:[#allocation3 + $0xa8] sm:$0xff] %vm75_vm0, %v2837_v58 }
 0x90e   :  { %3060 = vperm.xlu1 %4037, %v3049_v53   ;;  %4039 = vset.pattern.permute.xlu2 %v4455_v1  ;;  %v3130_v53 = vld [vmem:[#allocation4 + $0x10] sm:$0xff] }
 0x910   :  { %v2970_v54 = vpop.permute.xlu1 %2969 }
 0x911   :  { %3101 = vst.msk [vmem:[#allocation4 + $0x68] sm:$0xff] %vm1255_vm2, %v2970_v54  ;;  %v2699_v28 = vpop.permute.xlu0 %2698  ;;  %3343 = vperm.xlu0 %4044, %v3329_v52   ;;  %v3331_v54 = vld [vmem:[#allocation4 + $0x70] sm:$0xff] }
 0x912   :  { %v2834_v0 = vmul.f32 %v2793_v5, %v2699_v28 }
 0x914   :  { %2866 = vst.msk [vmem:[#allocation3 + $0x90] sm:$0xff] %vm75_vm0, %v2834_v0 }
 0x916   :  { %2995 = vperm.xlu1 %4037, %v2984_v38   ;;  %3008 = vperm.xlu2 %4039, %v2997_v30  }
 0x918   :  { %v2983_v32 = vpop.permute.xlu1 %2982  ;;  %v2738_v51 = vpop.permute.xlu2 %2737  ;;  %v3330_v37 = vld [vmem:[#allocation4 + $0x68] sm:$0xff] }
 0x919   :  { %3103 = vst.msk [vmem:[#allocation4 + $0x78] sm:$0xff] %vm1255_vm2, %v2983_v32  ;;  %v2840_v1 = vmul.f32 %v5616_v18, %v2738_v51 }
 0x91b   :  { %2872 = vst.msk [vmem:[#allocation3 + $0xc0] sm:$0xff] %vm75_vm0, %v2840_v1 }
 0x91e   :  { %4040 = vset.pattern.permute.xlu1 %v4380_v7  ;;  %3073 = vperm.xlu2 %4039, %v3062_v60   ;;  %v3195_v7 = vld [vmem:[#allocation4 + $0x20] sm:$0xff] }
 0x920   :  { %v2692_v29 = vpop.permute.xlu1 %2691  ;;  %v2751_v40 = vpop.permute.xlu2 %2750  ;;  %v3332_v10 = vld [vmem:[#allocation4 + $0x78] sm:$0xff] }
 0x921   :  { %v2731_v15 = vpop.permute.xlu0 %2730  ;;  %v2833_v62 = vmul.f32 %v2792_v55, %v2692_v29  ;;  %v2842_v56 = vmul.f32 %v5625_v17, %v2751_v40  ;;  %3358 = vperm.xlu0 %4044, %v3332_v10  }
 0x922   :  { %v2839_v4 = vmul.f32 %v2795_v35, %v2731_v15 }
 0x923   :  { %2865 = vst.msk [vmem:[#allocation3 + $0x88] sm:$0xff] %vm75_vm0, %v2833_v62 }
 0x924   :  { %2871 = vst.msk [vmem:[#allocation3 + $0xb8] sm:$0xff] %vm75_vm0, %v2839_v4 }
 0x925   :  { %2874 = vst.msk [vmem:[#allocation3 + $0xd0] sm:$0xff] %vm75_vm0, %v2842_v56 }
 0x926   :  { %3067 = vperm.xlu1 %4040, %v3062_v60   ;;  %4042 = vset.pattern.permute.xlu2 %v4278_v3 }
 0x927   :  { %3209 = vperm.xlu2 %4042, %v3195_v7  }
 0x92e   :  { %3080 = vperm.xlu1 %4040, %v3075_v41  }
 0x92f   :  { %3219 = vperm.xlu2 %4042, %v3197_v24   ;;  %v3121_v24 = vld [vmem:[#allocation2 + $0x8] sm:$0xff] }
 0x930   :  { %v2712_v44 = vpop.permute.xlu1 %2711  ;;  %v2770_v11 = vpop.permute.xlu2 %2769 }
 0x931   :  { %v2764_v21 = vpop.permute.xlu0 %2763  ;;  %v2836_v49 = vmul.f32 %v2794_v31, %v2712_v44  ;;  %v2845_v22 = vmul.f32 %v2798_v6, %v2770_v11  ;;  %v3131_v31 = vld [vmem:[#allocation4 + $0x18] sm:$0xff]  ;;  %v3125_v44 = vld [vmem:[#allocation3 + $0x8] sm:$0xff] }
 0x932   :  { %v2844_v30 = vmul.f32 %v2798_v6, %v2764_v21  ;;  %v3120_v6 = vld [vmem:[#allocation2] sm:$0xff]  ;;  %v3133_v21 = vmul.f32 0.0, %v3121_v24 }
 0x933   :  { %2868 = vst.msk [vmem:[#allocation3 + $0xa0] sm:$0xff] %vm75_vm0, %v2836_v49  ;;  %v3132_v57 = vmul.f32 0.0, %v3120_v6 }
 0x934   :  { %2876 = vst.msk [vmem:[#allocation3 + $0xe0] sm:$0xff] %vm75_vm0, %v2844_v30  ;;  %v3124_v30 = vld [vmem:[#allocation3] sm:$0xff] }
 0x935   :  { %2877 = vst.msk [vmem:[#allocation3 + $0xe8] sm:$0xff] %vm75_vm0, %v2845_v22 }
 0x936   :  { %4043 = vset.pattern.permute.xlu1 %v4278_v3 }
 0x937   :  { %3214 = vperm.xlu1 %4043, %v3196_v12   ;;  %3281 = vperm.xlu2 %4042, %v3263_v13   ;;  %v5666_v12 = vadd.f32 %v3133_v21, %v3125_v44  ;;  %v5668_v13 = vadd.f32 %v3132_v57, %v3124_v30  ;;  %v3257_v30 = vld [vmem:[#allocation2 + $0x58] sm:$0xff] }
 0x938   :  { %v2725_v55 = vpop.permute.xlu1 %2724  ;;  %v2783_v25 = vpop.permute.xlu2 %2782 }
 0x939   :  { %v3016_v26 = vpop.permute.xlu0 %3015  ;;  %v2838_v34 = vmul.f32 %v2795_v35, %v2725_v55  ;;  %v2847_v41 = vmul.f32 %v2799_v42, %v2783_v25  ;;  %v3192_v55 = vld [vmem:[#allocation3 + $0x28] sm:$0xff] }
 0x93a   :  { %3108 = vst.msk [vmem:[#allocation4 + $0xa0] sm:$0xff] %vm1255_vm2, %v3016_v26  ;;  %v3187_v26 = vld [vmem:[#allocation2 + $0x20] sm:$0xff] }
 0x93b   :  { %2870 = vst.msk [vmem:[#allocation3 + $0xb0] sm:$0xff] %vm75_vm0, %v2838_v34  ;;  %v3199_v34 = vmul.f32 %v3187_v26, %v5668_v13  ;;  %v3256_v26 = vld [vmem:[#allocation2 + $0x50] sm:$0xff] }
 0x93c   :  { %2879 = vst.msk [vmem:[#allocation3 + $0xf8] sm:$0xff] %vm75_vm0, %v2847_v41 }
 0x93f   :  { %3224 = vperm.xlu1 %4043, %v3198_v2   ;;  %3291 = vperm.xlu2 %4042, %v3265_v61  }
 0x940   :  { %v3022_v3 = vpop.permute.xlu2 %3021 }
 0x941   :  { %3109 = vst.msk [vmem:[#allocation4 + $0xa8] sm:$0xff] %vm1255_vm2, %v3022_v3  ;;  %v3463_v14 = vld [vmem:[#allocation4 + $0xa0] sm:$0xff]  ;;  %v3122_v3 = vld [vmem:[#allocation2 + $0x10] sm:$0xff] }
 0x947   :  { %3286 = vperm.xlu1 %4043, %v3264_v63   ;;  %3152 = vperm.xlu2 %4042, %v3130_v53   ;;  %v3123_v53 = vld [vmem:[#allocation2 + $0x18] sm:$0xff] }
 0x948   :  { %v2744_v5 = vpop.permute.xlu1 %2743  ;;  %v3035_v23 = vpop.permute.xlu2 %3034 }
 0x949   :  { %v3048_v43 = vpop.permute.xlu0 %3047  ;;  %v2841_v45 = vmul.f32 %v5616_v18, %v2744_v5  ;;  %3111 = vst.msk [vmem:[#allocation4 + $0xb8] sm:$0xff] %vm1255_vm2, %v3035_v23  ;;  %v3464_v18 = vld [vmem:[#allocation4 + $0xa8] sm:$0xff]  ;;  %v3191_v5 = vld [vmem:[#allocation3 + $0x20] sm:$0xff]  ;;  %v3126_v23 = vld [vmem:[#allocation3 + $0x10] sm:$0xff] }
 0x94a   :  { %3113 = vst.msk [vmem:[#allocation4 + $0xc8] sm:$0xff] %vm1255_vm2, %v3048_v43  ;;  %v3255_v43 = vld [vmem:[#allocation2 + $0x48] sm:$0xff] }
 0x94b   :  { %2873 = vst.msk [vmem:[#allocation3 + $0xc8] sm:$0xff] %vm75_vm0, %v2841_v45  ;;  %v3203_v45 = vadd.f32 %v3199_v34, %v3191_v5 }
 0x94f   :  { %3142 = vperm.xlu1 %4043, %v3128_v16   ;;  %3348 = vperm.xlu2 %4042, %v3330_v37   ;;  %v3134_v16 = vmul.f32 0.0, %v3122_v3  ;;  %v3261_v3 = vld [vmem:[#allocation3 + $0x58] sm:$0xff] }
 0x950   :  { %v2757_v8 = vpop.permute.xlu1 %2756  ;;  %v3466_v52 = vld [vmem:[#allocation4 + $0xb8] sm:$0xff] }
 0x951   :  { %v2843_v38 = vmul.f32 %v5625_v17, %v2757_v8  ;;  %v3531_v35 = vld [vmem:[#allocation4 + $0xc8] sm:$0xff]  ;;  %v3127_v8 = vld [vmem:[#allocation3 + $0x18] sm:$0xff] }
 0x953   :  { %2875 = vst.msk [vmem:[#allocation3 + $0xd8] sm:$0xff] %vm75_vm0, %v2843_v38  ;;  %v5673_v38 = vadd.f32 %v3134_v16, %v3126_v23 }
 0x957   :  { %3157 = vperm.xlu1 %4043, %v3131_v31   ;;  %3477 = vperm.xlu2 %4042, %v3463_v14   ;;  %v3135_v31 = vmul.f32 0.0, %v3123_v53  ;;  %v3254_v14 = vld [vmem:[#allocation2 + $0x40] sm:$0xff] }
 0x958   :  { %v3055_v33 = vpop.permute.xlu2 %3054 }
 0x959   :  { %v3003_v58 = vpop.permute.xlu0 %3002  ;;  %3114 = vst.msk [vmem:[#allocation4 + $0xd0] sm:$0xff] %vm1255_vm2, %v3055_v33  ;;  %v3258_v33 = vld [vmem:[#allocation3 + $0x40] sm:$0xff] }
 0x95a   :  { %3106 = vst.msk [vmem:[#allocation4 + $0x90] sm:$0xff] %vm1255_vm2, %v3003_v58  ;;  %v3259_v58 = vld [vmem:[#allocation3 + $0x48] sm:$0xff] }
 0x95f   :  { %3353 = vperm.xlu1 %4043, %v3331_v54   ;;  %3492 = vperm.xlu2 %4042, %v3466_v52   ;;  %v3266_v54 = vmul.f32 %v3254_v14, %v3203_v45 }
 0x960   :  { %v2777_v28 = vpop.permute.xlu1 %2776  ;;  %v2990_v0 = vpop.permute.xlu2 %2989  ;;  %v3532_v32 = vld [vmem:[#allocation4 + $0xd0] sm:$0xff] }
 0x961   :  { %v2846_v47 = vmul.f32 %v2799_v42, %v2777_v28  ;;  %3104 = vst.msk [vmem:[#allocation4 + $0x80] sm:$0xff] %vm1255_vm2, %v2990_v0  ;;  %v3398_v7 = vld [vmem:[#allocation4 + $0x90] sm:$0xff]  ;;  %v3188_v42 = vld [vmem:[#allocation2 + $0x28] sm:$0xff]  ;;  %v5677_v0 = vadd.f32 %v3135_v31, %v3127_v8 }
 0x962   :  { %v3200_v25 = vmul.f32 %v3188_v42, %v5666_v12 }
 0x963   :  { %2878 = vst.msk [vmem:[#allocation3 + $0xf0] sm:$0xff] %vm75_vm0, %v2846_v47 }
 0x964   :  { %v3204_v41 = vadd.f32 %v3200_v25, %v3192_v55 }
 0x966   :  { %v3267_v37 = vmul.f32 %v3255_v43, %v3204_v41 }
 0x967   :  { %3482 = vperm.xlu1 %4043, %v3464_v18   ;;  %3554 = vperm.xlu2 %4042, %v3532_v32  }
 0x968   :  { %v3029_v51 = vpop.permute.xlu1 %3028  ;;  %v3396_v10 = vld [vmem:[#allocation4 + $0x80] sm:$0xff]  ;;  %v5675_v28 = vadd.f32 %v3267_v37, %v3259_v58 }
 0x969   :  { %v3087_v1 = vpop.permute.xlu0 %3086  ;;  %3110 = vst.msk [vmem:[#allocation4 + $0xb0] sm:$0xff] %vm1255_vm2, %v3029_v51  ;;  %v3189_v51 = vld [vmem:[#allocation2 + $0x30] sm:$0xff] }
 0x96a   :  { %3119 = vst.msk [vmem:[#allocation4 + $0xf8] sm:$0xff] %vm1255_vm2, %v3087_v1 }
 0x970   :  { %v3042_v27 = vpop.permute.xlu1 %3041  ;;  %v3009_v60 = vpop.permute.xlu2 %3008  ;;  %v3465_v9 = vld [vmem:[#allocation4 + $0xb0] sm:$0xff] }
 0x971   :  { %3112 = vst.msk [vmem:[#allocation4 + $0xc0] sm:$0xff] %vm1255_vm2, %v3042_v27  ;;  %3487 = vperm.xlu0 %4044, %v3465_v9   ;;  %v3600_v47 = vld [vmem:[#allocation4 + $0xf8] sm:$0xff]  ;;  %v3270_v27 = vadd.f32 %v3266_v54, %v3258_v33 }
 0x972   :  { %3107 = vst.msk [vmem:[#allocation4 + $0x98] sm:$0xff] %vm1255_vm2, %v3009_v60  ;;  %v3201_v60 = vmul.f32 %v3189_v51, %v5673_v38 }
 0x973   :  { %v3277_v32 = vpop.permute.xlu0 %3276 }
 0x978   :  { %v3074_v17 = vpop.permute.xlu2 %3073  ;;  %v3530_v29 = vld [vmem:[#allocation4 + $0xc0] sm:$0xff] }
 0x979   :  { %3117 = vst.msk [vmem:[#allocation4 + $0xe8] sm:$0xff] %vm1255_vm2, %v3074_v17  ;;  %3549 = vperm.xlu0 %4044, %v3531_v35   ;;  %3544 = vperm.xlu1 %4043, %v3530_v29   ;;  %v3399_v56 = vld [vmem:[#allocation4 + $0x98] sm:$0xff] }
 0x97a   :  { %v3190_v35 = vld [vmem:[#allocation2 + $0x38] sm:$0xff] }
 0x97b   :  { %v3194_v29 = vld [vmem:[#allocation3 + $0x38] sm:$0xff] }
 0x980   :  { %v3061_v40 = vpop.permute.xlu1 %3060  ;;  %v3598_v22 = vld [vmem:[#allocation4 + $0xe8] sm:$0xff] }
 0x981   :  { %3115 = vst.msk [vmem:[#allocation4 + $0xd8] sm:$0xff] %vm1255_vm2, %v3061_v40  ;;  %3410 = vperm.xlu0 %4044, %v3396_v10   ;;  %v3210_v4 = vpop.permute.xlu2 %3209  ;;  %v3294_v10 = vmul.f32 %v3277_v32, %v3270_v27 }
 0x982   :  { %v3227_v52 = vmul.f32 %v3210_v4, %v3203_v45  ;;  %v3193_v4 = vld [vmem:[#allocation3 + $0x30] sm:$0xff] }
 0x983   :  { %v3298_v21 = vsel %vm75_vm0, %v3294_v10, 0.0  ;;  %v3260_v45 = vld [vmem:[#allocation3 + $0x50] sm:$0xff] }
 0x988   :  { %v2996_v15 = vpop.permute.xlu1 %2995  ;;  %v3533_v62 = vld [vmem:[#allocation4 + $0xd8] sm:$0xff] }
 0x989   :  { %3105 = vst.msk [vmem:[#allocation4 + $0x88] sm:$0xff] %vm1255_vm2, %v2996_v15  ;;  %3559 = vperm.xlu1 %4043, %v3533_v62   ;;  %3425 = vperm.xlu0 %4044, %v3399_v56   ;;  %v5663_v11 = vpop.permute.xlu2 %3219  ;;  %v3231_v15 = vsel %vm75_vm0, %v3227_v52, 0.0  ;;  %v3202_v62 = vmul.f32 %v3190_v35, %v5677_v0  ;;  %v3952_v35 = vmul.f32 -1.442695, %v5337_v36 }
 0x98b   :  { %v3206_v6 = vadd.f32 %v3202_v62, %v3194_v29  ;;  %4240 = vpow2.f32 %v3952_v35 }
 0x98d   :  { %v3269_v55 = vmul.f32 %v3257_v30, %v3206_v6 }
 0x98f   :  { %v5689_v23 = vadd.f32 %v3269_v55, %v3261_v3 }
 0x990   :  { %v3397_v20 = vld [vmem:[#allocation4 + $0x88] sm:$0xff] }
 0x991   :  { %3420 = vperm.xlu1 %4043, %v3398_v7   ;;  %3415 = vperm.xlu2 %4042, %v3397_v20   ;;  %v3282_v63 = vpop.permute.xlu2 %3281  ;;  %v3205_v20 = vadd.f32 %v3201_v60, %v3193_v4  ;;  %v3326_v60 = vld [vmem:[#allocation3 + $0x68] sm:$0xff]  ;;  %v4241_v3 = vpop.eup %4240 }
 0x992   :  { %v3295_v9 = vmul.f32 %v3282_v63, %v5675_v28 }
 0x994   :  { %v3299_v24 = vsel %vm75_vm0, %v3295_v9, 0.0 }
 0x998   :  { %v3068_v49 = vpop.permute.xlu1 %3067 }
 0x999   :  { %3116 = vst.msk [vmem:[#allocation4 + $0xe0] sm:$0xff] %vm1255_vm2, %v3068_v49  ;;  %3616 = vperm.xlu1 %4043, %v3598_v22   ;;  %v3292_v40 = vpop.permute.xlu2 %3291  ;;  %v3229_v49 = vmul.f32 %v5663_v11, %v3205_v20  ;;  %v3300_v22 = vadd.f32 %v3299_v24, %v3298_v21  ;;  %v3148_v11 = vpop.permute.xlu0 %3147 }
 0x99a   :  { %v3297_v16 = vmul.f32 %v3292_v40, %v5689_v23 }
 0x99b   :  { %v3240_v34 = vsel %vm75_vm0, %v3229_v49, 0.0 }
 0x99c   :  { %v3308_v52 = vsel %vm75_vm0, %v3297_v16, 0.0 }
 0x9a0   :  { %v3081_v2 = vpop.permute.xlu1 %3080  ;;  %v3597_v61 = vld [vmem:[#allocation4 + $0xe0] sm:$0xff] }
 0x9a1   :  { %3118 = vst.msk [vmem:[#allocation4 + $0xf0] sm:$0xff] %vm1255_vm2, %v3081_v2  ;;  %3611 = vperm.xlu2 %4042, %v3597_v61   ;;  %v3268_v2 = vmul.f32 %v3256_v26, %v3205_v20  ;;  %v3301_v61 = vrot.slane %v3300_v22, 4  ;;  %v3153_v63 = vpop.permute.xlu2 %3152  ;;  %v3344_v20 = vpop.permute.xlu0 %3343 }
 0x9a3   :  { %v5692_v37 = vadd.f32 %v3268_v2, %v3260_v45  ;;  %v3302_v8 = vadd.f32 %v3301_v61, %v3300_v22 }
 0x9a5   :  { %v3303_v32 = vrot.slane %v3302_v8, 2 }
 0x9a7   :  { %v3304_v24 = vadd.f32 %v3303_v32, %v3302_v8 }
 0x9a8   :  { %v3599_v18 = vld [vmem:[#allocation4 + $0xf0] sm:$0xff] }
 0x9a9   :  { %v3215_v1 = vpop.permute.xlu1 %3214  ;;  %3626 = vperm.xlu2 %4042, %v3600_v47   ;;  %3621 = vperm.xlu0 %4044, %v3599_v18   ;;  %v3321_v18 = vld [vmem:[#allocation2 + $0x60] sm:$0xff]  ;;  %v3349_v10 = vpop.permute.xlu2 %3348 }
 0x9aa   :  { %v3228_v17 = vmul.f32 %v3215_v1, %v3204_v41  ;;  %v3322_v1 = vld [vmem:[#allocation2 + $0x68] sm:$0xff]  ;;  %v3333_v29 = vmul.f32 %v3321_v18, %v3270_v27  ;;  %v3359_v32 = vpop.permute.xlu0 %3358 }
 0x9ab   :  { %v3334_v40 = vmul.f32 %v3322_v1, %v5675_v28  ;;  %v3392_v1 = vld [vmem:[#allocation3 + $0x80] sm:$0xff] }
 0x9ac   :  { %v3232_v56 = vsel %vm75_vm0, %v3228_v17, 0.0 }
 0x9ad   :  { %v3233_v7 = vadd.f32 %v3232_v56, %v3231_v15  ;;  %v3161_v56 = vmul.f32 %v3148_v11, %v5666_v12  ;;  %v3338_v4 = vadd.f32 %v3334_v40, %v3326_v60 }
 0x9af   :  { %v3234_v44 = vrot.slane %v3233_v7, 4  ;;  %v3362_v30 = vmul.f32 %v3349_v10, %v3338_v4 }
 0x9b1   :  { %v3235_v57 = vadd.f32 %v3234_v44, %v3233_v7  ;;  %v3225_v42 = vpop.permute.xlu1 %3224  ;;  %v3325_v7 = vld [vmem:[#allocation3 + $0x60] sm:$0xff] }
 0x9b2   :  { %v3230_v25 = vmul.f32 %v3225_v42, %v3206_v6  ;;  %v3337_v22 = vadd.f32 %v3333_v29, %v3325_v7  ;;  %v3165_v42 = vsel %vm75_vm0, %v3161_v56, 0.0 }
 0x9b3   :  { %v3236_v53 = vrot.slane %v3235_v57, 2 }
 0x9b4   :  { %v3241_v41 = vsel %vm75_vm0, %v3230_v25, 0.0  ;;  %v3361_v55 = vmul.f32 %v3344_v20, %v3337_v22  ;;  %v3305_v25 = vrot.slane %v3304_v24, 1 }
 0x9b5   :  { %v3242_v5 = vadd.f32 %v3241_v41, %v3240_v34  ;;  %v3237_v31 = vadd.f32 %v3236_v53, %v3235_v57  ;;  %v3366_v41 = vsel %vm75_vm0, %v3362_v30, 0.0  ;;  %v3162_v53 = vmul.f32 %v3153_v63, %v5673_v38  ;;  %v3456_v30 = vld [vmem:[#allocation2 + $0xa8] sm:$0xff] }
 0x9b7   :  { %v3243_v43 = vrot.slane %v3242_v5, 4  ;;  %v3238_v51 = vrot.slane %v3237_v31, 1  ;;  %v3173_v18 = vsel %vm75_vm0, %v3162_v53, 0.0 }
 0x9b9   :  { %v3244_v14 = vadd.f32 %v3243_v43, %v3242_v5  ;;  %v3287_v33 = vpop.permute.xlu1 %3286  ;;  %v3239_v6 = vadd.f32 %v3238_v51, %v3237_v31  ;;  %v3306_v5 = vadd.f32 %v3305_v25, %v3304_v24  ;;  %v5709_v31 = vadd.f32 1.0, %v4241_v3  ;;  %v3391_v3 = vld [vmem:[#allocation2 + $0x98] sm:$0xff] }
 0x9ba   :  { %v3296_v58 = vmul.f32 %v3287_v33, %v5692_v37  ;;  %v3328_v33 = vld [vmem:[#allocation3 + $0x78] sm:$0xff] }
 0x9bb   :  { %v3245_v54 = vrot.slane %v3244_v14, 2  ;;  %4242 = vrcp.f32 %v5709_v31  ;;  %vm3708_vm9 = vweird.f32 %v5709_v31 }
 0x9bc   :  { %v3307_v47 = vsel %vm75_vm0, %v3296_v58, 0.0  ;;  %v3323_v58 = vld [vmem:[#allocation2 + $0x70] sm:$0xff] }
 0x9bd   :  { %v3246_v9 = vadd.f32 %v3245_v54, %v3244_v14  ;;  %v3309_v17 = vadd.f32 %v3308_v52, %v3307_v47  ;;  %v3324_v14 = vld [vmem:[#allocation2 + $0x78] sm:$0xff]  ;;  %v3388_v52 = vld [vmem:[#allocation2 + $0x80] sm:$0xff]  ;;  %v3335_v38 = vmul.f32 %v3323_v58, %v5692_v37  ;;  %v3390_v58 = vld [vmem:[#allocation2 + $0x90] sm:$0xff] }
 0x9be   :  { %v3336_v47 = vmul.f32 %v3324_v14, %v5689_v23  ;;  %v3400_v35 = vmul.f32 %v3388_v52, %v3337_v22  ;;  %v3327_v23 = vld [vmem:[#allocation3 + $0x70] sm:$0xff]  ;;  %v3931_v14 = vld [vmem:[%s5882_s13 + $0x68] sm:$0xff] }
 0x9bf   :  { %v3247_v15 = vrot.slane %v3246_v9, 1  ;;  %v3310_v62 = vrot.slane %v3309_v17, 4  ;;  %v3394_v52 = vld [vmem:[#allocation3 + $0x90] sm:$0xff] }
 0x9c0   :  { %v3340_v29 = vadd.f32 %v3336_v47, %v3328_v33  ;;  %v5718_v37 = vadd.f32 %v3400_v35, %v3392_v1 }
 0x9c1   :  { %v3248_v44 = vadd.f32 %v3247_v15, %v3246_v9  ;;  %v3311_v21 = vadd.f32 %v3310_v62, %v3309_v17  ;;  %v3143_v49 = vpop.permute.xlu1 %3142  ;;  %v3393_v17 = vld [vmem:[#allocation3 + $0x88] sm:$0xff]  ;;  %v3339_v62 = vadd.f32 %v3335_v38, %v3327_v23 }
 0x9c2   :  { %v3160_v27 = vmul.f32 %v3143_v49, %v5668_v13  ;;  %v3365_v13 = vsel %vm75_vm0, %v3361_v55, 0.0  ;;  %v3364_v15 = vmul.f32 %v3359_v32, %v3340_v29  ;;  %v3459_v49 = vld [vmem:[#allocation3 + $0xa0] sm:$0xff] }
 0x9c3   :  { %v3251_v28 = vsel %vm1356_vm4, %v3248_v44, %v3239_v6  ;;  %v3312_v57 = vrot.slane %v3311_v21, 2  ;;  %v3367_v11 = vadd.f32 %v3366_v41, %v3365_v13  ;;  %v3395_v13 = vld [vmem:[#allocation3 + $0x98] sm:$0xff] }
 0x9c4   :  { %3253 = vst.msk [vmem:[#allocation5 + $0x2] sm:$0x3] %vm1359_vm5, %v3251_v28  ;;  %v3164_v12 = vsel %vm75_vm0, %v3160_v27, 0.0 }
 0x9c5   :  { %v3313_v26 = vadd.f32 %v3312_v57, %v3311_v21  ;;  %v3166_v34 = vadd.f32 %v3165_v42, %v3164_v12  ;;  %v3368_v51 = vrot.slane %v3367_v11, 4  ;;  %v3455_v21 = vld [vmem:[#allocation2 + $0xa0] sm:$0xff]  ;;  %v5726_v42 = vpop.eup %4242  ;;  %v3478_v12 = vpop.permute.xlu2 %3477 }
 0x9c6   :  { %v3467_v27 = vmul.f32 %v3455_v21, %v5718_v37  ;;  %v3461_v21 = vld [vmem:[#allocation3 + $0xb0] sm:$0xff]  ;;  %vm3709_vm2 = vweird.f32 %v5726_v42 }
 0x9c7   :  { %v3314_v2 = vrot.slane %v3313_v26, 1  ;;  %v3167_v61 = vrot.slane %v3166_v34, 4  ;;  %v3369_v7 = vadd.f32 %v3368_v51, %v3367_v11  ;;  %v3460_v11 = vld [vmem:[#allocation3 + $0xa8] sm:$0xff]  ;;  %v3930_v51 = vld [vmem:[%s5882_s13 + $0x60] sm:$0xff]  ;;  %vm5789_vm14 = vmor %vm3708_vm9, %vm3709_vm2 }
 0x9c8   :  { %v5728_v41 = vadd.f32 %v3467_v27, %v3459_v49  ;;  %v3927_v27 = vld [vmem:[%s5882_s13 + $0x48] sm:$0xff] }
 0x9c9   :  { %v3315_v43 = vadd.f32 %v3314_v2, %v3313_v26  ;;  %v3168_v45 = vadd.f32 %v3167_v61, %v3166_v34  ;;  %v3158_v16 = vpop.permute.xlu1 %3157  ;;  %v3370_v55 = vrot.slane %v3369_v7, 2  ;;  %v3933_v2 = vld [vmem:[%s5882_s13 + $0x78] sm:$0xff]  ;;  %v3932_v61 = vld [vmem:[%s5882_s13 + $0x70] sm:$0xff] }
 0x9ca   :  { %v3163_v8 = vmul.f32 %v3158_v16, %v5677_v0  ;;  %v3389_v0 = vld [vmem:[#allocation2 + $0x88] sm:$0xff]  ;;  %3751 = vmatpush.msra.mxu2 %v3933_v2  ;;  %v3495_v16 = vmul.f32 %v3478_v12, %v5728_v41 }
 0x9cb   :  { %v3318_v54 = vsel %vm1356_vm4, %v3315_v43, %v3306_v5  ;;  %v3169_v60 = vrot.slane %v3168_v45, 2  ;;  %v3401_v40 = vmul.f32 %v3389_v0, %v3338_v4  ;;  %v3375_v4 = vsel %vm75_vm0, %v3364_v15, 0.0  ;;  %v3462_v15 = vld [vmem:[#allocation3 + $0xb8] sm:$0xff] }
 0x9cc   :  { %3320 = vst.msk [vmem:[#allocation5 + $0x4] sm:$0x3] %vm1359_vm5, %v3318_v54  ;;  %v3174_v63 = vsel %vm75_vm0, %v3163_v8, 0.0  ;;  %v3704_v43 = vmul.f32 %v5726_v42, %v5709_v31  ;;  %v3371_v33 = vadd.f32 %v3370_v55, %v3369_v7  ;;  %3752 = vmatpush.msra.mxu2 %v3932_v61 }
 0x9cd   :  { %v3175_v9 = vadd.f32 %v3174_v63, %v3173_v18  ;;  %v5720_v56 = vadd.f32 %v3401_v40, %v3393_v17  ;;  %v3170_v20 = vadd.f32 %v3169_v60, %v3168_v45  ;;  %v3403_v45 = vmul.f32 %v3391_v3, %v3340_v29  ;;  %v3929_v29 = vld [vmem:[%s5882_s13 + $0x58] sm:$0xff] }
 0x9ce   :  { %v3402_v63 = vmul.f32 %v3390_v58, %v3339_v62  ;;  %3753 = vmatpush.msra.mxu2 %v3931_v14  ;;  %v3705_v40 = vsub.f32 1.0, %v3704_v43  ;;  %v3372_v23 = vrot.slane %v3371_v33, 1  ;;  %v3714_v43 = vand.u32 2147483648, %v5709_v31 }
 0x9cf   :  { %v3176_v10 = vrot.slane %v3175_v9, 4  ;;  %v3468_v57 = vmul.f32 %v3456_v30, %v5720_v56  ;;  %v3171_v25 = vrot.slane %v3170_v20, 1  ;;  %v5744_v32 = vadd.f32 %v3403_v45, %v3395_v13 }
 0x9d0   :  { %v5752_v17 = vadd.f32 %v3402_v63, %v3394_v52  ;;  %3754 = vmatpush.msra.mxu2 %v3930_v51  ;;  %v3527_v52 = vld [vmem:[#allocation3 + $0xc8] sm:$0xff]  ;;  %v3526_v51 = vld [vmem:[#allocation3 + $0xc0] sm:$0xff] }
 0x9d1   :  { %v3177_v24 = vadd.f32 %v3176_v10, %v3175_v9  ;;  %v3354_v6 = vpop.permute.xlu1 %3353  ;;  %v5739_v8 = vadd.f32 %v3468_v57, %v3460_v11  ;;  %v3172_v54 = vadd.f32 %v3171_v25, %v3170_v20  ;;  %v3499_v9 = vsel %vm75_vm0, %v3495_v16, 0.0  ;;  %v3458_v10 = vld [vmem:[#allocation2 + $0xb8] sm:$0xff]  ;;  %v3657_v11 = vld [vmem:[#allocation5 + $0x2] sm:$0x3] }
 0x9d2   :  { %v3363_v44 = vmul.f32 %v3354_v6, %v3339_v62  ;;  %v3470_v20 = vmul.f32 %v3458_v10, %v5744_v32  ;;  %v3493_v6 = vpop.permute.xlu2 %3492  ;;  %3755 = vmatpush.msra.mxu2 %v3929_v29  ;;  %v3373_v57 = vadd.f32 %v3372_v23, %v3371_v33 }
 0x9d3   :  { %v3178_v22 = vrot.slane %v3177_v24, 2  ;;  %v3658_v63 = vld [vmem:[#allocation5 + $0x4] sm:$0x3] }
 0x9d4   :  { %v3374_v28 = vsel %vm75_vm0, %v3363_v44, 0.0  ;;  %v3457_v44 = vld [vmem:[#allocation2 + $0xb0] sm:$0xff]  ;;  %v5763_v30 = vadd.f32 %v3470_v20, %v3462_v15 }
 0x9d5   :  { %v3179_v26 = vadd.f32 %v3178_v22, %v3177_v24  ;;  %v3376_v34 = vadd.f32 %v3375_v4, %v3374_v28  ;;  %v3928_v24 = vld [vmem:[%s5882_s13 + $0x50] sm:$0xff]  ;;  %v3469_v4 = vmul.f32 %v3457_v44, %v5752_v17  ;;  %v3706_v28 = vmul.f32 %v5726_v42, %v3705_v40 }
 0x9d6   :  { %3756 = vmatpush.msra.mxu2 %v3928_v24  ;;  %v3498_v12 = vmul.f32 %v3493_v6, %v5763_v30 }
 0x9d7   :  { %v3180_v53 = vrot.slane %v3179_v26, 1  ;;  %v3377_v5 = vrot.slane %v3376_v34, 4  ;;  %v5771_v25 = vadd.f32 %v3469_v4, %v3461_v21  ;;  %v3707_v13 = vadd.f32 %v5726_v42, %v3706_v28 }
 0x9d8   :  { %3757 = vmatpush.msra.mxu2 %v3927_v27  ;;  %v3509_v45 = vsel %vm75_vm0, %v3498_v12, 0.0 }
 0x9d9   :  { %v3181_v47 = vadd.f32 %v3180_v53, %v3179_v26  ;;  %v3378_v18 = vadd.f32 %v3377_v5, %v3376_v34  ;;  %v3483_v38 = vpop.permute.xlu1 %3482  ;;  %v3926_v26 = vld [vmem:[%s5882_s13 + $0x40] sm:$0xff]  ;;  %v3712_v53 = vand.u32 2147483647, %v5709_v31 }
 0x9da   :  { %v3496_v0 = vmul.f32 %v3483_v38, %v5739_v8  ;;  %v3522_v5 = vld [vmem:[#allocation2 + $0xc0] sm:$0xff]  ;;  %3758 = vmatpush.msra.mxu2 %v3926_v26 }
 0x9db   :  { %v3184_v1 = vsel %vm1356_vm4, %v3181_v47, %v3172_v54  ;;  %v3379_v60 = vrot.slane %v3378_v18, 2  ;;  %v3534_v14 = vmul.f32 %v3522_v5, %v5728_v41  ;;  %v3523_v54 = vld [vmem:[#allocation2 + $0xc8] sm:$0xff]  ;;  %v3711_v41 = vsel %vm5789_vm14, %v5726_v42, %v3707_v13 }
 0x9dc   :  { %3186 = vst.msk [vmem:[#allocation5] sm:$0x3] %vm1359_vm5, %v3184_v1  ;;  %v3500_v35 = vsel %vm75_vm0, %v3496_v0, 0.0  ;;  %v3535_v38 = vmul.f32 %v3523_v54, %v5739_v8  ;;  %v3665_v0 = vrot.slane %v3657_v11, 6  ;;  %v5800_v1 = vld [vmem:[%s5881_s12 + $0x1] ss:$0 sm:$0xff] }
 0x9dd   :  { %v3380_v62 = vadd.f32 %v3379_v60, %v3378_v18  ;;  %v3501_v7 = vadd.f32 %v3500_v35, %v3499_v9  ;;  %v3715_v60 = vor.u32 1.1754944e-38, %v3714_v43  ;;  %v3555_v9 = vpop.permute.xlu2 %3554  ;;  %v5804_v29 = vadd.f32 %v3534_v14, %v3526_v51  ;;  %v3525_v14 = vld [vmem:[#allocation2 + $0xd8] sm:$0xff] }
 0x9de   :  { %v5802_v35 = vadd.f32 %v3535_v38, %v3527_v52  ;;  %vm3713_vm15 = vcmp.eq.f32.partialorder %v3712_v53, 8.507059e+37  ;;  %v3537_v52 = vmul.f32 %v3525_v14, %v5763_v30 }
 0x9df   :  { %v3381_v49 = vrot.slane %v3380_v62, 1  ;;  %v3502_v22 = vrot.slane %v3501_v7, 4 }
 0x9e1   :  { %v3382_v55 = vadd.f32 %v3381_v49, %v3380_v62  ;;  %v3503_v2 = vadd.f32 %v3502_v22, %v3501_v7  ;;  %v3668_v62 = vrot.slane %v3658_v63, 4  ;;  %v3716_v7 = vsel %vm3713_vm15, %v3715_v60, %v3711_v41 }
 0x9e2   :  { %v3691_v49 = vmul.f32 %v5800_v1, %v5320_v46  ;;  %v3733_v4 = vmul.f32 %v3716_v7, %v5337_v36  ;;  %v3590_v7 = vld [vmem:[#allocation2 + $0xe8] sm:$0xff] }
 0x9e3   :  { %v3385_v34 = vsel %vm1356_vm4, %v3382_v55, %v3373_v57  ;;  %v3488_v61 = vpop.permute.xlu0 %3487  ;;  %v3504_v33 = vrot.slane %v3503_v2, 2  ;;  %v3656_v47 = vld [vmem:[#allocation5] sm:$0x3] }
 0x9e4   :  { %3387 = vst.msk [vmem:[#allocation5 + $0x6] sm:$0x3] %vm1359_vm5, %v3385_v34  ;;  %v3497_v3 = vmul.f32 %v3488_v61, %v5771_v25  ;;  %v3682_v8 = vsel %vm1891_vm10, %v3656_v47, %v3665_v0 }
 0x9e5   :  { %v3505_v40 = vadd.f32 %v3504_v33, %v3503_v2  ;;  %v3683_v21 = vsel %vm1893_vm11, %v3682_v8, %v3668_v62  ;;  %v3524_v2 = vld [vmem:[#allocation2 + $0xd0] sm:$0xff]  ;;  %v3529_v33 = vld [vmem:[#allocation3 + $0xd8] sm:$0xff] }
 0x9e6   :  { %v3508_v16 = vsel %vm75_vm0, %v3497_v3, 0.0  ;;  %v3536_v46 = vmul.f32 %v3524_v2, %v5771_v25  ;;  %v3541_v47 = vadd.f32 %v3537_v52, %v3529_v33  ;;  %v3593_v2 = vld [vmem:[#allocation3 + $0xe0] sm:$0xff]  ;;  %v3592_v52 = vld [vmem:[#allocation2 + $0xf8] sm:$0xff] }
 0x9e7   :  { %v3510_v58 = vadd.f32 %v3509_v45, %v3508_v16  ;;  %v3506_v27 = vrot.slane %v3505_v40, 1  ;;  %v3528_v45 = vld [vmem:[#allocation3 + $0xd0] sm:$0xff] }
 0x9e9   :  { %v3511_v31 = vrot.slane %v3510_v58, 4  ;;  %v3507_v61 = vadd.f32 %v3506_v27, %v3505_v40  ;;  %v3953_v27 = vmul.f32 -1.442695, %v5339_v19 }
 0x9eb   :  { %v3512_v23 = vadd.f32 %v3511_v31, %v3510_v58  ;;  %v3550_v10 = vpop.permute.xlu0 %3549  ;;  %v3545_v42 = vpop.permute.xlu1 %3544  ;;  %v3659_v15 = vld [vmem:[#allocation5 + $0x6] sm:$0x3]  ;;  %v5822_v58 = vadd.f32 %v3536_v46, %v3528_v45  ;;  %4244 = vpow2.f32 %v3953_v27 }
 0x9ec   :  { %v3563_v20 = vmul.f32 %v3550_v10, %v5802_v35  ;;  %v3562_v24 = vmul.f32 %v3545_v42, %v5804_v29  ;;  %v3671_v6 = vrot.slane %v3659_v15, 2  ;;  %v3416_v53 = vpop.permute.xlu2 %3415 }
 0x9ed   :  { %v3513_v44 = vrot.slane %v3512_v23, 2  ;;  %v3429_v43 = vmul.f32 %v3416_v53, %v5720_v56  ;;  %v3564_v25 = vmul.f32 %v3555_v9, %v5822_v58 }
 0x9ee   :  { %v3684_v22 = vsel %vm1895_vm12, %v3683_v21, %v3671_v6  ;;  %v3567_v55 = vsel %vm75_vm0, %v3563_v20, 0.0  ;;  %v3566_v12 = vsel %vm75_vm0, %v3562_v24, 0.0  ;;  %v3602_v6 = vmul.f32 %v3590_v7, %v5802_v35 }
 0x9ef   :  { %v3514_v28 = vadd.f32 %v3513_v44, %v3512_v23  ;;  %v3693_v57 = vadd.f32 %v3691_v49, %v3684_v22  ;;  %v3568_v13 = vadd.f32 %v3567_v55, %v3566_v12  ;;  %v3575_v56 = vsel %vm75_vm0, %v3564_v25, 0.0  ;;  %v3589_v22 = vld [vmem:[#allocation2 + $0xe0] sm:$0xff] }
 0x9f1   :  { %v3515_v26 = vrot.slane %v3514_v28, 1  ;;  %v3735_v34 = vmul.f32 %v3733_v4, %v3693_v57  ;;  %v3569_v16 = vrot.slane %v3568_v13, 4  ;;  %v4245_v14 = vpop.eup %4244 }
 0x9f3   :  { %v3516_v3 = vadd.f32 %v3515_v26, %v3514_v28  ;;  %v3411_v5 = vpop.permute.xlu0 %3410  ;;  %3954 = vmatmul.msk.f32.vlgmr.msra.gmra.mxu2 %vm75_vm0, %v3735_v34  ;;  %v3570_v18 = vadd.f32 %v3569_v16, %v3568_v13 }
 0x9f4   :  { %v3428_v36 = vmul.f32 %v3411_v5, %v5718_v37  ;;  %v3433_v37 = vsel %vm75_vm0, %v3429_v43, 0.0 }
 0x9f5   :  { %v3519_v11 = vsel %vm1356_vm4, %v3516_v3, %v3507_v61  ;;  %v3571_v31 = vrot.slane %v3570_v18, 2 }
 0x9f6   :  { %3521 = vst.msk [vmem:[#allocation5 + $0xa] sm:$0x3] %vm1359_vm5, %v3519_v11  ;;  %v3432_v54 = vsel %vm75_vm0, %v3428_v36, 0.0 }
 0x9f7   :  { %v3434_v38 = vadd.f32 %v3433_v37, %v3432_v54  ;;  %v3572_v23 = vadd.f32 %v3571_v31, %v3570_v18  ;;  %v3604_v37 = vmul.f32 %v3592_v52, %v3541_v47  ;;  %v3595_v31 = vld [vmem:[#allocation3 + $0xf0] sm:$0xff] }
 0x9f9   :  { %v3435_v51 = vrot.slane %v3434_v38, 4  ;;  %v3573_v44 = vrot.slane %v3572_v23, 1 }
 0x9fb   :  { %v3560_v63 = vpop.permute.xlu1 %3559  ;;  %v3426_v8 = vpop.permute.xlu0 %3425  ;;  %v3436_v9 = vadd.f32 %v3435_v51, %v3434_v38  ;;  %v3574_v12 = vadd.f32 %v3573_v44, %v3572_v23  ;;  %v3702_v38 = vadd.f32 1.0, %v4245_v14 }
 0x9fc   :  { %v3565_v0 = vmul.f32 %v3560_v63, %v3541_v47  ;;  %v3431_v30 = vmul.f32 %v3426_v8, %v5744_v32  ;;  %v3601_v32 = vmul.f32 %v3589_v22, %v5804_v29  ;;  %v3612_v61 = vpop.permute.xlu2 %3611  ;;  %v3596_v63 = vld [vmem:[#allocation3 + $0xf8] sm:$0xff] }
 0x9fd   :  { %v3437_v21 = vrot.slane %v3436_v9, 2  ;;  %v3608_v51 = vadd.f32 %v3604_v37, %v3596_v63  ;;  %4246 = vrcp.f32 %v3702_v38  ;;  %vm3723_vm13 = vweird.f32 %v3702_v38 }
 0x9fe   :  { %v3576_v41 = vsel %vm75_vm0, %v3565_v0, 0.0  ;;  %v3442_v20 = vsel %vm75_vm0, %v3431_v30, 0.0  ;;  %v3605_v13 = vadd.f32 %v3601_v32, %v3593_v2 }
 0x9ff   :  { %v3577_v60 = vadd.f32 %v3576_v41, %v3575_v56  ;;  %v3438_v26 = vadd.f32 %v3437_v21, %v3436_v9  ;;  %v3591_v41 = vld [vmem:[#allocation2 + $0xf0] sm:$0xff] }
 0xa00   :  { %v3629_v29 = vmul.f32 %v3612_v61, %v3605_v13 }
 0xa01   :  { %v3578_v40 = vrot.slane %v3577_v60, 4  ;;  %v3439_v36 = vrot.slane %v3438_v26, 1 }
 0xa02   :  { %v3633_v16 = vsel %vm75_vm0, %v3629_v29, 0.0 }
 0xa03   :  { %v3579_v10 = vadd.f32 %v3578_v40, %v3577_v60  ;;  %v3421_v42 = vpop.permute.xlu1 %3420  ;;  %v3440_v33 = vadd.f32 %v3439_v36, %v3438_v26  ;;  %v3603_v60 = vmul.f32 %v3591_v41, %v5822_v58  ;;  %v3692_v36 = vmul.f32 %v5800_v1, %v5329_v50 }
 0xa04   :  { %v3430_v15 = vmul.f32 %v3421_v42, %v5752_v17  ;;  %v3594_v17 = vld [vmem:[#allocation3 + $0xe8] sm:$0xff]  ;;  %v3627_v0 = vpop.permute.xlu2 %3626 }
 0xa05   :  { %v3580_v62 = vrot.slane %v3579_v10, 2  ;;  %v3606_v55 = vadd.f32 %v3602_v6, %v3594_v17  ;;  %v3632_v8 = vmul.f32 %v3627_v0, %v3608_v51  ;;  %v3607_v40 = vadd.f32 %v3603_v60, %v3595_v31  ;;  %v3661_v17 = vld [vmem:[#allocation5 + $0xa] sm:$0x3] }
 0xa06   :  { %v3441_v24 = vsel %vm75_vm0, %v3430_v15, 0.0  ;;  %v3674_v2 = vrot.slane %v3661_v17, 6 }
 0xa07   :  { %v3581_v49 = vadd.f32 %v3580_v62, %v3579_v10  ;;  %v3443_v4 = vadd.f32 %v3442_v20, %v3441_v24  ;;  %v3643_v47 = vsel %vm75_vm0, %v3632_v8, 0.0  ;;  %v4247_v62 = vpop.eup %4246 }
 0xa08   :  { %v3719_v20 = vmul.f32 %v4247_v62, %v3702_v38  ;;  %vm3724_vm1 = vweird.f32 %v4247_v62 }
 0xa09   :  { %v3582_v28 = vrot.slane %v3581_v49, 1  ;;  %v3444_v57 = vrot.slane %v3443_v4, 4  ;;  %vm3725_vm6 = vmor %vm3723_vm13, %vm3724_vm1 }
 0xa0a   :  { %v3720_v21 = vsub.f32 1.0, %v3719_v20 }
 0xa0b   :  { %v3583_v34 = vadd.f32 %v3582_v28, %v3581_v49  ;;  %v3445_v3 = vadd.f32 %v3444_v57, %v3443_v4  ;;  %v3617_v35 = vpop.permute.xlu1 %3616 }
 0xa0c   :  { %v3630_v53 = vmul.f32 %v3617_v35, %v3606_v55  ;;  %v3721_v4 = vmul.f32 %v4247_v62, %v3720_v21  ;;  %v3729_v55 = vand.u32 2147483648, %v3702_v38 }
 0xa0d   :  { %v3586_v5 = vsel %vm1356_vm4, %v3583_v34, %v3574_v12  ;;  %v3446_v46 = vrot.slane %v3445_v3, 2  ;;  %v3727_v12 = vand.u32 2147483647, %v3702_v38 }
 0xa0e   :  { %3588 = vst.msk [vmem:[#allocation5 + $0xc] sm:$0x3] %vm1359_vm5, %v3586_v5  ;;  %v3634_v43 = vsel %vm75_vm0, %v3630_v53, 0.0  ;;  %v3722_v57 = vadd.f32 %v4247_v62, %v3721_v4 }
 0xa0f   :  { %v3447_v11 = vadd.f32 %v3446_v46, %v3445_v3  ;;  %v3635_v25 = vadd.f32 %v3634_v43, %v3633_v16  ;;  %v3730_v3 = vor.u32 1.1754944e-38, %v3729_v55  ;;  %vm3728_vm7 = vcmp.eq.f32.partialorder %v3727_v12, 8.507059e+37 }
 0xa10   :  { %v3726_v61 = vsel %vm3725_vm6, %v4247_v62, %v3722_v57 }
 0xa11   :  { %v3448_v45 = vrot.slane %v3447_v11, 1  ;;  %v3636_v56 = vrot.slane %v3635_v25, 4  ;;  %v3731_v5 = vsel %vm3728_vm7, %v3730_v3, %v3726_v61 }
 0xa12   :  { %v3734_v43 = vmul.f32 %v3731_v5, %v5339_v19 }
 0xa13   :  { %v3449_v54 = vadd.f32 %v3448_v45, %v3447_v11  ;;  %v3637_v30 = vadd.f32 %v3636_v56, %v3635_v25 }
 0xa15   :  { %v3452_v18 = vsel %vm1356_vm4, %v3449_v54, %v3440_v33  ;;  %v3638_v42 = vrot.slane %v3637_v30, 2  ;;  %v3662_v34 = vld [vmem:[#allocation5 + $0xc] sm:$0x3] }
 0xa16   :  { %3454 = vst.msk [vmem:[#allocation5 + $0x8] sm:$0x3] %vm1359_vm5, %v3452_v18  ;;  %v3677_v53 = vrot.slane %v3662_v34, 4 }
 0xa17   :  { %v3639_v24 = vadd.f32 %v3638_v42, %v3637_v30 }
 0xa19   :  { %v3640_v58 = vrot.slane %v3639_v24, 1 }
 0xa1b   :  { %v3622_v23 = vpop.permute.xlu0 %3621  ;;  %v3641_v32 = vadd.f32 %v3640_v58, %v3639_v24 }
 0xa1c   :  { %v3631_v9 = vmul.f32 %v3622_v23, %v3607_v40 }
 0xa1d   :  { %v3660_v26 = vld [vmem:[#allocation5 + $0x8] sm:$0x3] }
 0xa1e   :  { %v3642_v10 = vsel %vm75_vm0, %v3631_v9, 0.0  ;;  %v3685_v35 = vsel %vm1891_vm10, %v3660_v26, %v3674_v2 }
 0xa1f   :  { %v3644_v15 = vadd.f32 %v3643_v47, %v3642_v10  ;;  %v3686_v29 = vsel %vm1893_vm11, %v3685_v35, %v3677_v53 }
 0xa21   :  { %v3645_v7 = vrot.slane %v3644_v15, 4 }
 0xa23   :  { %v3646_v6 = vadd.f32 %v3645_v7, %v3644_v15 }
 0xa25   :  { %v3647_v44 = vrot.slane %v3646_v6, 2 }
 0xa27   :  { %v3648_v49 = vadd.f32 %v3647_v44, %v3646_v6 }
 0xa29   :  { %v3649_v22 = vrot.slane %v3648_v49, 1 }
 0xa2b   :  { %v3650_v27 = vadd.f32 %v3649_v22, %v3648_v49 }
 0xa2d   :  { %v3653_v28 = vsel %vm1356_vm4, %v3650_v27, %v3641_v32 }
 0xa2e   :  { %3655 = vst.msk [vmem:[#allocation5 + $0xe] sm:$0x3] %vm1359_vm5, %v3653_v28 }
 0xa35   :  { %v3663_v13 = vld [vmem:[#allocation5 + $0xe] sm:$0x3] }
 0xa36   :  { %v3680_v46 = vrot.slane %v3663_v13, 2 }
 0xa38   :  { %v3687_v11 = vsel %vm1895_vm12, %v3686_v29, %v3680_v46 }
 0xa39   :  { %v3694_v45 = vadd.f32 %v3692_v36, %v3687_v11 }
 0xa3b   :  { %v3736_v16 = vmul.f32 %v3734_v43, %v3694_v45 }
 0xa3d   :  { %3955 = vmatmul.msk.f32.gmra.mxu2 %vm75_vm0, %v3736_v16 }
 0xa76   :  { %v3760_v14 = vpop.f32.mrf.mxu2 }
 0xa77   :  { %v3766_v33 = vadd.f32 %v3760_v14, %v5177_v59 }
 0xa79   :  { %v3768_v54 = vmul.f32 %v3766_v33, %v3766_v33 }
 0xa7b   :  { %v3770_v52 = vsel %vm163_vm3, %v3768_v54, 0.0 }
 0xa7c   :  { %3771 = vadd.xlane.f32.xlu1 %v3770_v52 }
 0xac0   :  { %v3763_v25 = vpop.f32.mrf.mxu2 }
 0xac1   :  { %v3767_v37 = vadd.f32 %v3763_v25, %v5183_v48  ;;  %v4053_v48 = vld [vmem:[%s5883_s14] ss:$0 sm:$0xff]  ;;  %s4281_s14 = smov [#allocation6]  }
 0xac2   :  { %s3814_s6 = sshll.u32 %s4281_s14, 4  ;;  %s3815_s6 = int_to_ptr.vmem [resolvable:$true] %s3814_s6 }
 0xac3   :  { %v3769_v18 = vmul.f32 %v3767_v37, %v3767_v37 }
 0xac5   :  { %v3773_v50 = vsel %vm163_vm3, %v3769_v18, 0.0 }
 0xac6   :  { %3774 = vadd.xlane.f32.xlu0 %v3773_v50 }
 0xaef   :  { %v3772_v1 = vpop.xlane.xlu1 %3771 }
 0xaf0   :  { %v3776_v19 = vmul.f32 %v3772_v1, %v4441_v39 }
 0xaf2   :  { %v3778_v38 = vadd.f32 1e-05, %v3776_v19 }
 0xaf4   :  { %4248 = vrsqrt.f32 %v3778_v38  ;;  %vm3786_vm4 = vweird.f32 %v3778_v38 }
 0xafa   :  { %v4249_v63 = vpop.eup %4248 }
 0xafb   :  { %v3781_v0 = vmul.f32 %v4249_v63, %v3778_v38  ;;  %vm3787_vm0 = vweird.f32 %v4249_v63 }
 0xafc   :  { %vm3788_vm5 = vmor %vm3786_vm4, %vm3787_vm0 }
 0xafd   :  { %v3782_v56 = vmul.f32 %v4249_v63, %v3781_v0 }
 0xaff   :  { %v3783_v59 = vmul.f32 0.5, %v3782_v56 }
 0xb01   :  { %v3784_v41 = vsub.f32 1.5, %v3783_v59 }
 0xb03   :  { %v3785_v31 = vmul.f32 %v4249_v63, %v3784_v41 }
 0xb05   :  { %v3789_v51 = vsel %vm3788_vm5, %v4249_v63, %v3785_v31 }
 0xb06   :  { %v3800_v60 = vmul.f32 %v3789_v51, %v3766_v33 }
 0xb08   :  { %v3806_v8 = vmul.f32 %v4053_v48, %v3800_v60 }
 0xb0a   :  { %3808 = vst.msk [vmem:[#allocation6] sm:$0xff] %vm163_vm3, %v3806_v8 }
 0xb39   :  { %v3775_v40 = vpop.xlane.xlu0 %3774 }
 0xb3a   :  { %v3777_v30 = vmul.f32 %v3775_v40, %v4441_v39 }
 0xb3c   :  { %v3779_v23 = vadd.f32 1e-05, %v3777_v30 }
 0xb3e   :  { %4250 = vrsqrt.f32 %v3779_v23  ;;  %vm3796_vm11 = vweird.f32 %v3779_v23 }
 0xb44   :  { %v4251_v9 = vpop.eup %4250 }
 0xb45   :  { %v3791_v47 = vmul.f32 %v4251_v9, %v3779_v23  ;;  %vm3797_vm10 = vweird.f32 %v4251_v9 }
 0xb46   :  { %vm3798_vm12 = vmor %vm3796_vm11, %vm3797_vm10 }
 0xb47   :  { %v3792_v10 = vmul.f32 %v4251_v9, %v3791_v47 }
 0xb49   :  { %v3793_v42 = vmul.f32 0.5, %v3792_v10 }
 0xb4b   :  { %v3794_v15 = vsub.f32 1.5, %v3793_v42 }
 0xb4d   :  { %v3795_v62 = vmul.f32 %v4251_v9, %v3794_v15 }
 0xb4f   :  { %v3799_v7 = vsel %vm3798_vm12, %v4251_v9, %v3795_v62 }
 0xb50   :  { %v3801_v20 = vmul.f32 %v3799_v7, %v3767_v37 }
 0xb52   :  { %v3807_v39 = vmul.f32 %v4053_v48, %v3801_v20 }
 0xb54   :  { %3809 = vst.msk [vmem:[#allocation6 + $0x8] sm:$0xff] %vm163_vm3, %v3807_v39 }
 0xb55   :  { %3822 = dma.vmem_to_hbm [thread:$0]  %s3815_s6, 256, %s3817_s7, [#allocation7], %s4282_s8, %s4282_s8, %s4283_s9  }
 0xb56   :  { %4276 = dma.done.wait [#allocation7], 256  }
 0xb57   :  { %4277 = vsyncadd [#allocation7], 4294967040 }
 0xb58   :  { %3827 = vsyncpa [#allocation7], 1 }

</bundles_post_ra>
